<compile_context>
chip_gen: v6e
topology: v6e:2x2x1
jax: 0.10.0
libtpu: 0.0.40
codegen_flags: <defaults>
</compile_context>

<pallas_src>
import functools

import jax
import jax.numpy as jnp
from jax.experimental import pallas as pl
from jax.experimental.pallas import tpu as pltpu


# ------------------------------ kernel helpers ------------------------------ #

def _silu(v):
    return v * jax.nn.sigmoid(v)


def _group_norm(v, gamma, beta, gdown, gup, *, eps=1e-5):
    """GroupNorm on a lane-dense (C, L) f32 block for ONE sample.

    Reduce-first statistics: lane reductions give (C, 1) columns; the per-group combine
    is two tiny matmuls with the factored membership matrices
      gdown: (groups, C) with 1 for group membership,
      gup:   (C, groups) with 1/(group_size*L) for group membership.
    Two-pass (centered) variance; the centered activation feeds the normalization.
    """
    s1 = jnp.sum(v, axis=-1, keepdims=True)                                 # (C, 1)
    mean = jnp.dot(gup, jnp.dot(gdown, s1, preferred_element_type=jnp.float32),
                   preferred_element_type=jnp.float32)                      # (C, 1)
    xc = v - mean
    s2 = jnp.sum(xc * xc, axis=-1, keepdims=True)                           # (C, 1)
    var = jnp.dot(gup, jnp.dot(gdown, s2, preferred_element_type=jnp.float32),
                  preferred_element_type=jnp.float32)                       # (C, 1)
    inv = jax.lax.rsqrt(var + eps)
    return xc * (inv * gamma) + beta


def _conv3x3_im2col(v, w_refs, bias, masks, *, H, W, extra=None, cast_early=True):
    """3x3 conv (padding=1) on a lane-dense (C_src, N) activation, N = n_seg*H*W.

    Chunked im2col: for each kernel row ky the 3 shifted taps (pltpu.roll on the lane
    axis + precomputed 0/1 boundary masks) are stacked into a (3*C_src, N) bf16 block
    and multiplied against that row's weight slab, accumulating in f32.  `extra` (bf16
    rows) is appended to the last chunk (used to fuse the 1x1 residual conv in).
    bf16 matmul operands with f32 accumulation: intentional inference-grade precision.
    """
    N = v.shape[-1]
    vb = v.astype(jnp.bfloat16) if cast_early else v
    out = None
    for ky in range(3):
        pieces = []
        for kx in range(3):
            d = (ky - 1) * W + (kx - 1)            # flattened source offset
            # want s[c, p] = v[c, p + d]  (jnp.roll semantics: roll by -d)
            s = vb if d == 0 else pltpu.roll(vb, shift=(-d) % N, axis=1)
            k = ky * 3 + kx
            if k != 4:                             # center tap needs no boundary mask
                s = s * masks[k:k + 1, :]          # (1, N) bf16 {0,1}, zero invalid lanes
            if not cast_early:                     # v5e-friendly: mask/select in f32
                s = s.astype(jnp.bfloat16)
            pieces.append(s)
        if ky == 2 and extra is not None:
            pieces.append(extra)                   # fused 1x1 residual rows (bf16)
        stack = jnp.concatenate(pieces, axis=0)    # (3*C_src [+ C_extra], N) bf16
        part = jnp.dot(w_refs[ky][...], stack, preferred_element_type=jnp.float32)
        out = part if out is None else out + part
    return out + bias


# ---------------------------------- kernel ----------------------------------- #

def residual_block_kernel(feature_ref, time_ref, masks_ref,
                          gn1_g_ref, gn1_b_ref, gdn1_ref, gup1_ref,
                          c1w0_ref, c1w1_ref, c1w2_ref, c1b_ref,
                          lin_w_ref, lin_b_ref,
                          gn2_g_ref, gn2_b_ref, gdn2_ref, gup2_ref,
                          c2w0_ref, c2w1_ref, c2w2_ref, c2b_ref,
                          out_ref, *, H, W, batch_block, use_res_conv, cast_early):
    HW = H * W
    masks = masks_ref[...]                         # (9, N) bf16 {0,1}

    def per_sample(v, fn):
        # Apply `fn(slice, sample_idx)` per 128-aligned per-sample lane segment.
        if batch_block == 1:
            return fn(v, 0)
        return jnp.concatenate(
            [fn(v[:, s * HW:(s + 1) * HW], s) for s in range(batch_block)], axis=-1)

    x = feature_ref[...]                           # (C_in, N) f32

    # ---- groupnorm_feature -> silu -> conv_feature ------------------------------
    h = per_sample(x, lambda vs, s: _group_norm(vs, gn1_g_ref[...], gn1_b_ref[...],
                                                gdn1_ref[...], gup1_ref[...]))
    h = _silu(h)
    h = _conv3x3_im2col(h, (c1w0_ref, c1w1_ref, c1w2_ref), c1b_ref[...], masks,
                        H=H, W=W, cast_early=cast_early)          # (C_out, N) f32

    # ---- time embedding (per sample) + groupnorm_merged -> silu -----------------
    t = _silu(time_ref[...])                       # (batch_block, n_time) f32

    def merge_and_norm(hs, s):
        t_emb = jnp.sum(lin_w_ref[...] * t[s:s + 1, :], axis=-1, keepdims=True)
        hs = hs + (t_emb + lin_b_ref[...])
        return _group_norm(hs, gn2_g_ref[...], gn2_b_ref[...],
                           gdn2_ref[...], gup2_ref[...])

    m = per_sample(h, merge_and_norm)
    m = _silu(m)

    # ---- conv_merged (+ fused 1x1 residual conv) --------------------------------
    extra = x.astype(jnp.bfloat16) if use_res_conv else None
    m = _conv3x3_im2col(m, (c2w0_ref, c2w1_ref, c2w2_ref), c2b_ref[...], masks,
                        H=H, W=W, extra=extra, cast_early=cast_early)

    if not use_res_conv:                           # identity residual path
        m = m + x

    out_ref[...] = m.astype(out_ref.dtype)


# --------------------------------- wrapper ------------------------------------ #

def _conv_tap_masks(H, W, n_seg):
    """(9, n_seg*H*W) bf16 {0,1} validity masks for the 9 taps of a 3x3 conv, pad=1."""
    HW = H * W
    p = jnp.arange(n_seg * HW) % HW                # per-sample flat pixel index
    y, x = p // W, p % W
    rows = []
    for ky in range(3):
        for kx in range(3):
            dy, dx = ky - 1, kx - 1
            m = jnp.ones_like(p, dtype=bool)
            if dy == -1:
                m = m & (y >= 1)
            if dy == 1:
                m = m & (y <= H - 2)
            if dx == -1:
                m = m & (x >= 1)
            if dx == 1:
                m = m & (x <= W - 2)
            rows.append(m)
    return jnp.stack(rows, axis=0).astype(jnp.bfloat16)


def _param_spec(a, single_buffer):
    zeros = (0,) * a.ndim
    idx = lambda g, _z=zeros: _z  # noqa: E731
    if single_buffer:
        # Constant block index -> one resident copy is enough; halves weight VMEM.
        return pl.BlockSpec(a.shape, idx, pipeline_mode=pl.Buffered(1))
    return pl.BlockSpec(a.shape, idx)


def residual_block_forward(feature, time, params, *, groups=32, batch_block=1,
                           cast_im2col_early=True):
    B, C_in, H, W = feature.shape
    HW = H * W
    n_time = time.shape[1]
    C_out = params["conv1_b"].shape[0]
    use_res_conv = (C_in != C_out)
    assert C_in % groups == 0 and C_out % groups == 0, "GroupNorm(32, C) needs C % 32 == 0"
    assert B % batch_block == 0
    n_steps = B // batch_block
    N = batch_block * HW
    # NOTE: on v7x keep n_steps >= 2 so both TensorCores get work; if B == 1, prefer a
    # second "parallel" grid axis (e.g. C_out tiles) over batch folding.

    f32, bf16 = jnp.float32, jnp.bfloat16

    def col(a, C):
        return a.reshape(C, 1).astype(f32)

    def conv_chunks(w):
        # torch (C_o, C_s, 3, 3) -> 3 slabs (C_o, 3*C_s) bf16, tap-major / channel-minor.
        C_o, C_s = w.shape[0], w.shape[1]
        w9 = jnp.transpose(w, (0, 2, 3, 1)).reshape(C_o, 9 * C_s)
        return [w9[:, ky * 3 * C_s:(ky + 1) * 3 * C_s].astype(bf16) for ky in range(3)]

    def group_mats(C):
        cg = C // groups
        gid = jnp.arange(C) // cg
        memb = (jnp.arange(groups)[:, None] == gid[None, :]).astype(f32)   # (groups, C)
        return memb, memb.T / float(cg * HW)                               # gdown, gup

    gdn1, gup1 = group_mats(C_in)
    gdn2, gup2 = group_mats(C_out)

    c1w = conv_chunks(params["conv1_w"])
    c2w = conv_chunks(params["conv2_w"])
    c2b = params["conv2_b"]
    if use_res_conv:
        # Fuse the 1x1 residual conv into the last conv2 chunk.
        c2w[2] = jnp.concatenate(
            [c2w[2], params["res_w"].reshape(C_out, C_in).astype(bf16)], axis=1)
        c2b = c2b + params["res_b"]

    masks = _conv_tap_masks(H, W, batch_block)                              # (9, N) bf16

    weights = [masks,
               col(params["gn1_g"], C_in), col(params["gn1_b"], C_in), gdn1, gup1,
               c1w[0], c1w[1], c1w[2], col(params["conv1_b"], C_out),
               params["lin_w"].astype(f32), col(params["lin_b"], C_out),
               col(params["gn2_g"], C_out), col(params["gn2_b"], C_out), gdn2, gup2,
               c2w[0], c2w[1], c2w[2], col(c2b, C_out)]

    # Lane-dense presentation: (n_steps, C, batch_block*HW); batch_block samples are
    # folded onto the lane axis of each block (layout plumbing done once in the wrapper).
    feat = feature.reshape(n_steps, batch_block, C_in, HW)
    feat = jnp.transpose(feat, (0, 2, 1, 3)).reshape(n_steps, C_in, N)
    time2 = time.reshape(n_steps, batch_block, n_time)

    # VMEM budget: weights (x2 to also cover the double-buffered fallback), double-
    # buffered activation/output blocks, and rough in-kernel f32/bf16 temporaries.
    def nbytes(a):
        return a.size * a.dtype.itemsize
    need = (2 * sum(nbytes(w) for w in weights)
            + 2 * 4 * (C_in * N + batch_block * n_time + C_out * N)
            + 8 * 4 * C_out * N
            + 2 * 2 * (3 * max(C_in, C_out) + C_in) * N
            + (4 << 20))
    # Only override the compiler default when we actually need more than ~32 MiB.
    vmem_limit = None if need <= (32 << 20) else min(int(need), 100 << 20)

    def call(single_buffer_weights, cast_early):
        kernel = functools.partial(residual_block_kernel, H=H, W=W,
                                   batch_block=batch_block, use_res_conv=use_res_conv,
                                   cast_early=cast_early)
        return pl.pallas_call(
            kernel,
            out_shape=jax.ShapeDtypeStruct((n_steps, C_out, N), feature.dtype),
            grid=(n_steps,),
            in_specs=[pl.BlockSpec((None, C_in, N), lambda g: (g, 0, 0)),
                      pl.BlockSpec((None, batch_block, n_time), lambda g: (g, 0, 0))]
                     + [_param_spec(w, single_buffer_weights) for w in weights],
            out_specs=pl.BlockSpec((None, C_out, N), lambda g: (g, 0, 0)),
            compiler_params=pltpu.CompilerParams(
                dimension_semantics=("parallel",),
                vmem_limit_bytes=vmem_limit),
        )(feat, time2, *weights)

    # Preferred configuration first; fall back gracefully if this jax/libtpu build
    # rejects single-buffered BlockSpecs (pl.Buffered(1)) or bf16 lane rotates.
    configs = [(True, cast_im2col_early), (False, cast_im2col_early)]
    if cast_im2col_early:
        configs.append((False, False))
    out2, errs = None, []
    for single_buf, cast_early in configs:
        try:
            out2 = jax.block_until_ready(call(single_buf, cast_early))
            break
        except Exception as e:  # noqa: BLE001 - try the next (more conservative) config
            errs.append(e)
    if out2 is None:
        raise errs[-1]

    out = out2.reshape(n_steps, C_out, batch_block, HW)
    out = jnp.transpose(out, (0, 2, 1, 3)).reshape(B, C_out, H, W)
    return out


# ----------------------------- pure-JAX reference ----------------------------- #

def residual_block_reference(feature, time, params, *, groups=32, eps=1e-5):
    def gn(v, g, b):
        B, C, H, W = v.shape
        vg = v.reshape(B, groups, -1)
        m = vg.mean(axis=2, keepdims=True)
        var = vg.var(axis=2, keepdims=True)
        vn = ((vg - m) / jnp.sqrt(var + eps)).reshape(B, C, H, W)
        return vn * g.reshape(1, C, 1, 1) + b.reshape(1, C, 1, 1)

    def silu(v):
        return v * jax.nn.sigmoid(v)

    def conv(v, w, b, pad):
        out = jax.lax.conv_general_dilated(
            v, w, (1, 1), [(pad, pad), (pad, pad)],
            dimension_numbers=("NCHW", "OIHW", "NCHW"))
        return out + b.reshape(1, -1, 1, 1)

    h = conv(silu(gn(feature, params["gn1_g"], params["gn1_b"])),
             params["conv1_w"], params["conv1_b"], 1)
    t = silu(time) @ params["lin_w"].T + params["lin_b"]
    merged = h + t[:, :, None, None]
    m = conv(silu(gn(merged, params["gn2_g"], params["gn2_b"])),
             params["conv2_w"], params["conv2_b"], 1)
    if feature.shape[1] != params["conv1_b"].shape[0]:
        res = conv(feature, params["res_w"], params["res_b"], 0)
    else:
        res = feature
    return m + res


# ------------------------------------ main ------------------------------------ #

def _make_params(key, C_in, C_out, n_time):
    ks = jax.random.split(key, 12)
    p = {
        "gn1_g": 1.0 + 0.1 * jax.random.normal(ks[0], (C_in,), jnp.float32),
        "gn1_b": 0.1 * jax.random.normal(ks[1], (C_in,), jnp.float32),
        "conv1_w": 0.1 * jax.random.normal(ks[2], (C_out, C_in, 3, 3), jnp.float32),
        "conv1_b": 0.1 * jax.random.normal(ks[3], (C_out,), jnp.float32),
        "lin_w": 0.1 * jax.random.normal(ks[4], (C_out, n_time), jnp.float32),
        "lin_b": 0.1 * jax.random.normal(ks[5], (C_out,), jnp.float32),
        "gn2_g": 1.0 + 0.1 * jax.random.normal(ks[6], (C_out,), jnp.float32),
        "gn2_b": 0.1 * jax.random.normal(ks[7], (C_out,), jnp.float32),
        "conv2_w": 0.1 * jax.random.normal(ks[8], (C_out, C_out, 3, 3), jnp.float32),
        "conv2_b": 0.1 * jax.random.normal(ks[9], (C_out,), jnp.float32),
    }
    if C_in != C_out:  # 1x1 residual conv path
        p["res_w"] = 0.1 * jax.random.normal(ks[10], (C_out, C_in, 1, 1), jnp.float32)
        p["res_b"] = 0.1 * jax.random.normal(ks[11], (C_out,), jnp.float32)
    return p


def _run_case(name, key, B, C_in, C_out, H, W, n_time, batch_block):
    kp, kf, kt = jax.random.split(key, 3)
    params = _make_params(kp, C_in, C_out, n_time)
    feature = jax.random.normal(kf, (B, C_in, H, W), jnp.float32)
    time = jax.random.normal(kt, (B, n_time), jnp.float32)

    out = jax.block_until_ready(
        residual_block_forward(feature, time, params, batch_block=batch_block))
    ref = residual_block_reference(feature, time, params)

    assert out.shape == ref.shape, (name, out.shape, ref.shape)
    assert bool(jnp.all(jnp.isfinite(out))), name
    # bf16 matmul operands (f32 accumulation) vs. the XLA reference.
    max_err = float(jnp.max(jnp.abs(out - ref)))
    rel_err = float(jnp.linalg.norm((out - ref).ravel())
                    / (jnp.linalg.norm(ref.ravel()) + 1e-12))
    assert max_err < 2.5e-1 and rel_err < 2e-2, (name, max_err, rel_err)


if __name__ == "__main__":
    root = jax.random.PRNGKey(0)
    k0, k1, k2 = jax.random.split(root, 3)
    # 1x1-residual-conv path; 2 "parallel" grid steps (keeps both v7x TensorCores busy).
    _run_case("res_conv", k0, B=2, C_in=32, C_out=64, H=16, W=16, n_time=64,
              batch_block=1)
    # Identity-residual path; whole batch folded onto the lane axis (single wide step,
    # the best setting on single-TensorCore v5e/v6e); exercises per-sample GN segments.
    _run_case("identity_folded", k1, B=2, C_in=64, C_out=64, H=16, W=16, n_time=64,
              batch_block=2)
    # Residual-conv path with batch folding (fused residual + segmented GroupNorm).
    _run_case("res_conv_folded", k2, B=2, C_in=32, C_out=64, H=16, W=16, n_time=64,
              batch_block=2)
    print("KERNEL_OK")
</pallas_src>

<mosaic_0001>
module attributes {stable_mosaic.version = 11 : i64} {
  func.func @residual_block_kernel(%arg0: i32, %arg1: memref<1x32x256xf32, #tpu.memory_space<vmem>>, %arg2: memref<1x1x64xf32, #tpu.memory_space<vmem>>, %arg3: memref<9x256xbf16, #tpu.memory_space<vmem>>, %arg4: memref<32x1xf32, #tpu.memory_space<vmem>>, %arg5: memref<32x1xf32, #tpu.memory_space<vmem>>, %arg6: memref<32x32xf32, #tpu.memory_space<vmem>>, %arg7: memref<32x32xf32, #tpu.memory_space<vmem>>, %arg8: memref<64x96xbf16, #tpu.memory_space<vmem>>, %arg9: memref<64x96xbf16, #tpu.memory_space<vmem>>, %arg10: memref<64x96xbf16, #tpu.memory_space<vmem>>, %arg11: memref<64x1xf32, #tpu.memory_space<vmem>>, %arg12: memref<64x64xf32, #tpu.memory_space<vmem>>, %arg13: memref<64x1xf32, #tpu.memory_space<vmem>>, %arg14: memref<64x1xf32, #tpu.memory_space<vmem>>, %arg15: memref<64x1xf32, #tpu.memory_space<vmem>>, %arg16: memref<32x64xf32, #tpu.memory_space<vmem>>, %arg17: memref<64x32xf32, #tpu.memory_space<vmem>>, %arg18: memref<64x192xbf16, #tpu.memory_space<vmem>>, %arg19: memref<64x192xbf16, #tpu.memory_space<vmem>>, %arg20: memref<64x224xbf16, #tpu.memory_space<vmem>>, %arg21: memref<64x1xf32, #tpu.memory_space<vmem>>, %arg22: memref<1x64x256xf32, #tpu.memory_space<vmem>>) attributes {dimension_semantics = [#tpu.dimension_semantics<parallel>], iteration_bounds = array<i64: 2>, scalar_prefetch = 0 : i64, scratch_operands = 0 : i64, tpu.core_type = #tpu.core_type<tc>, window_params = [{transform_indices = @transform_0, window_bounds = array<i64: 1, 32, 256>}, {transform_indices = @transform_1, window_bounds = array<i64: 1, 1, 64>}, {pipeline_mode = #tpu.pipeline_mode<synchronous>, transform_indices = @transform_2, window_bounds = array<i64: 9, 256>}, {pipeline_mode = #tpu.pipeline_mode<synchronous>, transform_indices = @transform_3, window_bounds = array<i64: 32, 1>}, {pipeline_mode = #tpu.pipeline_mode<synchronous>, transform_indices = @transform_4, window_bounds = array<i64: 32, 1>}, {pipeline_mode = #tpu.pipeline_mode<synchronous>, transform_indices = @transform_5, window_bounds = array<i64: 32, 32>}, {pipeline_mode = #tpu.pipeline_mode<synchronous>, transform_indices = @transform_6, window_bounds = array<i64: 32, 32>}, {pipeline_mode = #tpu.pipeline_mode<synchronous>, transform_indices = @transform_7, window_bounds = array<i64: 64, 96>}, {pipeline_mode = #tpu.pipeline_mode<synchronous>, transform_indices = @transform_8, window_bounds = array<i64: 64, 96>}, {pipeline_mode = #tpu.pipeline_mode<synchronous>, transform_indices = @transform_9, window_bounds = array<i64: 64, 96>}, {pipeline_mode = #tpu.pipeline_mode<synchronous>, transform_indices = @transform_10, window_bounds = array<i64: 64, 1>}, {pipeline_mode = #tpu.pipeline_mode<synchronous>, transform_indices = @transform_11, window_bounds = array<i64: 64, 64>}, {pipeline_mode = #tpu.pipeline_mode<synchronous>, transform_indices = @transform_12, window_bounds = array<i64: 64, 1>}, {pipeline_mode = #tpu.pipeline_mode<synchronous>, transform_indices = @transform_13, window_bounds = array<i64: 64, 1>}, {pipeline_mode = #tpu.pipeline_mode<synchronous>, transform_indices = @transform_14, window_bounds = array<i64: 64, 1>}, {pipeline_mode = #tpu.pipeline_mode<synchronous>, transform_indices = @transform_15, window_bounds = array<i64: 32, 64>}, {pipeline_mode = #tpu.pipeline_mode<synchronous>, transform_indices = @transform_16, window_bounds = array<i64: 64, 32>}, {pipeline_mode = #tpu.pipeline_mode<synchronous>, transform_indices = @transform_17, window_bounds = array<i64: 64, 192>}, {pipeline_mode = #tpu.pipeline_mode<synchronous>, transform_indices = @transform_18, window_bounds = array<i64: 64, 192>}, {pipeline_mode = #tpu.pipeline_mode<synchronous>, transform_indices = @transform_19, window_bounds = array<i64: 64, 224>}, {pipeline_mode = #tpu.pipeline_mode<synchronous>, transform_indices = @transform_20, window_bounds = array<i64: 64, 1>}, {transform_indices = @transform_21, window_bounds = array<i64: 1, 64, 256>}]} {
    %c0 = arith.constant 0 : index
    %c0_0 = arith.constant 0 : index
    %0 = vector.load %arg3[%c0, %c0_0] : memref<9x256xbf16, #tpu.memory_space<vmem>>, vector<9x256xbf16>
    %c0_1 = arith.constant 0 : index
    %c0_2 = arith.constant 0 : index
    %c0_3 = arith.constant 0 : index
    %1 = vector.load %arg1[%c0_1, %c0_2, %c0_3] : memref<1x32x256xf32, #tpu.memory_space<vmem>>, vector<1x32x256xf32>
    %2 = vector.shape_cast %1 : vector<1x32x256xf32> to vector<32x256xf32>
    %c0_4 = arith.constant 0 : index
    %c0_5 = arith.constant 0 : index
    %3 = vector.load %arg4[%c0_4, %c0_5] : memref<32x1xf32, #tpu.memory_space<vmem>>, vector<32x1xf32>
    %c0_6 = arith.constant 0 : index
    %c0_7 = arith.constant 0 : index
    %4 = vector.load %arg5[%c0_6, %c0_7] : memref<32x1xf32, #tpu.memory_space<vmem>>, vector<32x1xf32>
    %c0_8 = arith.constant 0 : index
    %c0_9 = arith.constant 0 : index
    %5 = vector.load %arg6[%c0_8, %c0_9] : memref<32x32xf32, #tpu.memory_space<vmem>>, vector<32x32xf32>
    %c0_10 = arith.constant 0 : index
    %c0_11 = arith.constant 0 : index
    %6 = vector.load %arg7[%c0_10, %c0_11] : memref<32x32xf32, #tpu.memory_space<vmem>>, vector<32x32xf32>
    %cst = arith.constant dense<0.000000e+00> : vector<32xf32>
    %7 = vector.multi_reduction <add>, %2, %cst [1] : vector<32x256xf32> to vector<32xf32>
    %8 = vector.shape_cast %7 : vector<32xf32> to vector<32x1xf32>
    %cst_12 = arith.constant dense<0.000000e+00> : vector<32x1xf32>
    %9 = tpu.matmul %5, %8, %cst_12 {dimension_numbers = #tpu.dot_dimension_numbers<[1], [0], [0], [1], [0, 0, 1, 1], [], []>} : vector<32x32xf32>, vector<32x1xf32>, vector<32x1xf32> -> vector<32x1xf32>
    %cst_13 = arith.constant dense<0.000000e+00> : vector<32x1xf32>
    %10 = tpu.matmul %6, %9, %cst_13 {dimension_numbers = #tpu.dot_dimension_numbers<[1], [0], [0], [1], [0, 0, 1, 1], [], []>} : vector<32x32xf32>, vector<32x1xf32>, vector<32x1xf32> -> vector<32x1xf32>
    %11 = vector.broadcast %10 : vector<32x1xf32> to vector<32x256xf32>
    %12 = arith.subf %2, %11 : vector<32x256xf32>
    %13 = arith.mulf %12, %12 : vector<32x256xf32>
    %cst_14 = arith.constant dense<0.000000e+00> : vector<32xf32>
    %14 = vector.multi_reduction <add>, %13, %cst_14 [1] : vector<32x256xf32> to vector<32xf32>
    %15 = vector.shape_cast %14 : vector<32xf32> to vector<32x1xf32>
    %cst_15 = arith.constant dense<0.000000e+00> : vector<32x1xf32>
    %16 = tpu.matmul %5, %15, %cst_15 {dimension_numbers = #tpu.dot_dimension_numbers<[1], [0], [0], [1], [0, 0, 1, 1], [], []>} : vector<32x32xf32>, vector<32x1xf32>, vector<32x1xf32> -> vector<32x1xf32>
    %cst_16 = arith.constant dense<0.000000e+00> : vector<32x1xf32>
    %17 = tpu.matmul %6, %16, %cst_16 {dimension_numbers = #tpu.dot_dimension_numbers<[1], [0], [0], [1], [0, 0, 1, 1], [], []>} : vector<32x32xf32>, vector<32x1xf32>, vector<32x1xf32> -> vector<32x1xf32>
    %cst_17 = arith.constant 9.99999974E-6 : f32
    %18 = vector.broadcast %cst_17 : f32 to vector<32x1xf32>
    %19 = arith.addf %17, %18 : vector<32x1xf32>
    %20 = math.rsqrt %19 : vector<32x1xf32>
    %21 = arith.mulf %20, %3 : vector<32x1xf32>
    %22 = vector.broadcast %21 : vector<32x1xf32> to vector<32x256xf32>
    %23 = arith.mulf %12, %22 : vector<32x256xf32>
    %24 = vector.broadcast %4 : vector<32x1xf32> to vector<32x256xf32>
    %25 = arith.addf %23, %24 : vector<32x256xf32>
    %26 = arith.negf %25 : vector<32x256xf32>
    %27 = math.exp %26 : vector<32x256xf32>
    %cst_18 = arith.constant 1.000000e+00 : f32
    %28 = vector.broadcast %cst_18 : f32 to vector<32x256xf32>
    %29 = arith.addf %28, %27 : vector<32x256xf32>
    %30 = arith.divf %28, %29 : vector<32x256xf32>
    %31 = arith.mulf %25, %30 : vector<32x256xf32>
    %c0_19 = arith.constant 0 : index
    %c0_20 = arith.constant 0 : index
    %32 = vector.load %arg11[%c0_19, %c0_20] : memref<64x1xf32, #tpu.memory_space<vmem>>, vector<64x1xf32>
    %33 = arith.truncf %31 : vector<32x256xf32> to vector<32x256xbf16>
    %c17_i32 = arith.constant 17 : i32
    %34 = tpu.dynamic_rotate %33 by %c17_i32 dim 1 : vector<32x256xbf16>, i32 -> vector<32x256xbf16>
    %35 = vector.extract_strided_slice %0 {offsets = [0, 0], sizes = [1, 256], strides = [1, 1]} : vector<9x256xbf16> to vector<1x256xbf16>
    %36 = vector.broadcast %35 : vector<1x256xbf16> to vector<32x256xbf16>
    %37 = arith.mulf %34, %36 : vector<32x256xbf16>
    %c16_i32 = arith.constant 16 : i32
    %38 = tpu.dynamic_rotate %33 by %c16_i32 dim 1 : vector<32x256xbf16>, i32 -> vector<32x256xbf16>
    %39 = vector.extract_strided_slice %0 {offsets = [1, 0], sizes = [1, 256], strides = [1, 1]} : vector<9x256xbf16> to vector<1x256xbf16>
    %40 = vector.broadcast %39 : vector<1x256xbf16> to vector<32x256xbf16>
    %41 = arith.mulf %38, %40 : vector<32x256xbf16>
    %c15_i32 = arith.constant 15 : i32
    %42 = tpu.dynamic_rotate %33 by %c15_i32 dim 1 : vector<32x256xbf16>, i32 -> vector<32x256xbf16>
    %43 = vector.extract_strided_slice %0 {offsets = [2, 0], sizes = [1, 256], strides = [1, 1]} : vector<9x256xbf16> to vector<1x256xbf16>
    %44 = vector.broadcast %43 : vector<1x256xbf16> to vector<32x256xbf16>
    %45 = arith.mulf %42, %44 : vector<32x256xbf16>
    %46 = tpu.concatenate %37, %41, %45 in 0 : vector<32x256xbf16>, vector<32x256xbf16>, vector<32x256xbf16> -> vector<96x256xbf16>
    %c0_21 = arith.constant 0 : index
    %c0_22 = arith.constant 0 : index
    %47 = vector.load %arg8[%c0_21, %c0_22] : memref<64x96xbf16, #tpu.memory_space<vmem>>, vector<64x96xbf16>
    %cst_23 = arith.constant dense<0.000000e+00> : vector<64x256xf32>
    %48 = tpu.matmul %47, %46, %cst_23 {dimension_numbers = #tpu.dot_dimension_numbers<[1], [0], [0], [1], [0, 0, 1, 1], [], []>} : vector<64x96xbf16>, vector<96x256xbf16>, vector<64x256xf32> -> vector<64x256xf32>
    %c1_i32 = arith.constant 1 : i32
    %49 = tpu.dynamic_rotate %33 by %c1_i32 dim 1 : vector<32x256xbf16>, i32 -> vector<32x256xbf16>
    %50 = vector.extract_strided_slice %0 {offsets = [3, 0], sizes = [1, 256], strides = [1, 1]} : vector<9x256xbf16> to vector<1x256xbf16>
    %51 = vector.broadcast %50 : vector<1x256xbf16> to vector<32x256xbf16>
    %52 = arith.mulf %49, %51 : vector<32x256xbf16>
    %c255_i32 = arith.constant 255 : i32
    %53 = tpu.dynamic_rotate %33 by %c255_i32 dim 1 : vector<32x256xbf16>, i32 -> vector<32x256xbf16>
    %54 = vector.extract_strided_slice %0 {offsets = [5, 0], sizes = [1, 256], strides = [1, 1]} : vector<9x256xbf16> to vector<1x256xbf16>
    %55 = vector.broadcast %54 : vector<1x256xbf16> to vector<32x256xbf16>
    %56 = arith.mulf %53, %55 : vector<32x256xbf16>
    %57 = tpu.concatenate %52, %33, %56 in 0 : vector<32x256xbf16>, vector<32x256xbf16>, vector<32x256xbf16> -> vector<96x256xbf16>
    %c0_24 = arith.constant 0 : index
    %c0_25 = arith.constant 0 : index
    %58 = vector.load %arg9[%c0_24, %c0_25] : memref<64x96xbf16, #tpu.memory_space<vmem>>, vector<64x96xbf16>
    %cst_26 = arith.constant dense<0.000000e+00> : vector<64x256xf32>
    %59 = tpu.matmul %58, %57, %cst_26 {dimension_numbers = #tpu.dot_dimension_numbers<[1], [0], [0], [1], [0, 0, 1, 1], [], []>} : vector<64x96xbf16>, vector<96x256xbf16>, vector<64x256xf32> -> vector<64x256xf32>
    %60 = arith.addf %48, %59 : vector<64x256xf32>
    %c241_i32 = arith.constant 241 : i32
    %61 = tpu.dynamic_rotate %33 by %c241_i32 dim 1 : vector<32x256xbf16>, i32 -> vector<32x256xbf16>
    %62 = vector.extract_strided_slice %0 {offsets = [6, 0], sizes = [1, 256], strides = [1, 1]} : vector<9x256xbf16> to vector<1x256xbf16>
    %63 = vector.broadcast %62 : vector<1x256xbf16> to vector<32x256xbf16>
    %64 = arith.mulf %61, %63 : vector<32x256xbf16>
    %c240_i32 = arith.constant 240 : i32
    %65 = tpu.dynamic_rotate %33 by %c240_i32 dim 1 : vector<32x256xbf16>, i32 -> vector<32x256xbf16>
    %66 = vector.extract_strided_slice %0 {offsets = [7, 0], sizes = [1, 256], strides = [1, 1]} : vector<9x256xbf16> to vector<1x256xbf16>
    %67 = vector.broadcast %66 : vector<1x256xbf16> to vector<32x256xbf16>
    %68 = arith.mulf %65, %67 : vector<32x256xbf16>
    %c239_i32 = arith.constant 239 : i32
    %69 = tpu.dynamic_rotate %33 by %c239_i32 dim 1 : vector<32x256xbf16>, i32 -> vector<32x256xbf16>
    %70 = vector.extract_strided_slice %0 {offsets = [8, 0], sizes = [1, 256], strides = [1, 1]} : vector<9x256xbf16> to vector<1x256xbf16>
    %71 = vector.broadcast %70 : vector<1x256xbf16> to vector<32x256xbf16>
    %72 = arith.mulf %69, %71 : vector<32x256xbf16>
    %73 = tpu.concatenate %64, %68, %72 in 0 : vector<32x256xbf16>, vector<32x256xbf16>, vector<32x256xbf16> -> vector<96x256xbf16>
    %c0_27 = arith.constant 0 : index
    %c0_28 = arith.constant 0 : index
    %74 = vector.load %arg10[%c0_27, %c0_28] : memref<64x96xbf16, #tpu.memory_space<vmem>>, vector<64x96xbf16>
    %cst_29 = arith.constant dense<0.000000e+00> : vector<64x256xf32>
    %75 = tpu.matmul %74, %73, %cst_29 {dimension_numbers = #tpu.dot_dimension_numbers<[1], [0], [0], [1], [0, 0, 1, 1], [], []>} : vector<64x96xbf16>, vector<96x256xbf16>, vector<64x256xf32> -> vector<64x256xf32>
    %76 = arith.addf %60, %75 : vector<64x256xf32>
    %77 = vector.broadcast %32 : vector<64x1xf32> to vector<64x256xf32>
    %78 = arith.addf %76, %77 : vector<64x256xf32>
    %c0_30 = arith.constant 0 : index
    %c0_31 = arith.constant 0 : index
    %c0_32 = arith.constant 0 : index
    %79 = vector.load %arg2[%c0_30, %c0_31, %c0_32] : memref<1x1x64xf32, #tpu.memory_space<vmem>>, vector<1x1x64xf32>
    %80 = vector.shape_cast %79 : vector<1x1x64xf32> to vector<1x64xf32>
    %81 = arith.negf %80 : vector<1x64xf32>
    %82 = math.exp %81 : vector<1x64xf32>
    %cst_33 = arith.constant 1.000000e+00 : f32
    %83 = vector.broadcast %cst_33 : f32 to vector<1x64xf32>
    %84 = arith.addf %83, %82 : vector<1x64xf32>
    %85 = arith.divf %83, %84 : vector<1x64xf32>
    %86 = arith.mulf %80, %85 : vector<1x64xf32>
    %c0_34 = arith.constant 0 : index
    %c0_35 = arith.constant 0 : index
    %87 = vector.load %arg12[%c0_34, %c0_35] : memref<64x64xf32, #tpu.memory_space<vmem>>, vector<64x64xf32>
    %88 = vector.broadcast %86 : vector<1x64xf32> to vector<64x64xf32>
    %89 = arith.mulf %87, %88 : vector<64x64xf32>
    %cst_36 = arith.constant dense<0.000000e+00> : vector<64xf32>
    %90 = vector.multi_reduction <add>, %89, %cst_36 [1] : vector<64x64xf32> to vector<64xf32>
    %91 = vector.shape_cast %90 : vector<64xf32> to vector<64x1xf32>
    %c0_37 = arith.constant 0 : index
    %c0_38 = arith.constant 0 : index
    %92 = vector.load %arg13[%c0_37, %c0_38] : memref<64x1xf32, #tpu.memory_space<vmem>>, vector<64x1xf32>
    %93 = arith.addf %91, %92 : vector<64x1xf32>
    %94 = vector.broadcast %93 : vector<64x1xf32> to vector<64x256xf32>
    %95 = arith.addf %78, %94 : vector<64x256xf32>
    %c0_39 = arith.constant 0 : index
    %c0_40 = arith.constant 0 : index
    %96 = vector.load %arg14[%c0_39, %c0_40] : memref<64x1xf32, #tpu.memory_space<vmem>>, vector<64x1xf32>
    %c0_41 = arith.constant 0 : index
    %c0_42 = arith.constant 0 : index
    %97 = vector.load %arg15[%c0_41, %c0_42] : memref<64x1xf32, #tpu.memory_space<vmem>>, vector<64x1xf32>
    %c0_43 = arith.constant 0 : index
    %c0_44 = arith.constant 0 : index
    %98 = vector.load %arg16[%c0_43, %c0_44] : memref<32x64xf32, #tpu.memory_space<vmem>>, vector<32x64xf32>
    %c0_45 = arith.constant 0 : index
    %c0_46 = arith.constant 0 : index
    %99 = vector.load %arg17[%c0_45, %c0_46] : memref<64x32xf32, #tpu.memory_space<vmem>>, vector<64x32xf32>
    %cst_47 = arith.constant dense<0.000000e+00> : vector<64xf32>
    %100 = vector.multi_reduction <add>, %95, %cst_47 [1] : vector<64x256xf32> to vector<64xf32>
    %101 = vector.shape_cast %100 : vector<64xf32> to vector<64x1xf32>
    %cst_48 = arith.constant dense<0.000000e+00> : vector<32x1xf32>
    %102 = tpu.matmul %98, %101, %cst_48 {dimension_numbers = #tpu.dot_dimension_numbers<[1], [0], [0], [1], [0, 0, 1, 1], [], []>} : vector<32x64xf32>, vector<64x1xf32>, vector<32x1xf32> -> vector<32x1xf32>
    %cst_49 = arith.constant dense<0.000000e+00> : vector<64x1xf32>
    %103 = tpu.matmul %99, %102, %cst_49 {dimension_numbers = #tpu.dot_dimension_numbers<[1], [0], [0], [1], [0, 0, 1, 1], [], []>} : vector<64x32xf32>, vector<32x1xf32>, vector<64x1xf32> -> vector<64x1xf32>
    %104 = vector.broadcast %103 : vector<64x1xf32> to vector<64x256xf32>
    %105 = arith.subf %95, %104 : vector<64x256xf32>
    %106 = arith.mulf %105, %105 : vector<64x256xf32>
    %cst_50 = arith.constant dense<0.000000e+00> : vector<64xf32>
    %107 = vector.multi_reduction <add>, %106, %cst_50 [1] : vector<64x256xf32> to vector<64xf32>
    %108 = vector.shape_cast %107 : vector<64xf32> to vector<64x1xf32>
    %cst_51 = arith.constant dense<0.000000e+00> : vector<32x1xf32>
    %109 = tpu.matmul %98, %108, %cst_51 {dimension_numbers = #tpu.dot_dimension_numbers<[1], [0], [0], [1], [0, 0, 1, 1], [], []>} : vector<32x64xf32>, vector<64x1xf32>, vector<32x1xf32> -> vector<32x1xf32>
    %cst_52 = arith.constant dense<0.000000e+00> : vector<64x1xf32>
    %110 = tpu.matmul %99, %109, %cst_52 {dimension_numbers = #tpu.dot_dimension_numbers<[1], [0], [0], [1], [0, 0, 1, 1], [], []>} : vector<64x32xf32>, vector<32x1xf32>, vector<64x1xf32> -> vector<64x1xf32>
    %cst_53 = arith.constant 9.99999974E-6 : f32
    %111 = vector.broadcast %cst_53 : f32 to vector<64x1xf32>
    %112 = arith.addf %110, %111 : vector<64x1xf32>
    %113 = math.rsqrt %112 : vector<64x1xf32>
    %114 = arith.mulf %113, %96 : vector<64x1xf32>
    %115 = vector.broadcast %114 : vector<64x1xf32> to vector<64x256xf32>
    %116 = arith.mulf %105, %115 : vector<64x256xf32>
    %117 = vector.broadcast %97 : vector<64x1xf32> to vector<64x256xf32>
    %118 = arith.addf %116, %117 : vector<64x256xf32>
    %119 = arith.negf %118 : vector<64x256xf32>
    %120 = math.exp %119 : vector<64x256xf32>
    %cst_54 = arith.constant 1.000000e+00 : f32
    %121 = vector.broadcast %cst_54 : f32 to vector<64x256xf32>
    %122 = arith.addf %121, %120 : vector<64x256xf32>
    %123 = arith.divf %121, %122 : vector<64x256xf32>
    %124 = arith.mulf %118, %123 : vector<64x256xf32>
    %125 = arith.truncf %2 : vector<32x256xf32> to vector<32x256xbf16>
    %c0_55 = arith.constant 0 : index
    %c0_56 = arith.constant 0 : index
    %126 = vector.load %arg21[%c0_55, %c0_56] : memref<64x1xf32, #tpu.memory_space<vmem>>, vector<64x1xf32>
    %127 = arith.truncf %124 : vector<64x256xf32> to vector<64x256xbf16>
    %c17_i32_57 = arith.constant 17 : i32
    %128 = tpu.dynamic_rotate %127 by %c17_i32_57 dim 1 : vector<64x256xbf16>, i32 -> vector<64x256xbf16>
    %129 = vector.extract_strided_slice %0 {offsets = [0, 0], sizes = [1, 256], strides = [1, 1]} : vector<9x256xbf16> to vector<1x256xbf16>
    %130 = vector.broadcast %129 : vector<1x256xbf16> to vector<64x256xbf16>
    %131 = arith.mulf %128, %130 : vector<64x256xbf16>
    %c16_i32_58 = arith.constant 16 : i32
    %132 = tpu.dynamic_rotate %127 by %c16_i32_58 dim 1 : vector<64x256xbf16>, i32 -> vector<64x256xbf16>
    %133 = vector.extract_strided_slice %0 {offsets = [1, 0], sizes = [1, 256], strides = [1, 1]} : vector<9x256xbf16> to vector<1x256xbf16>
    %134 = vector.broadcast %133 : vector<1x256xbf16> to vector<64x256xbf16>
    %135 = arith.mulf %132, %134 : vector<64x256xbf16>
    %c15_i32_59 = arith.constant 15 : i32
    %136 = tpu.dynamic_rotate %127 by %c15_i32_59 dim 1 : vector<64x256xbf16>, i32 -> vector<64x256xbf16>
    %137 = vector.extract_strided_slice %0 {offsets = [2, 0], sizes = [1, 256], strides = [1, 1]} : vector<9x256xbf16> to vector<1x256xbf16>
    %138 = vector.broadcast %137 : vector<1x256xbf16> to vector<64x256xbf16>
    %139 = arith.mulf %136, %138 : vector<64x256xbf16>
    %140 = tpu.concatenate %131, %135, %139 in 0 : vector<64x256xbf16>, vector<64x256xbf16>, vector<64x256xbf16> -> vector<192x256xbf16>
    %c0_60 = arith.constant 0 : index
    %c0_61 = arith.constant 0 : index
    %141 = vector.load %arg18[%c0_60, %c0_61] : memref<64x192xbf16, #tpu.memory_space<vmem>>, vector<64x192xbf16>
    %cst_62 = arith.constant dense<0.000000e+00> : vector<64x256xf32>
    %142 = tpu.matmul %141, %140, %cst_62 {dimension_numbers = #tpu.dot_dimension_numbers<[1], [0], [0], [1], [0, 0, 1, 1], [], []>} : vector<64x192xbf16>, vector<192x256xbf16>, vector<64x256xf32> -> vector<64x256xf32>
    %c1_i32_63 = arith.constant 1 : i32
    %143 = tpu.dynamic_rotate %127 by %c1_i32_63 dim 1 : vector<64x256xbf16>, i32 -> vector<64x256xbf16>
    %144 = vector.extract_strided_slice %0 {offsets = [3, 0], sizes = [1, 256], strides = [1, 1]} : vector<9x256xbf16> to vector<1x256xbf16>
    %145 = vector.broadcast %144 : vector<1x256xbf16> to vector<64x256xbf16>
    %146 = arith.mulf %143, %145 : vector<64x256xbf16>
    %c255_i32_64 = arith.constant 255 : i32
    %147 = tpu.dynamic_rotate %127 by %c255_i32_64 dim 1 : vector<64x256xbf16>, i32 -> vector<64x256xbf16>
    %148 = vector.extract_strided_slice %0 {offsets = [5, 0], sizes = [1, 256], strides = [1, 1]} : vector<9x256xbf16> to vector<1x256xbf16>
    %149 = vector.broadcast %148 : vector<1x256xbf16> to vector<64x256xbf16>
    %150 = arith.mulf %147, %149 : vector<64x256xbf16>
    %151 = tpu.concatenate %146, %127, %150 in 0 : vector<64x256xbf16>, vector<64x256xbf16>, vector<64x256xbf16> -> vector<192x256xbf16>
    %c0_65 = arith.constant 0 : index
    %c0_66 = arith.constant 0 : index
    %152 = vector.load %arg19[%c0_65, %c0_66] : memref<64x192xbf16, #tpu.memory_space<vmem>>, vector<64x192xbf16>
    %cst_67 = arith.constant dense<0.000000e+00> : vector<64x256xf32>
    %153 = tpu.matmul %152, %151, %cst_67 {dimension_numbers = #tpu.dot_dimension_numbers<[1], [0], [0], [1], [0, 0, 1, 1], [], []>} : vector<64x192xbf16>, vector<192x256xbf16>, vector<64x256xf32> -> vector<64x256xf32>
    %154 = arith.addf %142, %153 : vector<64x256xf32>
    %c241_i32_68 = arith.constant 241 : i32
    %155 = tpu.dynamic_rotate %127 by %c241_i32_68 dim 1 : vector<64x256xbf16>, i32 -> vector<64x256xbf16>
    %156 = vector.extract_strided_slice %0 {offsets = [6, 0], sizes = [1, 256], strides = [1, 1]} : vector<9x256xbf16> to vector<1x256xbf16>
    %157 = vector.broadcast %156 : vector<1x256xbf16> to vector<64x256xbf16>
    %158 = arith.mulf %155, %157 : vector<64x256xbf16>
    %c240_i32_69 = arith.constant 240 : i32
    %159 = tpu.dynamic_rotate %127 by %c240_i32_69 dim 1 : vector<64x256xbf16>, i32 -> vector<64x256xbf16>
    %160 = vector.extract_strided_slice %0 {offsets = [7, 0], sizes = [1, 256], strides = [1, 1]} : vector<9x256xbf16> to vector<1x256xbf16>
    %161 = vector.broadcast %160 : vector<1x256xbf16> to vector<64x256xbf16>
    %162 = arith.mulf %159, %161 : vector<64x256xbf16>
    %c239_i32_70 = arith.constant 239 : i32
    %163 = tpu.dynamic_rotate %127 by %c239_i32_70 dim 1 : vector<64x256xbf16>, i32 -> vector<64x256xbf16>
    %164 = vector.extract_strided_slice %0 {offsets = [8, 0], sizes = [1, 256], strides = [1, 1]} : vector<9x256xbf16> to vector<1x256xbf16>
    %165 = vector.broadcast %164 : vector<1x256xbf16> to vector<64x256xbf16>
    %166 = arith.mulf %163, %165 : vector<64x256xbf16>
    %167 = tpu.concatenate %158, %162, %166, %125 in 0 : vector<64x256xbf16>, vector<64x256xbf16>, vector<64x256xbf16>, vector<32x256xbf16> -> vector<224x256xbf16>
    %c0_71 = arith.constant 0 : index
    %c0_72 = arith.constant 0 : index
    %168 = vector.load %arg20[%c0_71, %c0_72] : memref<64x224xbf16, #tpu.memory_space<vmem>>, vector<64x224xbf16>
    %cst_73 = arith.constant dense<0.000000e+00> : vector<64x256xf32>
    %169 = tpu.matmul %168, %167, %cst_73 {dimension_numbers = #tpu.dot_dimension_numbers<[1], [0], [0], [1], [0, 0, 1, 1], [], []>} : vector<64x224xbf16>, vector<224x256xbf16>, vector<64x256xf32> -> vector<64x256xf32>
    %170 = arith.addf %154, %169 : vector<64x256xf32>
    %171 = vector.broadcast %126 : vector<64x1xf32> to vector<64x256xf32>
    %172 = arith.addf %170, %171 : vector<64x256xf32>
    %c0_74 = arith.constant 0 : index
    %c0_75 = arith.constant 0 : index
    %c0_76 = arith.constant 0 : index
    %173 = vector.load %arg22[%c0_74, %c0_75, %c0_76] : memref<1x64x256xf32, #tpu.memory_space<vmem>>, vector<1x64x256xf32>
    %174 = vector.shape_cast %173 : vector<1x64x256xf32> to vector<64x256xf32>
    %175 = vector.shape_cast %172 : vector<64x256xf32> to vector<1x64x256xf32>
    tpu.vector_store %arg22[%c0_74, %c0_75, %c0_76], %175 {strides = array<i32>} : memref<1x64x256xf32, #tpu.memory_space<vmem>>, vector<1x64x256xf32>,
    return
  }
  func.func @transform_0(%arg0: i32) -> (i32, i32, i32) {
    %c0_i32 = arith.constant 0 : i32
    %c0_i32_0 = arith.constant 0 : i32
    %c0_i32_1 = arith.constant 0 : i32
    return %arg0, %c0_i32, %c0_i32_0 : i32, i32, i32
  }
  func.func @transform_1(%arg0: i32) -> (i32, i32, i32) {
    %c0_i32 = arith.constant 0 : i32
    %c0_i32_0 = arith.constant 0 : i32
    %c0_i32_1 = arith.constant 0 : i32
    return %arg0, %c0_i32, %c0_i32_0 : i32, i32, i32
  }
  func.func @transform_2(%arg0: i32) -> (i32, i32) {
    %c0_i32 = arith.constant 0 : i32
    %c0_i32_0 = arith.constant 0 : i32
    %c0_i32_1 = arith.constant 0 : i32
    return %c0_i32, %c0_i32_0 : i32, i32
  }
  func.func @transform_3(%arg0: i32) -> (i32, i32) {
    %c0_i32 = arith.constant 0 : i32
    %c0_i32_0 = arith.constant 0 : i32
    %c0_i32_1 = arith.constant 0 : i32
    return %c0_i32, %c0_i32_0 : i32, i32
  }
  func.func @transform_4(%arg0: i32) -> (i32, i32) {
    %c0_i32 = arith.constant 0 : i32
    %c0_i32_0 = arith.constant 0 : i32
    %c0_i32_1 = arith.constant 0 : i32
    return %c0_i32, %c0_i32_0 : i32, i32
  }
  func.func @transform_5(%arg0: i32) -> (i32, i32) {
    %c0_i32 = arith.constant 0 : i32
    %c0_i32_0 = arith.constant 0 : i32
    %c0_i32_1 = arith.constant 0 : i32
    return %c0_i32, %c0_i32_0 : i32, i32
  }
  func.func @transform_6(%arg0: i32) -> (i32, i32) {
    %c0_i32 = arith.constant 0 : i32
    %c0_i32_0 = arith.constant 0 : i32
    %c0_i32_1 = arith.constant 0 : i32
    return %c0_i32, %c0_i32_0 : i32, i32
  }
  func.func @transform_7(%arg0: i32) -> (i32, i32) {
    %c0_i32 = arith.constant 0 : i32
    %c0_i32_0 = arith.constant 0 : i32
    %c0_i32_1 = arith.constant 0 : i32
    return %c0_i32, %c0_i32_0 : i32, i32
  }
  func.func @transform_8(%arg0: i32) -> (i32, i32) {
    %c0_i32 = arith.constant 0 : i32
    %c0_i32_0 = arith.constant 0 : i32
    %c0_i32_1 = arith.constant 0 : i32
    return %c0_i32, %c0_i32_0 : i32, i32
  }
  func.func @transform_9(%arg0: i32) -> (i32, i32) {
    %c0_i32 = arith.constant 0 : i32
    %c0_i32_0 = arith.constant 0 : i32
    %c0_i32_1 = arith.constant 0 : i32
    return %c0_i32, %c0_i32_0 : i32, i32
  }
  func.func @transform_10(%arg0: i32) -> (i32, i32) {
    %c0_i32 = arith.constant 0 : i32
    %c0_i32_0 = arith.constant 0 : i32
    %c0_i32_1 = arith.constant 0 : i32
    return %c0_i32, %c0_i32_0 : i32, i32
  }
  func.func @transform_11(%arg0: i32) -> (i32, i32) {
    %c0_i32 = arith.constant 0 : i32
    %c0_i32_0 = arith.constant 0 : i32
    %c0_i32_1 = arith.constant 0 : i32
    return %c0_i32, %c0_i32_0 : i32, i32
  }
  func.func @transform_12(%arg0: i32) -> (i32, i32) {
    %c0_i32 = arith.constant 0 : i32
    %c0_i32_0 = arith.constant 0 : i32
    %c0_i32_1 = arith.constant 0 : i32
    return %c0_i32, %c0_i32_0 : i32, i32
  }
  func.func @transform_13(%arg0: i32) -> (i32, i32) {
    %c0_i32 = arith.constant 0 : i32
    %c0_i32_0 = arith.constant 0 : i32
    %c0_i32_1 = arith.constant 0 : i32
    return %c0_i32, %c0_i32_0 : i32, i32
  }
  func.func @transform_14(%arg0: i32) -> (i32, i32) {
    %c0_i32 = arith.constant 0 : i32
    %c0_i32_0 = arith.constant 0 : i32
    %c0_i32_1 = arith.constant 0 : i32
    return %c0_i32, %c0_i32_0 : i32, i32
  }
  func.func @transform_15(%arg0: i32) -> (i32, i32) {
    %c0_i32 = arith.constant 0 : i32
    %c0_i32_0 = arith.constant 0 : i32
    %c0_i32_1 = arith.constant 0 : i32
    return %c0_i32, %c0_i32_0 : i32, i32
  }
  func.func @transform_16(%arg0: i32) -> (i32, i32) {
    %c0_i32 = arith.constant 0 : i32
    %c0_i32_0 = arith.constant 0 : i32
    %c0_i32_1 = arith.constant 0 : i32
    return %c0_i32, %c0_i32_0 : i32, i32
  }
  func.func @transform_17(%arg0: i32) -> (i32, i32) {
    %c0_i32 = arith.constant 0 : i32
    %c0_i32_0 = arith.constant 0 : i32
    %c0_i32_1 = arith.constant 0 : i32
    return %c0_i32, %c0_i32_0 : i32, i32
  }
  func.func @transform_18(%arg0: i32) -> (i32, i32) {
    %c0_i32 = arith.constant 0 : i32
    %c0_i32_0 = arith.constant 0 : i32
    %c0_i32_1 = arith.constant 0 : i32
    return %c0_i32, %c0_i32_0 : i32, i32
  }
  func.func @transform_19(%arg0: i32) -> (i32, i32) {
    %c0_i32 = arith.constant 0 : i32
    %c0_i32_0 = arith.constant 0 : i32
    %c0_i32_1 = arith.constant 0 : i32
    return %c0_i32, %c0_i32_0 : i32, i32
  }
  func.func @transform_20(%arg0: i32) -> (i32, i32) {
    %c0_i32 = arith.constant 0 : i32
    %c0_i32_0 = arith.constant 0 : i32
    %c0_i32_1 = arith.constant 0 : i32
    return %c0_i32, %c0_i32_0 : i32, i32
  }
  func.func @transform_21(%arg0: i32) -> (i32, i32, i32) {
    %c0_i32 = arith.constant 0 : i32
    %c0_i32_0 = arith.constant 0 : i32
    %c0_i32_1 = arith.constant 0 : i32
    return %arg0, %c0_i32, %c0_i32_0 : i32, i32, i32
  }
}

module attributes {stable_mosaic.version = 11 : i64} {
  func.func @residual_block_kernel(%arg0: i32, %arg1: memref<1x32x256xf32, #tpu.memory_space<vmem>>, %arg2: memref<1x1x64xf32, #tpu.memory_space<vmem>>, %arg3: memref<9x256xbf16, #tpu.memory_space<vmem>>, %arg4: memref<32x1xf32, #tpu.memory_space<vmem>>, %arg5: memref<32x1xf32, #tpu.memory_space<vmem>>, %arg6: memref<32x32xf32, #tpu.memory_space<vmem>>, %arg7: memref<32x32xf32, #tpu.memory_space<vmem>>, %arg8: memref<64x96xbf16, #tpu.memory_space<vmem>>, %arg9: memref<64x96xbf16, #tpu.memory_space<vmem>>, %arg10: memref<64x96xbf16, #tpu.memory_space<vmem>>, %arg11: memref<64x1xf32, #tpu.memory_space<vmem>>, %arg12: memref<64x64xf32, #tpu.memory_space<vmem>>, %arg13: memref<64x1xf32, #tpu.memory_space<vmem>>, %arg14: memref<64x1xf32, #tpu.memory_space<vmem>>, %arg15: memref<64x1xf32, #tpu.memory_space<vmem>>, %arg16: memref<32x64xf32, #tpu.memory_space<vmem>>, %arg17: memref<64x32xf32, #tpu.memory_space<vmem>>, %arg18: memref<64x192xbf16, #tpu.memory_space<vmem>>, %arg19: memref<64x192xbf16, #tpu.memory_space<vmem>>, %arg20: memref<64x224xbf16, #tpu.memory_space<vmem>>, %arg21: memref<64x1xf32, #tpu.memory_space<vmem>>, %arg22: memref<1x64x256xf32, #tpu.memory_space<vmem>>) attributes {dimension_semantics = [#tpu.dimension_semantics<parallel>], iteration_bounds = array<i64: 2>, scalar_prefetch = 0 : i64, scratch_operands = 0 : i64, tpu.core_type = #tpu.core_type<tc>, window_params = [{transform_indices = @transform_0, window_bounds = array<i64: 1, 32, 256>}, {transform_indices = @transform_1, window_bounds = array<i64: 1, 1, 64>}, {pipeline_mode = #tpu.pipeline_mode<synchronous>, transform_indices = @transform_2, window_bounds = array<i64: 9, 256>}, {pipeline_mode = #tpu.pipeline_mode<synchronous>, transform_indices = @transform_3, window_bounds = array<i64: 32, 1>}, {pipeline_mode = #tpu.pipeline_mode<synchronous>, transform_indices = @transform_4, window_bounds = array<i64: 32, 1>}, {pipeline_mode = #tpu.pipeline_mode<synchronous>, transform_indices = @transform_5, window_bounds = array<i64: 32, 32>}, {pipeline_mode = #tpu.pipeline_mode<synchronous>, transform_indices = @transform_6, window_bounds = array<i64: 32, 32>}, {pipeline_mode = #tpu.pipeline_mode<synchronous>, transform_indices = @transform_7, window_bounds = array<i64: 64, 96>}, {pipeline_mode = #tpu.pipeline_mode<synchronous>, transform_indices = @transform_8, window_bounds = array<i64: 64, 96>}, {pipeline_mode = #tpu.pipeline_mode<synchronous>, transform_indices = @transform_9, window_bounds = array<i64: 64, 96>}, {pipeline_mode = #tpu.pipeline_mode<synchronous>, transform_indices = @transform_10, window_bounds = array<i64: 64, 1>}, {pipeline_mode = #tpu.pipeline_mode<synchronous>, transform_indices = @transform_11, window_bounds = array<i64: 64, 64>}, {pipeline_mode = #tpu.pipeline_mode<synchronous>, transform_indices = @transform_12, window_bounds = array<i64: 64, 1>}, {pipeline_mode = #tpu.pipeline_mode<synchronous>, transform_indices = @transform_13, window_bounds = array<i64: 64, 1>}, {pipeline_mode = #tpu.pipeline_mode<synchronous>, transform_indices = @transform_14, window_bounds = array<i64: 64, 1>}, {pipeline_mode = #tpu.pipeline_mode<synchronous>, transform_indices = @transform_15, window_bounds = array<i64: 32, 64>}, {pipeline_mode = #tpu.pipeline_mode<synchronous>, transform_indices = @transform_16, window_bounds = array<i64: 64, 32>}, {pipeline_mode = #tpu.pipeline_mode<synchronous>, transform_indices = @transform_17, window_bounds = array<i64: 64, 192>}, {pipeline_mode = #tpu.pipeline_mode<synchronous>, transform_indices = @transform_18, window_bounds = array<i64: 64, 192>}, {pipeline_mode = #tpu.pipeline_mode<synchronous>, transform_indices = @transform_19, window_bounds = array<i64: 64, 224>}, {pipeline_mode = #tpu.pipeline_mode<synchronous>, transform_indices = @transform_20, window_bounds = array<i64: 64, 1>}, {transform_indices = @transform_21, window_bounds = array<i64: 1, 64, 256>}]} {
    %c0 = arith.constant 0 : index
    %c0_0 = arith.constant 0 : index
    %0 = vector.load %arg3[%c0, %c0_0] : memref<9x256xbf16, #tpu.memory_space<vmem>>, vector<9x256xbf16>
    %c0_1 = arith.constant 0 : index
    %c0_2 = arith.constant 0 : index
    %c0_3 = arith.constant 0 : index
    %1 = vector.load %arg1[%c0_1, %c0_2, %c0_3] : memref<1x32x256xf32, #tpu.memory_space<vmem>>, vector<1x32x256xf32>
    %2 = vector.shape_cast %1 : vector<1x32x256xf32> to vector<32x256xf32>
    %c0_4 = arith.constant 0 : index
    %c0_5 = arith.constant 0 : index
    %3 = vector.load %arg4[%c0_4, %c0_5] : memref<32x1xf32, #tpu.memory_space<vmem>>, vector<32x1xf32>
    %c0_6 = arith.constant 0 : index
    %c0_7 = arith.constant 0 : index
    %4 = vector.load %arg5[%c0_6, %c0_7] : memref<32x1xf32, #tpu.memory_space<vmem>>, vector<32x1xf32>
    %c0_8 = arith.constant 0 : index
    %c0_9 = arith.constant 0 : index
    %5 = vector.load %arg6[%c0_8, %c0_9] : memref<32x32xf32, #tpu.memory_space<vmem>>, vector<32x32xf32>
    %c0_10 = arith.constant 0 : index
    %c0_11 = arith.constant 0 : index
    %6 = vector.load %arg7[%c0_10, %c0_11] : memref<32x32xf32, #tpu.memory_space<vmem>>, vector<32x32xf32>
    %cst = arith.constant dense<0.000000e+00> : vector<32xf32>
    %7 = vector.multi_reduction <add>, %2, %cst [1] : vector<32x256xf32> to vector<32xf32>
    %8 = vector.shape_cast %7 : vector<32xf32> to vector<32x1xf32>
    %cst_12 = arith.constant dense<0.000000e+00> : vector<32x1xf32>
    %9 = tpu.matmul %5, %8, %cst_12 {dimension_numbers = #tpu.dot_dimension_numbers<[1], [0], [0], [1], [0, 0, 1, 1], [], []>} : vector<32x32xf32>, vector<32x1xf32>, vector<32x1xf32> -> vector<32x1xf32>
    %cst_13 = arith.constant dense<0.000000e+00> : vector<32x1xf32>
    %10 = tpu.matmul %6, %9, %cst_13 {dimension_numbers = #tpu.dot_dimension_numbers<[1], [0], [0], [1], [0, 0, 1, 1], [], []>} : vector<32x32xf32>, vector<32x1xf32>, vector<32x1xf32> -> vector<32x1xf32>
    %11 = vector.broadcast %10 : vector<32x1xf32> to vector<32x256xf32>
    %12 = arith.subf %2, %11 : vector<32x256xf32>
    %13 = arith.mulf %12, %12 : vector<32x256xf32>
    %cst_14 = arith.constant dense<0.000000e+00> : vector<32xf32>
    %14 = vector.multi_reduction <add>, %13, %cst_14 [1] : vector<32x256xf32> to vector<32xf32>
    %15 = vector.shape_cast %14 : vector<32xf32> to vector<32x1xf32>
    %cst_15 = arith.constant dense<0.000000e+00> : vector<32x1xf32>
    %16 = tpu.matmul %5, %15, %cst_15 {dimension_numbers = #tpu.dot_dimension_numbers<[1], [0], [0], [1], [0, 0, 1, 1], [], []>} : vector<32x32xf32>, vector<32x1xf32>, vector<32x1xf32> -> vector<32x1xf32>
    %cst_16 = arith.constant dense<0.000000e+00> : vector<32x1xf32>
    %17 = tpu.matmul %6, %16, %cst_16 {dimension_numbers = #tpu.dot_dimension_numbers<[1], [0], [0], [1], [0, 0, 1, 1], [], []>} : vector<32x32xf32>, vector<32x1xf32>, vector<32x1xf32> -> vector<32x1xf32>
    %cst_17 = arith.constant 9.99999974E-6 : f32
    %18 = vector.broadcast %cst_17 : f32 to vector<32x1xf32>
    %19 = arith.addf %17, %18 : vector<32x1xf32>
    %20 = math.rsqrt %19 : vector<32x1xf32>
    %21 = arith.mulf %20, %3 : vector<32x1xf32>
    %22 = vector.broadcast %21 : vector<32x1xf32> to vector<32x256xf32>
    %23 = arith.mulf %12, %22 : vector<32x256xf32>
    %24 = vector.broadcast %4 : vector<32x1xf32> to vector<32x256xf32>
    %25 = arith.addf %23, %24 : vector<32x256xf32>
    %26 = arith.negf %25 : vector<32x256xf32>
    %27 = math.exp %26 : vector<32x256xf32>
    %cst_18 = arith.constant 1.000000e+00 : f32
    %28 = vector.broadcast %cst_18 : f32 to vector<32x256xf32>
    %29 = arith.addf %28, %27 : vector<32x256xf32>
    %30 = arith.divf %28, %29 : vector<32x256xf32>
    %31 = arith.mulf %25, %30 : vector<32x256xf32>
    %c0_19 = arith.constant 0 : index
    %c0_20 = arith.constant 0 : index
    %32 = vector.load %arg11[%c0_19, %c0_20] : memref<64x1xf32, #tpu.memory_space<vmem>>, vector<64x1xf32>
    %33 = arith.truncf %31 : vector<32x256xf32> to vector<32x256xbf16>
    %c17_i32 = arith.constant 17 : i32
    %34 = tpu.dynamic_rotate %33 by %c17_i32 dim 1 : vector<32x256xbf16>, i32 -> vector<32x256xbf16>
    %35 = vector.extract_strided_slice %0 {offsets = [0, 0], sizes = [1, 256], strides = [1, 1]} : vector<9x256xbf16> to vector<1x256xbf16>
    %36 = vector.broadcast %35 : vector<1x256xbf16> to vector<32x256xbf16>
    %37 = arith.mulf %34, %36 : vector<32x256xbf16>
    %c16_i32 = arith.constant 16 : i32
    %38 = tpu.dynamic_rotate %33 by %c16_i32 dim 1 : vector<32x256xbf16>, i32 -> vector<32x256xbf16>
    %39 = vector.extract_strided_slice %0 {offsets = [1, 0], sizes = [1, 256], strides = [1, 1]} : vector<9x256xbf16> to vector<1x256xbf16>
    %40 = vector.broadcast %39 : vector<1x256xbf16> to vector<32x256xbf16>
    %41 = arith.mulf %38, %40 : vector<32x256xbf16>
    %c15_i32 = arith.constant 15 : i32
    %42 = tpu.dynamic_rotate %33 by %c15_i32 dim 1 : vector<32x256xbf16>, i32 -> vector<32x256xbf16>
    %43 = vector.extract_strided_slice %0 {offsets = [2, 0], sizes = [1, 256], strides = [1, 1]} : vector<9x256xbf16> to vector<1x256xbf16>
    %44 = vector.broadcast %43 : vector<1x256xbf16> to vector<32x256xbf16>
    %45 = arith.mulf %42, %44 : vector<32x256xbf16>
    %46 = tpu.concatenate %37, %41, %45 in 0 : vector<32x256xbf16>, vector<32x256xbf16>, vector<32x256xbf16> -> vector<96x256xbf16>
    %c0_21 = arith.constant 0 : index
    %c0_22 = arith.constant 0 : index
    %47 = vector.load %arg8[%c0_21, %c0_22] : memref<64x96xbf16, #tpu.memory_space<vmem>>, vector<64x96xbf16>
    %cst_23 = arith.constant dense<0.000000e+00> : vector<64x256xf32>
    %48 = tpu.matmul %47, %46, %cst_23 {dimension_numbers = #tpu.dot_dimension_numbers<[1], [0], [0], [1], [0, 0, 1, 1], [], []>} : vector<64x96xbf16>, vector<96x256xbf16>, vector<64x256xf32> -> vector<64x256xf32>
    %c1_i32 = arith.constant 1 : i32
    %49 = tpu.dynamic_rotate %33 by %c1_i32 dim 1 : vector<32x256xbf16>, i32 -> vector<32x256xbf16>
    %50 = vector.extract_strided_slice %0 {offsets = [3, 0], sizes = [1, 256], strides = [1, 1]} : vector<9x256xbf16> to vector<1x256xbf16>
    %51 = vector.broadcast %50 : vector<1x256xbf16> to vector<32x256xbf16>
    %52 = arith.mulf %49, %51 : vector<32x256xbf16>
    %c255_i32 = arith.constant 255 : i32
    %53 = tpu.dynamic_rotate %33 by %c255_i32 dim 1 : vector<32x256xbf16>, i32 -> vector<32x256xbf16>
    %54 = vector.extract_strided_slice %0 {offsets = [5, 0], sizes = [1, 256], strides = [1, 1]} : vector<9x256xbf16> to vector<1x256xbf16>
    %55 = vector.broadcast %54 : vector<1x256xbf16> to vector<32x256xbf16>
    %56 = arith.mulf %53, %55 : vector<32x256xbf16>
    %57 = tpu.concatenate %52, %33, %56 in 0 : vector<32x256xbf16>, vector<32x256xbf16>, vector<32x256xbf16> -> vector<96x256xbf16>
    %c0_24 = arith.constant 0 : index
    %c0_25 = arith.constant 0 : index
    %58 = vector.load %arg9[%c0_24, %c0_25] : memref<64x96xbf16, #tpu.memory_space<vmem>>, vector<64x96xbf16>
    %cst_26 = arith.constant dense<0.000000e+00> : vector<64x256xf32>
    %59 = tpu.matmul %58, %57, %cst_26 {dimension_numbers = #tpu.dot_dimension_numbers<[1], [0], [0], [1], [0, 0, 1, 1], [], []>} : vector<64x96xbf16>, vector<96x256xbf16>, vector<64x256xf32> -> vector<64x256xf32>
    %60 = arith.addf %48, %59 : vector<64x256xf32>
    %c241_i32 = arith.constant 241 : i32
    %61 = tpu.dynamic_rotate %33 by %c241_i32 dim 1 : vector<32x256xbf16>, i32 -> vector<32x256xbf16>
    %62 = vector.extract_strided_slice %0 {offsets = [6, 0], sizes = [1, 256], strides = [1, 1]} : vector<9x256xbf16> to vector<1x256xbf16>
    %63 = vector.broadcast %62 : vector<1x256xbf16> to vector<32x256xbf16>
    %64 = arith.mulf %61, %63 : vector<32x256xbf16>
    %c240_i32 = arith.constant 240 : i32
    %65 = tpu.dynamic_rotate %33 by %c240_i32 dim 1 : vector<32x256xbf16>, i32 -> vector<32x256xbf16>
    %66 = vector.extract_strided_slice %0 {offsets = [7, 0], sizes = [1, 256], strides = [1, 1]} : vector<9x256xbf16> to vector<1x256xbf16>
    %67 = vector.broadcast %66 : vector<1x256xbf16> to vector<32x256xbf16>
    %68 = arith.mulf %65, %67 : vector<32x256xbf16>
    %c239_i32 = arith.constant 239 : i32
    %69 = tpu.dynamic_rotate %33 by %c239_i32 dim 1 : vector<32x256xbf16>, i32 -> vector<32x256xbf16>
    %70 = vector.extract_strided_slice %0 {offsets = [8, 0], sizes = [1, 256], strides = [1, 1]} : vector<9x256xbf16> to vector<1x256xbf16>
    %71 = vector.broadcast %70 : vector<1x256xbf16> to vector<32x256xbf16>
    %72 = arith.mulf %69, %71 : vector<32x256xbf16>
    %73 = tpu.concatenate %64, %68, %72 in 0 : vector<32x256xbf16>, vector<32x256xbf16>, vector<32x256xbf16> -> vector<96x256xbf16>
    %c0_27 = arith.constant 0 : index
    %c0_28 = arith.constant 0 : index
    %74 = vector.load %arg10[%c0_27, %c0_28] : memref<64x96xbf16, #tpu.memory_space<vmem>>, vector<64x96xbf16>
    %cst_29 = arith.constant dense<0.000000e+00> : vector<64x256xf32>
    %75 = tpu.matmul %74, %73, %cst_29 {dimension_numbers = #tpu.dot_dimension_numbers<[1], [0], [0], [1], [0, 0, 1, 1], [], []>} : vector<64x96xbf16>, vector<96x256xbf16>, vector<64x256xf32> -> vector<64x256xf32>
    %76 = arith.addf %60, %75 : vector<64x256xf32>
    %77 = vector.broadcast %32 : vector<64x1xf32> to vector<64x256xf32>
    %78 = arith.addf %76, %77 : vector<64x256xf32>
    %c0_30 = arith.constant 0 : index
    %c0_31 = arith.constant 0 : index
    %c0_32 = arith.constant 0 : index
    %79 = vector.load %arg2[%c0_30, %c0_31, %c0_32] : memref<1x1x64xf32, #tpu.memory_space<vmem>>, vector<1x1x64xf32>
    %80 = vector.shape_cast %79 : vector<1x1x64xf32> to vector<1x64xf32>
    %81 = arith.negf %80 : vector<1x64xf32>
    %82 = math.exp %81 : vector<1x64xf32>
    %cst_33 = arith.constant 1.000000e+00 : f32
    %83 = vector.broadcast %cst_33 : f32 to vector<1x64xf32>
    %84 = arith.addf %83, %82 : vector<1x64xf32>
    %85 = arith.divf %83, %84 : vector<1x64xf32>
    %86 = arith.mulf %80, %85 : vector<1x64xf32>
    %c0_34 = arith.constant 0 : index
    %c0_35 = arith.constant 0 : index
    %87 = vector.load %arg12[%c0_34, %c0_35] : memref<64x64xf32, #tpu.memory_space<vmem>>, vector<64x64xf32>
    %88 = vector.broadcast %86 : vector<1x64xf32> to vector<64x64xf32>
    %89 = arith.mulf %87, %88 : vector<64x64xf32>
    %cst_36 = arith.constant dense<0.000000e+00> : vector<64xf32>
    %90 = vector.multi_reduction <add>, %89, %cst_36 [1] : vector<64x64xf32> to vector<64xf32>
    %91 = vector.shape_cast %90 : vector<64xf32> to vector<64x1xf32>
    %c0_37 = arith.constant 0 : index
    %c0_38 = arith.constant 0 : index
    %92 = vector.load %arg13[%c0_37, %c0_38] : memref<64x1xf32, #tpu.memory_space<vmem>>, vector<64x1xf32>
    %93 = arith.addf %91, %92 : vector<64x1xf32>
    %94 = vector.broadcast %93 : vector<64x1xf32> to vector<64x256xf32>
    %95 = arith.addf %78, %94 : vector<64x256xf32>
    %c0_39 = arith.constant 0 : index
    %c0_40 = arith.constant 0 : index
    %96 = vector.load %arg14[%c0_39, %c0_40] : memref<64x1xf32, #tpu.memory_space<vmem>>, vector<64x1xf32>
    %c0_41 = arith.constant 0 : index
    %c0_42 = arith.constant 0 : index
    %97 = vector.load %arg15[%c0_41, %c0_42] : memref<64x1xf32, #tpu.memory_space<vmem>>, vector<64x1xf32>
    %c0_43 = arith.constant 0 : index
    %c0_44 = arith.constant 0 : index
    %98 = vector.load %arg16[%c0_43, %c0_44] : memref<32x64xf32, #tpu.memory_space<vmem>>, vector<32x64xf32>
    %c0_45 = arith.constant 0 : index
    %c0_46 = arith.constant 0 : index
    %99 = vector.load %arg17[%c0_45, %c0_46] : memref<64x32xf32, #tpu.memory_space<vmem>>, vector<64x32xf32>
    %cst_47 = arith.constant dense<0.000000e+00> : vector<64xf32>
    %100 = vector.multi_reduction <add>, %95, %cst_47 [1] : vector<64x256xf32> to vector<64xf32>
    %101 = vector.shape_cast %100 : vector<64xf32> to vector<64x1xf32>
    %cst_48 = arith.constant dense<0.000000e+00> : vector<32x1xf32>
    %102 = tpu.matmul %98, %101, %cst_48 {dimension_numbers = #tpu.dot_dimension_numbers<[1], [0], [0], [1], [0, 0, 1, 1], [], []>} : vector<32x64xf32>, vector<64x1xf32>, vector<32x1xf32> -> vector<32x1xf32>
    %cst_49 = arith.constant dense<0.000000e+00> : vector<64x1xf32>
    %103 = tpu.matmul %99, %102, %cst_49 {dimension_numbers = #tpu.dot_dimension_numbers<[1], [0], [0], [1], [0, 0, 1, 1], [], []>} : vector<64x32xf32>, vector<32x1xf32>, vector<64x1xf32> -> vector<64x1xf32>
    %104 = vector.broadcast %103 : vector<64x1xf32> to vector<64x256xf32>
    %105 = arith.subf %95, %104 : vector<64x256xf32>
    %106 = arith.mulf %105, %105 : vector<64x256xf32>
    %cst_50 = arith.constant dense<0.000000e+00> : vector<64xf32>
    %107 = vector.multi_reduction <add>, %106, %cst_50 [1] : vector<64x256xf32> to vector<64xf32>
    %108 = vector.shape_cast %107 : vector<64xf32> to vector<64x1xf32>
    %cst_51 = arith.constant dense<0.000000e+00> : vector<32x1xf32>
    %109 = tpu.matmul %98, %108, %cst_51 {dimension_numbers = #tpu.dot_dimension_numbers<[1], [0], [0], [1], [0, 0, 1, 1], [], []>} : vector<32x64xf32>, vector<64x1xf32>, vector<32x1xf32> -> vector<32x1xf32>
    %cst_52 = arith.constant dense<0.000000e+00> : vector<64x1xf32>
    %110 = tpu.matmul %99, %109, %cst_52 {dimension_numbers = #tpu.dot_dimension_numbers<[1], [0], [0], [1], [0, 0, 1, 1], [], []>} : vector<64x32xf32>, vector<32x1xf32>, vector<64x1xf32> -> vector<64x1xf32>
    %cst_53 = arith.constant 9.99999974E-6 : f32
    %111 = vector.broadcast %cst_53 : f32 to vector<64x1xf32>
    %112 = arith.addf %110, %111 : vector<64x1xf32>
    %113 = math.rsqrt %112 : vector<64x1xf32>
    %114 = arith.mulf %113, %96 : vector<64x1xf32>
    %115 = vector.broadcast %114 : vector<64x1xf32> to vector<64x256xf32>
    %116 = arith.mulf %105, %115 : vector<64x256xf32>
    %117 = vector.broadcast %97 : vector<64x1xf32> to vector<64x256xf32>
    %118 = arith.addf %116, %117 : vector<64x256xf32>
    %119 = arith.negf %118 : vector<64x256xf32>
    %120 = math.exp %119 : vector<64x256xf32>
    %cst_54 = arith.constant 1.000000e+00 : f32
    %121 = vector.broadcast %cst_54 : f32 to vector<64x256xf32>
    %122 = arith.addf %121, %120 : vector<64x256xf32>
    %123 = arith.divf %121, %122 : vector<64x256xf32>
    %124 = arith.mulf %118, %123 : vector<64x256xf32>
    %125 = arith.truncf %2 : vector<32x256xf32> to vector<32x256xbf16>
    %c0_55 = arith.constant 0 : index
    %c0_56 = arith.constant 0 : index
    %126 = vector.load %arg21[%c0_55, %c0_56] : memref<64x1xf32, #tpu.memory_space<vmem>>, vector<64x1xf32>
    %127 = arith.truncf %124 : vector<64x256xf32> to vector<64x256xbf16>
    %c17_i32_57 = arith.constant 17 : i32
    %128 = tpu.dynamic_rotate %127 by %c17_i32_57 dim 1 : vector<64x256xbf16>, i32 -> vector<64x256xbf16>
    %129 = vector.extract_strided_slice %0 {offsets = [0, 0], sizes = [1, 256], strides = [1, 1]} : vector<9x256xbf16> to vector<1x256xbf16>
    %130 = vector.broadcast %129 : vector<1x256xbf16> to vector<64x256xbf16>
    %131 = arith.mulf %128, %130 : vector<64x256xbf16>
    %c16_i32_58 = arith.constant 16 : i32
    %132 = tpu.dynamic_rotate %127 by %c16_i32_58 dim 1 : vector<64x256xbf16>, i32 -> vector<64x256xbf16>
    %133 = vector.extract_strided_slice %0 {offsets = [1, 0], sizes = [1, 256], strides = [1, 1]} : vector<9x256xbf16> to vector<1x256xbf16>
    %134 = vector.broadcast %133 : vector<1x256xbf16> to vector<64x256xbf16>
    %135 = arith.mulf %132, %134 : vector<64x256xbf16>
    %c15_i32_59 = arith.constant 15 : i32
    %136 = tpu.dynamic_rotate %127 by %c15_i32_59 dim 1 : vector<64x256xbf16>, i32 -> vector<64x256xbf16>
    %137 = vector.extract_strided_slice %0 {offsets = [2, 0], sizes = [1, 256], strides = [1, 1]} : vector<9x256xbf16> to vector<1x256xbf16>
    %138 = vector.broadcast %137 : vector<1x256xbf16> to vector<64x256xbf16>
    %139 = arith.mulf %136, %138 : vector<64x256xbf16>
    %140 = tpu.concatenate %131, %135, %139 in 0 : vector<64x256xbf16>, vector<64x256xbf16>, vector<64x256xbf16> -> vector<192x256xbf16>
    %c0_60 = arith.constant 0 : index
    %c0_61 = arith.constant 0 : index
    %141 = vector.load %arg18[%c0_60, %c0_61] : memref<64x192xbf16, #tpu.memory_space<vmem>>, vector<64x192xbf16>
    %cst_62 = arith.constant dense<0.000000e+00> : vector<64x256xf32>
    %142 = tpu.matmul %141, %140, %cst_62 {dimension_numbers = #tpu.dot_dimension_numbers<[1], [0], [0], [1], [0, 0, 1, 1], [], []>} : vector<64x192xbf16>, vector<192x256xbf16>, vector<64x256xf32> -> vector<64x256xf32>
    %c1_i32_63 = arith.constant 1 : i32
    %143 = tpu.dynamic_rotate %127 by %c1_i32_63 dim 1 : vector<64x256xbf16>, i32 -> vector<64x256xbf16>
    %144 = vector.extract_strided_slice %0 {offsets = [3, 0], sizes = [1, 256], strides = [1, 1]} : vector<9x256xbf16> to vector<1x256xbf16>
    %145 = vector.broadcast %144 : vector<1x256xbf16> to vector<64x256xbf16>
    %146 = arith.mulf %143, %145 : vector<64x256xbf16>
    %c255_i32_64 = arith.constant 255 : i32
    %147 = tpu.dynamic_rotate %127 by %c255_i32_64 dim 1 : vector<64x256xbf16>, i32 -> vector<64x256xbf16>
    %148 = vector.extract_strided_slice %0 {offsets = [5, 0], sizes = [1, 256], strides = [1, 1]} : vector<9x256xbf16> to vector<1x256xbf16>
    %149 = vector.broadcast %148 : vector<1x256xbf16> to vector<64x256xbf16>
    %150 = arith.mulf %147, %149 : vector<64x256xbf16>
    %151 = tpu.concatenate %146, %127, %150 in 0 : vector<64x256xbf16>, vector<64x256xbf16>, vector<64x256xbf16> -> vector<192x256xbf16>
    %c0_65 = arith.constant 0 : index
    %c0_66 = arith.constant 0 : index
    %152 = vector.load %arg19[%c0_65, %c0_66] : memref<64x192xbf16, #tpu.memory_space<vmem>>, vector<64x192xbf16>
    %cst_67 = arith.constant dense<0.000000e+00> : vector<64x256xf32>
    %153 = tpu.matmul %152, %151, %cst_67 {dimension_numbers = #tpu.dot_dimension_numbers<[1], [0], [0], [1], [0, 0, 1, 1], [], []>} : vector<64x192xbf16>, vector<192x256xbf16>, vector<64x256xf32> -> vector<64x256xf32>
    %154 = arith.addf %142, %153 : vector<64x256xf32>
    %c241_i32_68 = arith.constant 241 : i32
    %155 = tpu.dynamic_rotate %127 by %c241_i32_68 dim 1 : vector<64x256xbf16>, i32 -> vector<64x256xbf16>
    %156 = vector.extract_strided_slice %0 {offsets = [6, 0], sizes = [1, 256], strides = [1, 1]} : vector<9x256xbf16> to vector<1x256xbf16>
    %157 = vector.broadcast %156 : vector<1x256xbf16> to vector<64x256xbf16>
    %158 = arith.mulf %155, %157 : vector<64x256xbf16>
    %c240_i32_69 = arith.constant 240 : i32
    %159 = tpu.dynamic_rotate %127 by %c240_i32_69 dim 1 : vector<64x256xbf16>, i32 -> vector<64x256xbf16>
    %160 = vector.extract_strided_slice %0 {offsets = [7, 0], sizes = [1, 256], strides = [1, 1]} : vector<9x256xbf16> to vector<1x256xbf16>
    %161 = vector.broadcast %160 : vector<1x256xbf16> to vector<64x256xbf16>
    %162 = arith.mulf %159, %161 : vector<64x256xbf16>
    %c239_i32_70 = arith.constant 239 : i32
    %163 = tpu.dynamic_rotate %127 by %c239_i32_70 dim 1 : vector<64x256xbf16>, i32 -> vector<64x256xbf16>
    %164 = vector.extract_strided_slice %0 {offsets = [8, 0], sizes = [1, 256], strides = [1, 1]} : vector<9x256xbf16> to vector<1x256xbf16>
    %165 = vector.broadcast %164 : vector<1x256xbf16> to vector<64x256xbf16>
    %166 = arith.mulf %163, %165 : vector<64x256xbf16>
    %167 = tpu.concatenate %158, %162, %166, %125 in 0 : vector<64x256xbf16>, vector<64x256xbf16>, vector<64x256xbf16>, vector<32x256xbf16> -> vector<224x256xbf16>
    %c0_71 = arith.constant 0 : index
    %c0_72 = arith.constant 0 : index
    %168 = vector.load %arg20[%c0_71, %c0_72] : memref<64x224xbf16, #tpu.memory_space<vmem>>, vector<64x224xbf16>
    %cst_73 = arith.constant dense<0.000000e+00> : vector<64x256xf32>
    %169 = tpu.matmul %168, %167, %cst_73 {dimension_numbers = #tpu.dot_dimension_numbers<[1], [0], [0], [1], [0, 0, 1, 1], [], []>} : vector<64x224xbf16>, vector<224x256xbf16>, vector<64x256xf32> -> vector<64x256xf32>
    %170 = arith.addf %154, %169 : vector<64x256xf32>
    %171 = vector.broadcast %126 : vector<64x1xf32> to vector<64x256xf32>
    %172 = arith.addf %170, %171 : vector<64x256xf32>
    %c0_74 = arith.constant 0 : index
    %c0_75 = arith.constant 0 : index
    %c0_76 = arith.constant 0 : index
    %173 = vector.load %arg22[%c0_74, %c0_75, %c0_76] : memref<1x64x256xf32, #tpu.memory_space<vmem>>, vector<1x64x256xf32>
    %174 = vector.shape_cast %173 : vector<1x64x256xf32> to vector<64x256xf32>
    %175 = vector.shape_cast %172 : vector<64x256xf32> to vector<1x64x256xf32>
    tpu.vector_store %arg22[%c0_74, %c0_75, %c0_76], %175 {strides = array<i32>} : memref<1x64x256xf32, #tpu.memory_space<vmem>>, vector<1x64x256xf32>,
    return
  }
  func.func @transform_0(%arg0: i32) -> (i32, i32, i32) {
    %c0_i32 = arith.constant 0 : i32
    %c0_i32_0 = arith.constant 0 : i32
    %c0_i32_1 = arith.constant 0 : i32
    return %arg0, %c0_i32, %c0_i32_0 : i32, i32, i32
  }
  func.func @transform_1(%arg0: i32) -> (i32, i32, i32) {
    %c0_i32 = arith.constant 0 : i32
    %c0_i32_0 = arith.constant 0 : i32
    %c0_i32_1 = arith.constant 0 : i32
    return %arg0, %c0_i32, %c0_i32_0 : i32, i32, i32
  }
  func.func @transform_2(%arg0: i32) -> (i32, i32) {
    %c0_i32 = arith.constant 0 : i32
    %c0_i32_0 = arith.constant 0 : i32
    %c0_i32_1 = arith.constant 0 : i32
    return %c0_i32, %c0_i32_0 : i32, i32
  }
  func.func @transform_3(%arg0: i32) -> (i32, i32) {
    %c0_i32 = arith.constant 0 : i32
    %c0_i32_0 = arith.constant 0 : i32
    %c0_i32_1 = arith.constant 0 : i32
    return %c0_i32, %c0_i32_0 : i32, i32
  }
  func.func @transform_4(%arg0: i32) -> (i32, i32) {
    %c0_i32 = arith.constant 0 : i32
    %c0_i32_0 = arith.constant 0 : i32
    %c0_i32_1 = arith.constant 0 : i32
    return %c0_i32, %c0_i32_0 : i32, i32
  }
  func.func @transform_5(%arg0: i32) -> (i32, i32) {
    %c0_i32 = arith.constant 0 : i32
    %c0_i32_0 = arith.constant 0 : i32
    %c0_i32_1 = arith.constant 0 : i32
    return %c0_i32, %c0_i32_0 : i32, i32
  }
  func.func @transform_6(%arg0: i32) -> (i32, i32) {
    %c0_i32 = arith.constant 0 : i32
    %c0_i32_0 = arith.constant 0 : i32
    %c0_i32_1 = arith.constant 0 : i32
    return %c0_i32, %c0_i32_0 : i32, i32
  }
  func.func @transform_7(%arg0: i32) -> (i32, i32) {
    %c0_i32 = arith.constant 0 : i32
    %c0_i32_0 = arith.constant 0 : i32
    %c0_i32_1 = arith.constant 0 : i32
    return %c0_i32, %c0_i32_0 : i32, i32
  }
  func.func @transform_8(%arg0: i32) -> (i32, i32) {
    %c0_i32 = arith.constant 0 : i32
    %c0_i32_0 = arith.constant 0 : i32
    %c0_i32_1 = arith.constant 0 : i32
    return %c0_i32, %c0_i32_0 : i32, i32
  }
  func.func @transform_9(%arg0: i32) -> (i32, i32) {
    %c0_i32 = arith.constant 0 : i32
    %c0_i32_0 = arith.constant 0 : i32
    %c0_i32_1 = arith.constant 0 : i32
    return %c0_i32, %c0_i32_0 : i32, i32
  }
  func.func @transform_10(%arg0: i32) -> (i32, i32) {
    %c0_i32 = arith.constant 0 : i32
    %c0_i32_0 = arith.constant 0 : i32
    %c0_i32_1 = arith.constant 0 : i32
    return %c0_i32, %c0_i32_0 : i32, i32
  }
  func.func @transform_11(%arg0: i32) -> (i32, i32) {
    %c0_i32 = arith.constant 0 : i32
    %c0_i32_0 = arith.constant 0 : i32
    %c0_i32_1 = arith.constant 0 : i32
    return %c0_i32, %c0_i32_0 : i32, i32
  }
  func.func @transform_12(%arg0: i32) -> (i32, i32) {
    %c0_i32 = arith.constant 0 : i32
    %c0_i32_0 = arith.constant 0 : i32
    %c0_i32_1 = arith.constant 0 : i32
    return %c0_i32, %c0_i32_0 : i32, i32
  }
  func.func @transform_13(%arg0: i32) -> (i32, i32) {
    %c0_i32 = arith.constant 0 : i32
    %c0_i32_0 = arith.constant 0 : i32
    %c0_i32_1 = arith.constant 0 : i32
    return %c0_i32, %c0_i32_0 : i32, i32
  }
  func.func @transform_14(%arg0: i32) -> (i32, i32) {
    %c0_i32 = arith.constant 0 : i32
    %c0_i32_0 = arith.constant 0 : i32
    %c0_i32_1 = arith.constant 0 : i32
    return %c0_i32, %c0_i32_0 : i32, i32
  }
  func.func @transform_15(%arg0: i32) -> (i32, i32) {
    %c0_i32 = arith.constant 0 : i32
    %c0_i32_0 = arith.constant 0 : i32
    %c0_i32_1 = arith.constant 0 : i32
    return %c0_i32, %c0_i32_0 : i32, i32
  }
  func.func @transform_16(%arg0: i32) -> (i32, i32) {
    %c0_i32 = arith.constant 0 : i32
    %c0_i32_0 = arith.constant 0 : i32
    %c0_i32_1 = arith.constant 0 : i32
    return %c0_i32, %c0_i32_0 : i32, i32
  }
  func.func @transform_17(%arg0: i32) -> (i32, i32) {
    %c0_i32 = arith.constant 0 : i32
    %c0_i32_0 = arith.constant 0 : i32
    %c0_i32_1 = arith.constant 0 : i32
    return %c0_i32, %c0_i32_0 : i32, i32
  }
  func.func @transform_18(%arg0: i32) -> (i32, i32) {
    %c0_i32 = arith.constant 0 : i32
    %c0_i32_0 = arith.constant 0 : i32
    %c0_i32_1 = arith.constant 0 : i32
    return %c0_i32, %c0_i32_0 : i32, i32
  }
  func.func @transform_19(%arg0: i32) -> (i32, i32) {
    %c0_i32 = arith.constant 0 : i32
    %c0_i32_0 = arith.constant 0 : i32
    %c0_i32_1 = arith.constant 0 : i32
    return %c0_i32, %c0_i32_0 : i32, i32
  }
  func.func @transform_20(%arg0: i32) -> (i32, i32) {
    %c0_i32 = arith.constant 0 : i32
    %c0_i32_0 = arith.constant 0 : i32
    %c0_i32_1 = arith.constant 0 : i32
    return %c0_i32, %c0_i32_0 : i32, i32
  }
  func.func @transform_21(%arg0: i32) -> (i32, i32, i32) {
    %c0_i32 = arith.constant 0 : i32
    %c0_i32_0 = arith.constant 0 : i32
    %c0_i32_1 = arith.constant 0 : i32
    return %arg0, %c0_i32, %c0_i32_0 : i32, i32, i32
  }
}

module attributes {stable_mosaic.version = 11 : i64} {
  func.func @residual_block_kernel(%arg0: i32, %arg1: memref<1x32x256xf32, #tpu.memory_space<vmem>>, %arg2: memref<1x1x64xf32, #tpu.memory_space<vmem>>, %arg3: memref<9x256xbf16, #tpu.memory_space<vmem>>, %arg4: memref<32x1xf32, #tpu.memory_space<vmem>>, %arg5: memref<32x1xf32, #tpu.memory_space<vmem>>, %arg6: memref<32x32xf32, #tpu.memory_space<vmem>>, %arg7: memref<32x32xf32, #tpu.memory_space<vmem>>, %arg8: memref<64x96xbf16, #tpu.memory_space<vmem>>, %arg9: memref<64x96xbf16, #tpu.memory_space<vmem>>, %arg10: memref<64x96xbf16, #tpu.memory_space<vmem>>, %arg11: memref<64x1xf32, #tpu.memory_space<vmem>>, %arg12: memref<64x64xf32, #tpu.memory_space<vmem>>, %arg13: memref<64x1xf32, #tpu.memory_space<vmem>>, %arg14: memref<64x1xf32, #tpu.memory_space<vmem>>, %arg15: memref<64x1xf32, #tpu.memory_space<vmem>>, %arg16: memref<32x64xf32, #tpu.memory_space<vmem>>, %arg17: memref<64x32xf32, #tpu.memory_space<vmem>>, %arg18: memref<64x192xbf16, #tpu.memory_space<vmem>>, %arg19: memref<64x192xbf16, #tpu.memory_space<vmem>>, %arg20: memref<64x224xbf16, #tpu.memory_space<vmem>>, %arg21: memref<64x1xf32, #tpu.memory_space<vmem>>, %arg22: memref<1x64x256xf32, #tpu.memory_space<vmem>>) attributes {dimension_semantics = [#tpu.dimension_semantics<parallel>], iteration_bounds = array<i64: 2>, scalar_prefetch = 0 : i64, scratch_operands = 0 : i64, tpu.core_type = #tpu.core_type<tc>, window_params = [{transform_indices = @transform_0, window_bounds = array<i64: 1, 32, 256>}, {transform_indices = @transform_1, window_bounds = array<i64: 1, 1, 64>}, {pipeline_mode = #tpu.pipeline_mode<synchronous>, transform_indices = @transform_2, window_bounds = array<i64: 9, 256>}, {pipeline_mode = #tpu.pipeline_mode<synchronous>, transform_indices = @transform_3, window_bounds = array<i64: 32, 1>}, {pipeline_mode = #tpu.pipeline_mode<synchronous>, transform_indices = @transform_4, window_bounds = array<i64: 32, 1>}, {pipeline_mode = #tpu.pipeline_mode<synchronous>, transform_indices = @transform_5, window_bounds = array<i64: 32, 32>}, {pipeline_mode = #tpu.pipeline_mode<synchronous>, transform_indices = @transform_6, window_bounds = array<i64: 32, 32>}, {pipeline_mode = #tpu.pipeline_mode<synchronous>, transform_indices = @transform_7, window_bounds = array<i64: 64, 96>}, {pipeline_mode = #tpu.pipeline_mode<synchronous>, transform_indices = @transform_8, window_bounds = array<i64: 64, 96>}, {pipeline_mode = #tpu.pipeline_mode<synchronous>, transform_indices = @transform_9, window_bounds = array<i64: 64, 96>}, {pipeline_mode = #tpu.pipeline_mode<synchronous>, transform_indices = @transform_10, window_bounds = array<i64: 64, 1>}, {pipeline_mode = #tpu.pipeline_mode<synchronous>, transform_indices = @transform_11, window_bounds = array<i64: 64, 64>}, {pipeline_mode = #tpu.pipeline_mode<synchronous>, transform_indices = @transform_12, window_bounds = array<i64: 64, 1>}, {pipeline_mode = #tpu.pipeline_mode<synchronous>, transform_indices = @transform_13, window_bounds = array<i64: 64, 1>}, {pipeline_mode = #tpu.pipeline_mode<synchronous>, transform_indices = @transform_14, window_bounds = array<i64: 64, 1>}, {pipeline_mode = #tpu.pipeline_mode<synchronous>, transform_indices = @transform_15, window_bounds = array<i64: 32, 64>}, {pipeline_mode = #tpu.pipeline_mode<synchronous>, transform_indices = @transform_16, window_bounds = array<i64: 64, 32>}, {pipeline_mode = #tpu.pipeline_mode<synchronous>, transform_indices = @transform_17, window_bounds = array<i64: 64, 192>}, {pipeline_mode = #tpu.pipeline_mode<synchronous>, transform_indices = @transform_18, window_bounds = array<i64: 64, 192>}, {pipeline_mode = #tpu.pipeline_mode<synchronous>, transform_indices = @transform_19, window_bounds = array<i64: 64, 224>}, {pipeline_mode = #tpu.pipeline_mode<synchronous>, transform_indices = @transform_20, window_bounds = array<i64: 64, 1>}, {transform_indices = @transform_21, window_bounds = array<i64: 1, 64, 256>}]} {
    %c0 = arith.constant 0 : index
    %c0_0 = arith.constant 0 : index
    %0 = vector.load %arg3[%c0, %c0_0] : memref<9x256xbf16, #tpu.memory_space<vmem>>, vector<9x256xbf16>
    %c0_1 = arith.constant 0 : index
    %c0_2 = arith.constant 0 : index
    %c0_3 = arith.constant 0 : index
    %1 = vector.load %arg1[%c0_1, %c0_2, %c0_3] : memref<1x32x256xf32, #tpu.memory_space<vmem>>, vector<1x32x256xf32>
    %2 = vector.shape_cast %1 : vector<1x32x256xf32> to vector<32x256xf32>
    %c0_4 = arith.constant 0 : index
    %c0_5 = arith.constant 0 : index
    %3 = vector.load %arg4[%c0_4, %c0_5] : memref<32x1xf32, #tpu.memory_space<vmem>>, vector<32x1xf32>
    %c0_6 = arith.constant 0 : index
    %c0_7 = arith.constant 0 : index
    %4 = vector.load %arg5[%c0_6, %c0_7] : memref<32x1xf32, #tpu.memory_space<vmem>>, vector<32x1xf32>
    %c0_8 = arith.constant 0 : index
    %c0_9 = arith.constant 0 : index
    %5 = vector.load %arg6[%c0_8, %c0_9] : memref<32x32xf32, #tpu.memory_space<vmem>>, vector<32x32xf32>
    %c0_10 = arith.constant 0 : index
    %c0_11 = arith.constant 0 : index
    %6 = vector.load %arg7[%c0_10, %c0_11] : memref<32x32xf32, #tpu.memory_space<vmem>>, vector<32x32xf32>
    %cst = arith.constant dense<0.000000e+00> : vector<32xf32>
    %7 = vector.multi_reduction <add>, %2, %cst [1] : vector<32x256xf32> to vector<32xf32>
    %8 = vector.shape_cast %7 : vector<32xf32> to vector<32x1xf32>
    %cst_12 = arith.constant dense<0.000000e+00> : vector<32x1xf32>
    %9 = tpu.matmul %5, %8, %cst_12 {dimension_numbers = #tpu.dot_dimension_numbers<[1], [0], [0], [1], [0, 0, 1, 1], [], []>} : vector<32x32xf32>, vector<32x1xf32>, vector<32x1xf32> -> vector<32x1xf32>
    %cst_13 = arith.constant dense<0.000000e+00> : vector<32x1xf32>
    %10 = tpu.matmul %6, %9, %cst_13 {dimension_numbers = #tpu.dot_dimension_numbers<[1], [0], [0], [1], [0, 0, 1, 1], [], []>} : vector<32x32xf32>, vector<32x1xf32>, vector<32x1xf32> -> vector<32x1xf32>
    %11 = vector.broadcast %10 : vector<32x1xf32> to vector<32x256xf32>
    %12 = arith.subf %2, %11 : vector<32x256xf32>
    %13 = arith.mulf %12, %12 : vector<32x256xf32>
    %cst_14 = arith.constant dense<0.000000e+00> : vector<32xf32>
    %14 = vector.multi_reduction <add>, %13, %cst_14 [1] : vector<32x256xf32> to vector<32xf32>
    %15 = vector.shape_cast %14 : vector<32xf32> to vector<32x1xf32>
    %cst_15 = arith.constant dense<0.000000e+00> : vector<32x1xf32>
    %16 = tpu.matmul %5, %15, %cst_15 {dimension_numbers = #tpu.dot_dimension_numbers<[1], [0], [0], [1], [0, 0, 1, 1], [], []>} : vector<32x32xf32>, vector<32x1xf32>, vector<32x1xf32> -> vector<32x1xf32>
    %cst_16 = arith.constant dense<0.000000e+00> : vector<32x1xf32>
    %17 = tpu.matmul %6, %16, %cst_16 {dimension_numbers = #tpu.dot_dimension_numbers<[1], [0], [0], [1], [0, 0, 1, 1], [], []>} : vector<32x32xf32>, vector<32x1xf32>, vector<32x1xf32> -> vector<32x1xf32>
    %cst_17 = arith.constant 9.99999974E-6 : f32
    %18 = vector.broadcast %cst_17 : f32 to vector<32x1xf32>
    %19 = arith.addf %17, %18 : vector<32x1xf32>
    %20 = math.rsqrt %19 : vector<32x1xf32>
    %21 = arith.mulf %20, %3 : vector<32x1xf32>
    %22 = vector.broadcast %21 : vector<32x1xf32> to vector<32x256xf32>
    %23 = arith.mulf %12, %22 : vector<32x256xf32>
    %24 = vector.broadcast %4 : vector<32x1xf32> to vector<32x256xf32>
    %25 = arith.addf %23, %24 : vector<32x256xf32>
    %26 = arith.negf %25 : vector<32x256xf32>
    %27 = math.exp %26 : vector<32x256xf32>
    %cst_18 = arith.constant 1.000000e+00 : f32
    %28 = vector.broadcast %cst_18 : f32 to vector<32x256xf32>
    %29 = arith.addf %28, %27 : vector<32x256xf32>
    %30 = arith.divf %28, %29 : vector<32x256xf32>
    %31 = arith.mulf %25, %30 : vector<32x256xf32>
    %c0_19 = arith.constant 0 : index
    %c0_20 = arith.constant 0 : index
    %32 = vector.load %arg11[%c0_19, %c0_20] : memref<64x1xf32, #tpu.memory_space<vmem>>, vector<64x1xf32>
    %c17_i32 = arith.constant 17 : i32
    %33 = tpu.dynamic_rotate %31 by %c17_i32 dim 1 : vector<32x256xf32>, i32 -> vector<32x256xf32>
    %34 = vector.extract_strided_slice %0 {offsets = [0, 0], sizes = [1, 256], strides = [1, 1]} : vector<9x256xbf16> to vector<1x256xbf16>
    %35 = arith.extf %34 : vector<1x256xbf16> to vector<1x256xf32>
    %36 = vector.broadcast %35 : vector<1x256xf32> to vector<32x256xf32>
    %37 = arith.mulf %33, %36 : vector<32x256xf32>
    %38 = arith.truncf %37 : vector<32x256xf32> to vector<32x256xbf16>
    %c16_i32 = arith.constant 16 : i32
    %39 = tpu.dynamic_rotate %31 by %c16_i32 dim 1 : vector<32x256xf32>, i32 -> vector<32x256xf32>
    %40 = vector.extract_strided_slice %0 {offsets = [1, 0], sizes = [1, 256], strides = [1, 1]} : vector<9x256xbf16> to vector<1x256xbf16>
    %41 = arith.extf %40 : vector<1x256xbf16> to vector<1x256xf32>
    %42 = vector.broadcast %41 : vector<1x256xf32> to vector<32x256xf32>
    %43 = arith.mulf %39, %42 : vector<32x256xf32>
    %44 = arith.truncf %43 : vector<32x256xf32> to vector<32x256xbf16>
    %c15_i32 = arith.constant 15 : i32
    %45 = tpu.dynamic_rotate %31 by %c15_i32 dim 1 : vector<32x256xf32>, i32 -> vector<32x256xf32>
    %46 = vector.extract_strided_slice %0 {offsets = [2, 0], sizes = [1, 256], strides = [1, 1]} : vector<9x256xbf16> to vector<1x256xbf16>
    %47 = arith.extf %46 : vector<1x256xbf16> to vector<1x256xf32>
    %48 = vector.broadcast %47 : vector<1x256xf32> to vector<32x256xf32>
    %49 = arith.mulf %45, %48 : vector<32x256xf32>
    %50 = arith.truncf %49 : vector<32x256xf32> to vector<32x256xbf16>
    %51 = tpu.concatenate %38, %44, %50 in 0 : vector<32x256xbf16>, vector<32x256xbf16>, vector<32x256xbf16> -> vector<96x256xbf16>
    %c0_21 = arith.constant 0 : index
    %c0_22 = arith.constant 0 : index
    %52 = vector.load %arg8[%c0_21, %c0_22] : memref<64x96xbf16, #tpu.memory_space<vmem>>, vector<64x96xbf16>
    %cst_23 = arith.constant dense<0.000000e+00> : vector<64x256xf32>
    %53 = tpu.matmul %52, %51, %cst_23 {dimension_numbers = #tpu.dot_dimension_numbers<[1], [0], [0], [1], [0, 0, 1, 1], [], []>} : vector<64x96xbf16>, vector<96x256xbf16>, vector<64x256xf32> -> vector<64x256xf32>
    %c1_i32 = arith.constant 1 : i32
    %54 = tpu.dynamic_rotate %31 by %c1_i32 dim 1 : vector<32x256xf32>, i32 -> vector<32x256xf32>
    %55 = vector.extract_strided_slice %0 {offsets = [3, 0], sizes = [1, 256], strides = [1, 1]} : vector<9x256xbf16> to vector<1x256xbf16>
    %56 = arith.extf %55 : vector<1x256xbf16> to vector<1x256xf32>
    %57 = vector.broadcast %56 : vector<1x256xf32> to vector<32x256xf32>
    %58 = arith.mulf %54, %57 : vector<32x256xf32>
    %59 = arith.truncf %58 : vector<32x256xf32> to vector<32x256xbf16>
    %60 = arith.truncf %31 : vector<32x256xf32> to vector<32x256xbf16>
    %c255_i32 = arith.constant 255 : i32
    %61 = tpu.dynamic_rotate %31 by %c255_i32 dim 1 : vector<32x256xf32>, i32 -> vector<32x256xf32>
    %62 = vector.extract_strided_slice %0 {offsets = [5, 0], sizes = [1, 256], strides = [1, 1]} : vector<9x256xbf16> to vector<1x256xbf16>
    %63 = arith.extf %62 : vector<1x256xbf16> to vector<1x256xf32>
    %64 = vector.broadcast %63 : vector<1x256xf32> to vector<32x256xf32>
    %65 = arith.mulf %61, %64 : vector<32x256xf32>
    %66 = arith.truncf %65 : vector<32x256xf32> to vector<32x256xbf16>
    %67 = tpu.concatenate %59, %60, %66 in 0 : vector<32x256xbf16>, vector<32x256xbf16>, vector<32x256xbf16> -> vector<96x256xbf16>
    %c0_24 = arith.constant 0 : index
    %c0_25 = arith.constant 0 : index
    %68 = vector.load %arg9[%c0_24, %c0_25] : memref<64x96xbf16, #tpu.memory_space<vmem>>, vector<64x96xbf16>
    %cst_26 = arith.constant dense<0.000000e+00> : vector<64x256xf32>
    %69 = tpu.matmul %68, %67, %cst_26 {dimension_numbers = #tpu.dot_dimension_numbers<[1], [0], [0], [1], [0, 0, 1, 1], [], []>} : vector<64x96xbf16>, vector<96x256xbf16>, vector<64x256xf32> -> vector<64x256xf32>
    %70 = arith.addf %53, %69 : vector<64x256xf32>
    %c241_i32 = arith.constant 241 : i32
    %71 = tpu.dynamic_rotate %31 by %c241_i32 dim 1 : vector<32x256xf32>, i32 -> vector<32x256xf32>
    %72 = vector.extract_strided_slice %0 {offsets = [6, 0], sizes = [1, 256], strides = [1, 1]} : vector<9x256xbf16> to vector<1x256xbf16>
    %73 = arith.extf %72 : vector<1x256xbf16> to vector<1x256xf32>
    %74 = vector.broadcast %73 : vector<1x256xf32> to vector<32x256xf32>
    %75 = arith.mulf %71, %74 : vector<32x256xf32>
    %76 = arith.truncf %75 : vector<32x256xf32> to vector<32x256xbf16>
    %c240_i32 = arith.constant 240 : i32
    %77 = tpu.dynamic_rotate %31 by %c240_i32 dim 1 : vector<32x256xf32>, i32 -> vector<32x256xf32>
    %78 = vector.extract_strided_slice %0 {offsets = [7, 0], sizes = [1, 256], strides = [1, 1]} : vector<9x256xbf16> to vector<1x256xbf16>
    %79 = arith.extf %78 : vector<1x256xbf16> to vector<1x256xf32>
    %80 = vector.broadcast %79 : vector<1x256xf32> to vector<32x256xf32>
    %81 = arith.mulf %77, %80 : vector<32x256xf32>
    %82 = arith.truncf %81 : vector<32x256xf32> to vector<32x256xbf16>
    %c239_i32 = arith.constant 239 : i32
    %83 = tpu.dynamic_rotate %31 by %c239_i32 dim 1 : vector<32x256xf32>, i32 -> vector<32x256xf32>
    %84 = vector.extract_strided_slice %0 {offsets = [8, 0], sizes = [1, 256], strides = [1, 1]} : vector<9x256xbf16> to vector<1x256xbf16>
    %85 = arith.extf %84 : vector<1x256xbf16> to vector<1x256xf32>
    %86 = vector.broadcast %85 : vector<1x256xf32> to vector<32x256xf32>
    %87 = arith.mulf %83, %86 : vector<32x256xf32>
    %88 = arith.truncf %87 : vector<32x256xf32> to vector<32x256xbf16>
    %89 = tpu.concatenate %76, %82, %88 in 0 : vector<32x256xbf16>, vector<32x256xbf16>, vector<32x256xbf16> -> vector<96x256xbf16>
    %c0_27 = arith.constant 0 : index
    %c0_28 = arith.constant 0 : index
    %90 = vector.load %arg10[%c0_27, %c0_28] : memref<64x96xbf16, #tpu.memory_space<vmem>>, vector<64x96xbf16>
    %cst_29 = arith.constant dense<0.000000e+00> : vector<64x256xf32>
    %91 = tpu.matmul %90, %89, %cst_29 {dimension_numbers = #tpu.dot_dimension_numbers<[1], [0], [0], [1], [0, 0, 1, 1], [], []>} : vector<64x96xbf16>, vector<96x256xbf16>, vector<64x256xf32> -> vector<64x256xf32>
    %92 = arith.addf %70, %91 : vector<64x256xf32>
    %93 = vector.broadcast %32 : vector<64x1xf32> to vector<64x256xf32>
    %94 = arith.addf %92, %93 : vector<64x256xf32>
    %c0_30 = arith.constant 0 : index
    %c0_31 = arith.constant 0 : index
    %c0_32 = arith.constant 0 : index
    %95 = vector.load %arg2[%c0_30, %c0_31, %c0_32] : memref<1x1x64xf32, #tpu.memory_space<vmem>>, vector<1x1x64xf32>
    %96 = vector.shape_cast %95 : vector<1x1x64xf32> to vector<1x64xf32>
    %97 = arith.negf %96 : vector<1x64xf32>
    %98 = math.exp %97 : vector<1x64xf32>
    %cst_33 = arith.constant 1.000000e+00 : f32
    %99 = vector.broadcast %cst_33 : f32 to vector<1x64xf32>
    %100 = arith.addf %99, %98 : vector<1x64xf32>
    %101 = arith.divf %99, %100 : vector<1x64xf32>
    %102 = arith.mulf %96, %101 : vector<1x64xf32>
    %c0_34 = arith.constant 0 : index
    %c0_35 = arith.constant 0 : index
    %103 = vector.load %arg12[%c0_34, %c0_35] : memref<64x64xf32, #tpu.memory_space<vmem>>, vector<64x64xf32>
    %104 = vector.broadcast %102 : vector<1x64xf32> to vector<64x64xf32>
    %105 = arith.mulf %103, %104 : vector<64x64xf32>
    %cst_36 = arith.constant dense<0.000000e+00> : vector<64xf32>
    %106 = vector.multi_reduction <add>, %105, %cst_36 [1] : vector<64x64xf32> to vector<64xf32>
    %107 = vector.shape_cast %106 : vector<64xf32> to vector<64x1xf32>
    %c0_37 = arith.constant 0 : index
    %c0_38 = arith.constant 0 : index
    %108 = vector.load %arg13[%c0_37, %c0_38] : memref<64x1xf32, #tpu.memory_space<vmem>>, vector<64x1xf32>
    %109 = arith.addf %107, %108 : vector<64x1xf32>
    %110 = vector.broadcast %109 : vector<64x1xf32> to vector<64x256xf32>
    %111 = arith.addf %94, %110 : vector<64x256xf32>
    %c0_39 = arith.constant 0 : index
    %c0_40 = arith.constant 0 : index
    %112 = vector.load %arg14[%c0_39, %c0_40] : memref<64x1xf32, #tpu.memory_space<vmem>>, vector<64x1xf32>
    %c0_41 = arith.constant 0 : index
    %c0_42 = arith.constant 0 : index
    %113 = vector.load %arg15[%c0_41, %c0_42] : memref<64x1xf32, #tpu.memory_space<vmem>>, vector<64x1xf32>
    %c0_43 = arith.constant 0 : index
    %c0_44 = arith.constant 0 : index
    %114 = vector.load %arg16[%c0_43, %c0_44] : memref<32x64xf32, #tpu.memory_space<vmem>>, vector<32x64xf32>
    %c0_45 = arith.constant 0 : index
    %c0_46 = arith.constant 0 : index
    %115 = vector.load %arg17[%c0_45, %c0_46] : memref<64x32xf32, #tpu.memory_space<vmem>>, vector<64x32xf32>
    %cst_47 = arith.constant dense<0.000000e+00> : vector<64xf32>
    %116 = vector.multi_reduction <add>, %111, %cst_47 [1] : vector<64x256xf32> to vector<64xf32>
    %117 = vector.shape_cast %116 : vector<64xf32> to vector<64x1xf32>
    %cst_48 = arith.constant dense<0.000000e+00> : vector<32x1xf32>
    %118 = tpu.matmul %114, %117, %cst_48 {dimension_numbers = #tpu.dot_dimension_numbers<[1], [0], [0], [1], [0, 0, 1, 1], [], []>} : vector<32x64xf32>, vector<64x1xf32>, vector<32x1xf32> -> vector<32x1xf32>
    %cst_49 = arith.constant dense<0.000000e+00> : vector<64x1xf32>
    %119 = tpu.matmul %115, %118, %cst_49 {dimension_numbers = #tpu.dot_dimension_numbers<[1], [0], [0], [1], [0, 0, 1, 1], [], []>} : vector<64x32xf32>, vector<32x1xf32>, vector<64x1xf32> -> vector<64x1xf32>
    %120 = vector.broadcast %119 : vector<64x1xf32> to vector<64x256xf32>
    %121 = arith.subf %111, %120 : vector<64x256xf32>
    %122 = arith.mulf %121, %121 : vector<64x256xf32>
    %cst_50 = arith.constant dense<0.000000e+00> : vector<64xf32>
    %123 = vector.multi_reduction <add>, %122, %cst_50 [1] : vector<64x256xf32> to vector<64xf32>
    %124 = vector.shape_cast %123 : vector<64xf32> to vector<64x1xf32>
    %cst_51 = arith.constant dense<0.000000e+00> : vector<32x1xf32>
    %125 = tpu.matmul %114, %124, %cst_51 {dimension_numbers = #tpu.dot_dimension_numbers<[1], [0], [0], [1], [0, 0, 1, 1], [], []>} : vector<32x64xf32>, vector<64x1xf32>, vector<32x1xf32> -> vector<32x1xf32>
    %cst_52 = arith.constant dense<0.000000e+00> : vector<64x1xf32>
    %126 = tpu.matmul %115, %125, %cst_52 {dimension_numbers = #tpu.dot_dimension_numbers<[1], [0], [0], [1], [0, 0, 1, 1], [], []>} : vector<64x32xf32>, vector<32x1xf32>, vector<64x1xf32> -> vector<64x1xf32>
    %cst_53 = arith.constant 9.99999974E-6 : f32
    %127 = vector.broadcast %cst_53 : f32 to vector<64x1xf32>
    %128 = arith.addf %126, %127 : vector<64x1xf32>
    %129 = math.rsqrt %128 : vector<64x1xf32>
    %130 = arith.mulf %129, %112 : vector<64x1xf32>
    %131 = vector.broadcast %130 : vector<64x1xf32> to vector<64x256xf32>
    %132 = arith.mulf %121, %131 : vector<64x256xf32>
    %133 = vector.broadcast %113 : vector<64x1xf32> to vector<64x256xf32>
    %134 = arith.addf %132, %133 : vector<64x256xf32>
    %135 = arith.negf %134 : vector<64x256xf32>
    %136 = math.exp %135 : vector<64x256xf32>
    %cst_54 = arith.constant 1.000000e+00 : f32
    %137 = vector.broadcast %cst_54 : f32 to vector<64x256xf32>
    %138 = arith.addf %137, %136 : vector<64x256xf32>
    %139 = arith.divf %137, %138 : vector<64x256xf32>
    %140 = arith.mulf %134, %139 : vector<64x256xf32>
    %141 = arith.truncf %2 : vector<32x256xf32> to vector<32x256xbf16>
    %c0_55 = arith.constant 0 : index
    %c0_56 = arith.constant 0 : index
    %142 = vector.load %arg21[%c0_55, %c0_56] : memref<64x1xf32, #tpu.memory_space<vmem>>, vector<64x1xf32>
    %c17_i32_57 = arith.constant 17 : i32
    %143 = tpu.dynamic_rotate %140 by %c17_i32_57 dim 1 : vector<64x256xf32>, i32 -> vector<64x256xf32>
    %144 = vector.extract_strided_slice %0 {offsets = [0, 0], sizes = [1, 256], strides = [1, 1]} : vector<9x256xbf16> to vector<1x256xbf16>
    %145 = arith.extf %144 : vector<1x256xbf16> to vector<1x256xf32>
    %146 = vector.broadcast %145 : vector<1x256xf32> to vector<64x256xf32>
    %147 = arith.mulf %143, %146 : vector<64x256xf32>
    %148 = arith.truncf %147 : vector<64x256xf32> to vector<64x256xbf16>
    %c16_i32_58 = arith.constant 16 : i32
    %149 = tpu.dynamic_rotate %140 by %c16_i32_58 dim 1 : vector<64x256xf32>, i32 -> vector<64x256xf32>
    %150 = vector.extract_strided_slice %0 {offsets = [1, 0], sizes = [1, 256], strides = [1, 1]} : vector<9x256xbf16> to vector<1x256xbf16>
    %151 = arith.extf %150 : vector<1x256xbf16> to vector<1x256xf32>
    %152 = vector.broadcast %151 : vector<1x256xf32> to vector<64x256xf32>
    %153 = arith.mulf %149, %152 : vector<64x256xf32>
    %154 = arith.truncf %153 : vector<64x256xf32> to vector<64x256xbf16>
    %c15_i32_59 = arith.constant 15 : i32
    %155 = tpu.dynamic_rotate %140 by %c15_i32_59 dim 1 : vector<64x256xf32>, i32 -> vector<64x256xf32>
    %156 = vector.extract_strided_slice %0 {offsets = [2, 0], sizes = [1, 256], strides = [1, 1]} : vector<9x256xbf16> to vector<1x256xbf16>
    %157 = arith.extf %156 : vector<1x256xbf16> to vector<1x256xf32>
    %158 = vector.broadcast %157 : vector<1x256xf32> to vector<64x256xf32>
    %159 = arith.mulf %155, %158 : vector<64x256xf32>
    %160 = arith.truncf %159 : vector<64x256xf32> to vector<64x256xbf16>
    %161 = tpu.concatenate %148, %154, %160 in 0 : vector<64x256xbf16>, vector<64x256xbf16>, vector<64x256xbf16> -> vector<192x256xbf16>
    %c0_60 = arith.constant 0 : index
    %c0_61 = arith.constant 0 : index
    %162 = vector.load %arg18[%c0_60, %c0_61] : memref<64x192xbf16, #tpu.memory_space<vmem>>, vector<64x192xbf16>
    %cst_62 = arith.constant dense<0.000000e+00> : vector<64x256xf32>
    %163 = tpu.matmul %162, %161, %cst_62 {dimension_numbers = #tpu.dot_dimension_numbers<[1], [0], [0], [1], [0, 0, 1, 1], [], []>} : vector<64x192xbf16>, vector<192x256xbf16>, vector<64x256xf32> -> vector<64x256xf32>
    %c1_i32_63 = arith.constant 1 : i32
    %164 = tpu.dynamic_rotate %140 by %c1_i32_63 dim 1 : vector<64x256xf32>, i32 -> vector<64x256xf32>
    %165 = vector.extract_strided_slice %0 {offsets = [3, 0], sizes = [1, 256], strides = [1, 1]} : vector<9x256xbf16> to vector<1x256xbf16>
    %166 = arith.extf %165 : vector<1x256xbf16> to vector<1x256xf32>
    %167 = vector.broadcast %166 : vector<1x256xf32> to vector<64x256xf32>
    %168 = arith.mulf %164, %167 : vector<64x256xf32>
    %169 = arith.truncf %168 : vector<64x256xf32> to vector<64x256xbf16>
    %170 = arith.truncf %140 : vector<64x256xf32> to vector<64x256xbf16>
    %c255_i32_64 = arith.constant 255 : i32
    %171 = tpu.dynamic_rotate %140 by %c255_i32_64 dim 1 : vector<64x256xf32>, i32 -> vector<64x256xf32>
    %172 = vector.extract_strided_slice %0 {offsets = [5, 0], sizes = [1, 256], strides = [1, 1]} : vector<9x256xbf16> to vector<1x256xbf16>
    %173 = arith.extf %172 : vector<1x256xbf16> to vector<1x256xf32>
    %174 = vector.broadcast %173 : vector<1x256xf32> to vector<64x256xf32>
    %175 = arith.mulf %171, %174 : vector<64x256xf32>
    %176 = arith.truncf %175 : vector<64x256xf32> to vector<64x256xbf16>
    %177 = tpu.concatenate %169, %170, %176 in 0 : vector<64x256xbf16>, vector<64x256xbf16>, vector<64x256xbf16> -> vector<192x256xbf16>
    %c0_65 = arith.constant 0 : index
    %c0_66 = arith.constant 0 : index
    %178 = vector.load %arg19[%c0_65, %c0_66] : memref<64x192xbf16, #tpu.memory_space<vmem>>, vector<64x192xbf16>
    %cst_67 = arith.constant dense<0.000000e+00> : vector<64x256xf32>
    %179 = tpu.matmul %178, %177, %cst_67 {dimension_numbers = #tpu.dot_dimension_numbers<[1], [0], [0], [1], [0, 0, 1, 1], [], []>} : vector<64x192xbf16>, vector<192x256xbf16>, vector<64x256xf32> -> vector<64x256xf32>
    %180 = arith.addf %163, %179 : vector<64x256xf32>
    %c241_i32_68 = arith.constant 241 : i32
    %181 = tpu.dynamic_rotate %140 by %c241_i32_68 dim 1 : vector<64x256xf32>, i32 -> vector<64x256xf32>
    %182 = vector.extract_strided_slice %0 {offsets = [6, 0], sizes = [1, 256], strides = [1, 1]} : vector<9x256xbf16> to vector<1x256xbf16>
    %183 = arith.extf %182 : vector<1x256xbf16> to vector<1x256xf32>
    %184 = vector.broadcast %183 : vector<1x256xf32> to vector<64x256xf32>
    %185 = arith.mulf %181, %184 : vector<64x256xf32>
    %186 = arith.truncf %185 : vector<64x256xf32> to vector<64x256xbf16>
    %c240_i32_69 = arith.constant 240 : i32
    %187 = tpu.dynamic_rotate %140 by %c240_i32_69 dim 1 : vector<64x256xf32>, i32 -> vector<64x256xf32>
    %188 = vector.extract_strided_slice %0 {offsets = [7, 0], sizes = [1, 256], strides = [1, 1]} : vector<9x256xbf16> to vector<1x256xbf16>
    %189 = arith.extf %188 : vector<1x256xbf16> to vector<1x256xf32>
    %190 = vector.broadcast %189 : vector<1x256xf32> to vector<64x256xf32>
    %191 = arith.mulf %187, %190 : vector<64x256xf32>
    %192 = arith.truncf %191 : vector<64x256xf32> to vector<64x256xbf16>
    %c239_i32_70 = arith.constant 239 : i32
    %193 = tpu.dynamic_rotate %140 by %c239_i32_70 dim 1 : vector<64x256xf32>, i32 -> vector<64x256xf32>
    %194 = vector.extract_strided_slice %0 {offsets = [8, 0], sizes = [1, 256], strides = [1, 1]} : vector<9x256xbf16> to vector<1x256xbf16>
    %195 = arith.extf %194 : vector<1x256xbf16> to vector<1x256xf32>
    %196 = vector.broadcast %195 : vector<1x256xf32> to vector<64x256xf32>
    %197 = arith.mulf %193, %196 : vector<64x256xf32>
    %198 = arith.truncf %197 : vector<64x256xf32> to vector<64x256xbf16>
    %199 = tpu.concatenate %186, %192, %198, %141 in 0 : vector<64x256xbf16>, vector<64x256xbf16>, vector<64x256xbf16>, vector<32x256xbf16> -> vector<224x256xbf16>
    %c0_71 = arith.constant 0 : index
    %c0_72 = arith.constant 0 : index
    %200 = vector.load %arg20[%c0_71, %c0_72] : memref<64x224xbf16, #tpu.memory_space<vmem>>, vector<64x224xbf16>
    %cst_73 = arith.constant dense<0.000000e+00> : vector<64x256xf32>
    %201 = tpu.matmul %200, %199, %cst_73 {dimension_numbers = #tpu.dot_dimension_numbers<[1], [0], [0], [1], [0, 0, 1, 1], [], []>} : vector<64x224xbf16>, vector<224x256xbf16>, vector<64x256xf32> -> vector<64x256xf32>
    %202 = arith.addf %180, %201 : vector<64x256xf32>
    %203 = vector.broadcast %142 : vector<64x1xf32> to vector<64x256xf32>
    %204 = arith.addf %202, %203 : vector<64x256xf32>
    %c0_74 = arith.constant 0 : index
    %c0_75 = arith.constant 0 : index
    %c0_76 = arith.constant 0 : index
    %205 = vector.load %arg22[%c0_74, %c0_75, %c0_76] : memref<1x64x256xf32, #tpu.memory_space<vmem>>, vector<1x64x256xf32>
    %206 = vector.shape_cast %205 : vector<1x64x256xf32> to vector<64x256xf32>
    %207 = vector.shape_cast %204 : vector<64x256xf32> to vector<1x64x256xf32>
    tpu.vector_store %arg22[%c0_74, %c0_75, %c0_76], %207 {strides = array<i32>} : memref<1x64x256xf32, #tpu.memory_space<vmem>>, vector<1x64x256xf32>,
    return
  }
  func.func @transform_0(%arg0: i32) -> (i32, i32, i32) {
    %c0_i32 = arith.constant 0 : i32
    %c0_i32_0 = arith.constant 0 : i32
    %c0_i32_1 = arith.constant 0 : i32
    return %arg0, %c0_i32, %c0_i32_0 : i32, i32, i32
  }
  func.func @transform_1(%arg0: i32) -> (i32, i32, i32) {
    %c0_i32 = arith.constant 0 : i32
    %c0_i32_0 = arith.constant 0 : i32
    %c0_i32_1 = arith.constant 0 : i32
    return %arg0, %c0_i32, %c0_i32_0 : i32, i32, i32
  }
  func.func @transform_2(%arg0: i32) -> (i32, i32) {
    %c0_i32 = arith.constant 0 : i32
    %c0_i32_0 = arith.constant 0 : i32
    %c0_i32_1 = arith.constant 0 : i32
    return %c0_i32, %c0_i32_0 : i32, i32
  }
  func.func @transform_3(%arg0: i32) -> (i32, i32) {
    %c0_i32 = arith.constant 0 : i32
    %c0_i32_0 = arith.constant 0 : i32
    %c0_i32_1 = arith.constant 0 : i32
    return %c0_i32, %c0_i32_0 : i32, i32
  }
  func.func @transform_4(%arg0: i32) -> (i32, i32) {
    %c0_i32 = arith.constant 0 : i32
    %c0_i32_0 = arith.constant 0 : i32
    %c0_i32_1 = arith.constant 0 : i32
    return %c0_i32, %c0_i32_0 : i32, i32
  }
  func.func @transform_5(%arg0: i32) -> (i32, i32) {
    %c0_i32 = arith.constant 0 : i32
    %c0_i32_0 = arith.constant 0 : i32
    %c0_i32_1 = arith.constant 0 : i32
    return %c0_i32, %c0_i32_0 : i32, i32
  }
  func.func @transform_6(%arg0: i32) -> (i32, i32) {
    %c0_i32 = arith.constant 0 : i32
    %c0_i32_0 = arith.constant 0 : i32
    %c0_i32_1 = arith.constant 0 : i32
    return %c0_i32, %c0_i32_0 : i32, i32
  }
  func.func @transform_7(%arg0: i32) -> (i32, i32) {
    %c0_i32 = arith.constant 0 : i32
    %c0_i32_0 = arith.constant 0 : i32
    %c0_i32_1 = arith.constant 0 : i32
    return %c0_i32, %c0_i32_0 : i32, i32
  }
  func.func @transform_8(%arg0: i32) -> (i32, i32) {
    %c0_i32 = arith.constant 0 : i32
    %c0_i32_0 = arith.constant 0 : i32
    %c0_i32_1 = arith.constant 0 : i32
    return %c0_i32, %c0_i32_0 : i32, i32
  }
  func.func @transform_9(%arg0: i32) -> (i32, i32) {
    %c0_i32 = arith.constant 0 : i32
    %c0_i32_0 = arith.constant 0 : i32
    %c0_i32_1 = arith.constant 0 : i32
    return %c0_i32, %c0_i32_0 : i32, i32
  }
  func.func @transform_10(%arg0: i32) -> (i32, i32) {
    %c0_i32 = arith.constant 0 : i32
    %c0_i32_0 = arith.constant 0 : i32
    %c0_i32_1 = arith.constant 0 : i32
    return %c0_i32, %c0_i32_0 : i32, i32
  }
  func.func @transform_11(%arg0: i32) -> (i32, i32) {
    %c0_i32 = arith.constant 0 : i32
    %c0_i32_0 = arith.constant 0 : i32
    %c0_i32_1 = arith.constant 0 : i32
    return %c0_i32, %c0_i32_0 : i32, i32
  }
  func.func @transform_12(%arg0: i32) -> (i32, i32) {
    %c0_i32 = arith.constant 0 : i32
    %c0_i32_0 = arith.constant 0 : i32
    %c0_i32_1 = arith.constant 0 : i32
    return %c0_i32, %c0_i32_0 : i32, i32
  }
  func.func @transform_13(%arg0: i32) -> (i32, i32) {
    %c0_i32 = arith.constant 0 : i32
    %c0_i32_0 = arith.constant 0 : i32
    %c0_i32_1 = arith.constant 0 : i32
    return %c0_i32, %c0_i32_0 : i32, i32
  }
  func.func @transform_14(%arg0: i32) -> (i32, i32) {
    %c0_i32 = arith.constant 0 : i32
    %c0_i32_0 = arith.constant 0 : i32
    %c0_i32_1 = arith.constant 0 : i32
    return %c0_i32, %c0_i32_0 : i32, i32
  }
  func.func @transform_15(%arg0: i32) -> (i32, i32) {
    %c0_i32 = arith.constant 0 : i32
    %c0_i32_0 = arith.constant 0 : i32
    %c0_i32_1 = arith.constant 0 : i32
    return %c0_i32, %c0_i32_0 : i32, i32
  }
  func.func @transform_16(%arg0: i32) -> (i32, i32) {
    %c0_i32 = arith.constant 0 : i32
    %c0_i32_0 = arith.constant 0 : i32
    %c0_i32_1 = arith.constant 0 : i32
    return %c0_i32, %c0_i32_0 : i32, i32
  }
  func.func @transform_17(%arg0: i32) -> (i32, i32) {
    %c0_i32 = arith.constant 0 : i32
    %c0_i32_0 = arith.constant 0 : i32
    %c0_i32_1 = arith.constant 0 : i32
    return %c0_i32, %c0_i32_0 : i32, i32
  }
  func.func @transform_18(%arg0: i32) -> (i32, i32) {
    %c0_i32 = arith.constant 0 : i32
    %c0_i32_0 = arith.constant 0 : i32
    %c0_i32_1 = arith.constant 0 : i32
    return %c0_i32, %c0_i32_0 : i32, i32
  }
  func.func @transform_19(%arg0: i32) -> (i32, i32) {
    %c0_i32 = arith.constant 0 : i32
    %c0_i32_0 = arith.constant 0 : i32
    %c0_i32_1 = arith.constant 0 : i32
    return %c0_i32, %c0_i32_0 : i32, i32
  }
  func.func @transform_20(%arg0: i32) -> (i32, i32) {
    %c0_i32 = arith.constant 0 : i32
    %c0_i32_0 = arith.constant 0 : i32
    %c0_i32_1 = arith.constant 0 : i32
    return %c0_i32, %c0_i32_0 : i32, i32
  }
  func.func @transform_21(%arg0: i32) -> (i32, i32, i32) {
    %c0_i32 = arith.constant 0 : i32
    %c0_i32_0 = arith.constant 0 : i32
    %c0_i32_1 = arith.constant 0 : i32
    return %arg0, %c0_i32, %c0_i32_0 : i32, i32, i32
  }
}

</mosaic_0001>

<bundles_post_ra>
// kernel: tpu_custom_call.1
= control target key start
LH: loop header
LB: loop body
LE: loop exit
PB: predicated region body
PF: predicated region fallthrough
CT: control target
= control target key end

     0   :  { %s7842_s0 = inlined_call_operand.vmem [shape: f32[2,32,256], index: 0, kind: input, shape index: {}]   ;;  %s7843_s1 = inlined_call_operand.vmem [shape: f32[2,1,64], index: 1, kind: input, shape index: {}]   ;;  %s7844_s2 = inlined_call_operand.hbm [shape: bf16[9,256], index: 2, kind: input, shape index: {}]   ;;  %s7845_s3 = inlined_call_operand.vmem [shape: f32[32,1], index: 3, kind: input, shape index: {}]   ;;  %s7846_s4 = inlined_call_operand.vmem [shape: f32[32,1], index: 4, kind: input, shape index: {}]   ;;  %s7847_s5 = inlined_call_operand.vmem [shape: f32[32,32], index: 5, kind: input, shape index: {}]   ;;  %s7848_s6 = inlined_call_operand.vmem [shape: f32[32,32], index: 6, kind: input, shape index: {}]   ;;  %s7849_s7 = inlined_call_operand.hbm [shape: bf16[64,96], index: 7, kind: input, shape index: {}]   ;;  %s7850_s8 = inlined_call_operand.hbm [shape: bf16[64,96], index: 8, kind: input, shape index: {}]   ;;  %s7851_s9 = inlined_call_operand.hbm [shape: bf16[64,96], index: 9, kind: input, shape index: {}]   ;;  %s7852_s10 = inlined_call_operand.vmem [shape: f32[64,1], index: 10, kind: input, shape index: {}]   ;;  %s7853_s11 = inlined_call_operand.vmem [shape: f32[64,64], index: 11, kind: input, shape index: {}]   ;;  %s7854_s12 = inlined_call_operand.vmem [shape: f32[64,1], index: 12, kind: input, shape index: {}]   ;;  %s7855_s13 = inlined_call_operand.vmem [shape: f32[64,1], index: 13, kind: input, shape index: {}]   ;;  %s7856_s14 = inlined_call_operand.vmem [shape: f32[64,1], index: 14, kind: input, shape index: {}]   ;;  %s7857_s15 = inlined_call_operand.vmem [shape: f32[32,64], index: 15, kind: input, shape index: {}]   ;;  %s7858_s16 = inlined_call_operand.vmem [shape: f32[64,32], index: 16, kind: input, shape index: {}]   ;;  %s7859_s17 = inlined_call_operand.vmem [shape: bf16[64,192], index: 17, kind: input, shape index: {}]   ;;  %s7860_s18 = inlined_call_operand.vmem [shape: bf16[64,192], index: 18, kind: input, shape index: {}]   ;;  %s7861_s19 = inlined_call_operand.vmem [shape: bf16[64,224], index: 19, kind: input, shape index: {}]   ;;  %s7862_s20 = inlined_call_operand.vmem [shape: f32[64,1], index: 20, kind: input, shape index: {}]   ;;  %s7863_s21 = inlined_call_operand.hbm [shape: f32[2,64,256], index: 21, kind: output, shape index: {}]  }
   0x1   :  { %7981 = sst [smem:[#allocation71_spill]] %s7842_s0 }
   0x2   :  { %7982 = sst [smem:[#allocation72_spill]] %s7843_s1 }
   0x3   :  { %7983 = sst [smem:[#allocation73_spill]] %s7844_s2 }
   0x4   :  { %7984 = sst [smem:[#allocation74_spill]] %s7845_s3 }
   0x5   :  { %7985 = sst [smem:[#allocation75_spill]] %s7846_s4 }
   0x6   :  { %7986 = sst [smem:[#allocation76_spill]] %s7847_s5 }
   0x7   :  { %7987 = sst [smem:[#allocation77_spill]] %s7848_s6 }
   0x8   :  { %7988 = sst [smem:[#allocation78_spill]] %s7849_s7 }
   0x9   :  { %7989 = sst [smem:[#allocation79_spill]] %s7863_s21 }
   0xa   :  { %26 = vsyncpa [#allocation3], 0 }
   0xb   :  { %27 = vsyncpa [#allocation6], 0 }
   0xc   :  { %28 = vsyncpa [#allocation9], 0 }
   0xd   :  { %29 = vsyncpa [#allocation4], 0 }
   0xe   :  { %31 = vsyncpa [#allocation4 + $0x1], 0  ;;  %s5168_s2 = smov 0   ;;  %s5170_s25 = smov 0  }
   0xf   :  { %s5172_s26 = smov 0   ;;  %s5174_s27 = smov 0  }
  0x10 LB: > { %7990 = sst [smem:[#allocation15_spill]] %s5025_s2  ;;  %s5189_s3 = sadd.s32 4294967295, %s5037_s27   ;;  %s5037_s27 = sphi %s5174_s27, %s8189_s27   ;;  %s5033_s26 = sphi %s5172_s26, %s8191_s26   ;;  %s5029_s25 = sphi %s5170_s25, %s8193_s25   ;;  %s5025_s2 = sphi %s5168_s2, %s8192_s2  }
  0x11   : > { %7991 = sst [smem:[#allocation16_spill]] %s5033_s26  ;;  %s4218_s28 = sadd.s32 4294967294, %s5037_s27  }
  0x12   : > { %7992 = sst [smem:[#allocation17_spill]] %s5037_s27  ;;  %s5193_s29 = sadd.s32 1, %s5037_s27  }
  0x13   : > { %7993 = sst [smem:[#allocation18_spill]] %s5193_s29  ;;  %s495_s0 = sadd.s32 1, %s5033_s26 }
  0x14   : > { %s492_s4 = ssub.s32 %s5037_s27, %s5193_s29  ;;  %p505_p0 = scmp.ne.s32.totalorder %s5033_s26, %s5029_s25 }
  0x15   : > { %p493_p1 = scmp.eq.s32.totalorder %s492_s4, 0  ;;  %p506_p2 = scmp.eq.s32.totalorder %s5189_s3, 1 }
  0x16   : > { %p511_p3 = scmp.ne.s32.totalorder %s5029_s25, %s5025_s2  ;;  %p512_p4 = scmp.eq.s32.totalorder %s4218_s28, 1 }
  0x17   : > { %s5204_s30 = scalar_select %p493_p1, %s5033_s26, %s495_s0  }
  0x18   : > { %p5206_p5 = por %p506_p2, %p505_p0  ;;  %p5210_p6 = por %p512_p4, %p511_p3 }
  0x19   : > { %7994 = sst [smem:[#allocation19_spill]] %s5204_s30  ;;  %p4219_p7 = scmp.ge.s32.totalorder %s5037_s27, 1 }
  0x1a   : > { %s7996_s22 = scalar_select %p5210_p6, 1, 0 }
  0x1b   : > { %p519_p8 = scmp.lt.s32.totalorder %s5037_s27, 3  ;;  %p7878_p9 = scmp.eq.s32.totalorder %s5189_s3, 0 }
  0x1c   : > { %7997 = sst [smem:[#allocation20_spill]] %s7996_s22  ;;  %s5039_s1 = smov [#allocation5]  }
  0x1d   : > { %p5217_p10 = pnand %p4219_p7, %p519_p8  ;;  %s556_s24 = sshll.u32 %s5039_s1, 4  ;;  %s557_s24 = int_to_ptr.vmem [resolvable:$true] %s556_s24 }
  0x1e   : > { %s5040_s0 = smov [#allocation2]   ;;  %s4872_s30 = scalar_lea.vmem %s557_s24, 512 }
  0x1f   : > { %p4603_p11 = pneg %p5217_p10  ;;  %s531_s4 = sshll.u32 %s5040_s0, 4  ;;  %s532_s4 = int_to_ptr.vmem [resolvable:$true] %s531_s4 }
  0x20   : > { %p4873_p0 = scmp.ne.s32.totalorder %s557_s24, %s4872_s30  ;;  %p4880_p3 = scmp.lt.s32.totalorder %s557_s24, %s557_s24 }
  0x21   : > { %p5225_p12 = pnand %p7878_p9, %p4603_p11  ;;  %p4881_p4 = scmp.lt.s32.totalorder %s4872_s30, %s4872_s30 }
  0x23   : > { %p4863_p13 = pneg %p5225_p12  ;;  %p4882_p7 = por %p4881_p4, %p4880_p3 }
  0x25   : > { %p4875_p1 = pnand %p4873_p0, %p4863_p13 }
  0x27   : > { %p4876_p2 = pneg %p4875_p1 }
  0x29   : > { %p4883_p8 = pnand %p4882_p7, %p4876_p2 }
  0x2b   : > { %4886 = shalt.err (!%p4883_p8)
}
  0x2c   : > { %s7874_s1 = smov 64   ;;  %s7876_s26 = smov 4  }
  0x2d   : > { %s8000_s7 = sld [smem:[#allocation78_spill]]  ;;  %s4898_s22 = scalar_lea.vmem %s532_s4, 256 }
  0x2e   : > { %p4899_p11 = scmp.ne.s32.totalorder %s532_s4, %s4898_s22  ;;  %p4906_p2 = scmp.lt.s32.totalorder %s532_s4, %s532_s4 }
  0x2f   : > { %p4907_p3 = scmp.lt.s32.totalorder %s4898_s22, %s4898_s22 }
  0x30   : > { %p4901_p0 = pnand %p4899_p11, %p4863_p13 }
  0x31   : > { %p4908_p4 = por %p4907_p3, %p4906_p2 }
  0x32   : > { %p4902_p1 = pneg %p4901_p0 }
  0x33   : > { %4609 = dma.hbm_to_vmem [thread:$0]  (!%p5225_p12), %s8000_s7, 512, %s557_s24, [#allocation6], %s7874_s1, %s7874_s1, %s7876_s26  }
  0x34   : > { %p4909_p7 = pnand %p4908_p4, %p4902_p1 }
  0x36   : > { %4912 = shalt.err (!%p4909_p7)
}
  0x37   : > { %s5043_s30 = smov 128   ;;  %s5044_s2 = smov 8  }
  0x38   : > { %s8001_s29 = sld [smem:[#allocation73_spill]]  ;;  %s5045_s24 = smov [#allocation7]  }
  0x39   : > { %s569_s0 = sshll.u32 %s5045_s24, 4  ;;  %s5046_s1 = smov [#allocation8]   ;;  %s570_s0 = int_to_ptr.vmem [resolvable:$true] %s569_s0 }
  0x3a   : > { %s582_s26 = sshll.u32 %s5046_s1, 4  ;;  %s4924_s7 = scalar_lea.vmem %s570_s0, 512  ;;  %s583_s26 = int_to_ptr.vmem [resolvable:$true] %s582_s26 }
  0x3b   : > { %p4925_p8 = scmp.ne.s32.totalorder %s570_s0, %s4924_s7  ;;  %p4932_p1 = scmp.lt.s32.totalorder %s570_s0, %s570_s0 }
  0x3c   : > { %p4933_p2 = scmp.lt.s32.totalorder %s4924_s7, %s4924_s7 }
  0x3d   : > { %p4927_p11 = pnand %p4925_p8, %p4863_p13 }
  0x3e   : > { %4606 = dma.hbm_to_vmem [thread:$0]  (!%p5225_p12), %s8001_s29, 256, %s532_s4, [#allocation3], %s5043_s30, %s5043_s30, %s5044_s2  }
  0x3f   : > { %p4928_p0 = pneg %p4927_p11  ;;  %p4934_p3 = por %p4933_p2, %p4932_p1 }
  0x41   : > { %p4935_p4 = pnand %p4934_p3, %p4928_p0 }
  0x43   : > { %4938 = shalt.err (!%p4935_p4)
}
  0x44   : > { %s8002_s21 = smov 4   ;;  %s8003_s2 = smov 64  }
  0x45   : > { %4612 = dma.hbm_to_vmem [thread:$0]  (!%p5225_p12), %s7850_s8, 512, %s570_s0, [#allocation6], %s8003_s2, %s8003_s2, %s8002_s21  }
  0x46   : > { %s4950_s4 = scalar_lea.vmem %s583_s26, 512  ;;  %p4958_p9 = scmp.lt.s32.totalorder %s583_s26, %s583_s26 }
  0x47   : > { %p4951_p7 = scmp.ne.s32.totalorder %s583_s26, %s4950_s4  ;;  %p4959_p1 = scmp.lt.s32.totalorder %s4950_s4, %s4950_s4 }
  0x49   : > { %p4953_p8 = pnand %p4951_p7, %p4863_p13  ;;  %p4960_p0 = por %p4959_p1, %p4958_p9 }
  0x4b   : > { %p4954_p11 = pneg %p4953_p8 }
  0x4d   : > { %p4961_p2 = pnand %p4960_p0, %p4954_p11 }
  0x4f   : > { %4964 = shalt.err (!%p4961_p2)
}
  0x50   : > { %4615 = dma.hbm_to_vmem [thread:$0]  (!%p5225_p12), %s7851_s9, 512, %s583_s26, [#allocation9], %s8003_s2, %s8003_s2, %s8002_s21  }
  0x51   : > { %645 = sbr.rel (%p5217_p10) target bundleno = 4051 (0xfd3), region = 104 }
  0x56   : > { %p8004_p13 = scmp.eq.s32.totalorder %s5189_s3, 0 }
  0x58   : > { %5008 = dma.done.wait (%p8004_p13), [#allocation3], 256   ;;  %p8005_p3 = pmov %p8004_p13 }
  0x5a   : > { %5010 = vsyncadd (%p8005_p3), [#allocation3], 4294967040  ;;  %p8006_p9 = pmov %p8005_p3 }
  0x5b   : > { %p8007_p4 = pmov %p8005_p3 }
  0x5c   : > { %5012 = dma.done.wait (%p8006_p9), [#allocation6], 1024  }
  0x5d   : > { %5014 = vsyncadd (%p8007_p4), [#allocation6], 4294966272  ;;  %p8008_p7 = pmov %p8005_p3 }
  0x5e   : > { %p8009_p12 = pmov %p8005_p3 }
  0x5f   : > { %5016 = dma.done.wait (%p8008_p7), [#allocation9], 512  }
  0x60   : > { %5018 = vsyncadd (%p8009_p12), [#allocation9], 4294966784  ;;  %p720_p10 = scmp.lt.s32.totalorder %s5189_s3, 1  ;;  %s8010_s29 = sld [smem:[#allocation71_spill]]  ;;  %vm767_vm0 = vcmask 261120   ;;  %v5047_v21 = vmov 0  }
  0x61   : > { %s8011_s2 = sld [smem:[#allocation76_spill]]  ;;  %4680 = vset.pattern.permute.xlu1 %v5047_v21  ;;  %4679 = vset.pattern.permute.xlu0 %v5047_v21  ;;  %s7881_s7 = smov 127   ;;  %vm2120_vm1 = vcmask 523264   ;;  %vm1577_vm4 = vcmask 785408  }
  0x62   : > { %s5288_s26 = scalar_select %p720_p10, %s5189_s3, 1 }
  0x63   : > { %s8013_s6 = sld [smem:[#allocation77_spill]]  ;;  %s7928_s1 = smov 1  }
  0x64   : > { %s4363_s23 = sshll.u32 %s5288_s26, 6  ;;  %s8014_s28 = sld [smem:[#allocation75_spill]] }
  0x65   : > { %s7883_s30 = smov 16   ;;  %s7885_s0 = smov 111  }
  0x66   : > { %s5294_s24 = scalar_lea.vmem %s8010_s29, %s4363_s23  ;;  %s7879_s23 = smov 15  }
  0x67   : > { %v5297_v0 = vld [vmem:[%s5294_s24 + $0x30] sm:$0xff]  ;;  %v5300_v1 = vld [vmem:[%s5294_s24 + $0x38] sm:$0xff]  ;;  %v5305_v3 = vld [vmem:[%s5294_s24 + $0x20] sm:$0xff]  ;;  %s8012_s22 = smov %s8011_s2  ;;  %s7887_s29 = smov 17  }
  0x68   : > { %v764_v2 = vadd.f32 %v5300_v1, %v5297_v0  ;;  %v5308_v4 = vld [vmem:[%s5294_s24 + $0x28] sm:$0xff]  ;;  %v5311_v5 = vld [vmem:[%s5294_s24 + $0x10] sm:$0xff]  ;;  %v5314_v6 = vld [vmem:[%s5294_s24 + $0x18] sm:$0xff]  ;;  %s7926_s21 = smov 112   ;;  %s8044_s27 = smov 127  }
  0x69   : > { %v761_v7 = vadd.f32 %v5308_v4, %v5305_v3  ;;  %v758_v8 = vadd.f32 %v5314_v6, %v5311_v5  ;;  %v5321_v9 = vld [vmem:[%s5294_s24] sm:$0xff]  ;;  %v5324_v10 = vld [vmem:[%s5294_s24 + $0x8] sm:$0xff]  ;;  %v5340_v18 = vld [vmem:[%s8012_s22 + $0x10] sm:$0xff] }
  0x6a   : > { %765 = vadd.xlane.f32.xlu0 %v764_v2  ;;  %v755_v11 = vadd.f32 %v5324_v10, %v5321_v9  ;;  %v747_v12 = vld [vmem:[%s8011_s2] sm:$0xff]  ;;  %v5335_v17 = vld [vmem:[%s8012_s22 + $0x8] sm:$0xff]  ;;  %v5349_v19 = vld [vmem:[%s8012_s22 + $0x18] sm:$0xff]  ;;  %s8015_s2 = sld [smem:[#allocation74_spill]] }
  0x6b   : > { %759 = vadd.xlane.f32.xlu1 %v758_v8  ;;  %4453 = vmatprep.mubr.msk.f32.mxu0 %vm767_vm0, %v747_v12  ;;  %v751_v20 = vld [vmem:[%s8013_s6] sm:$0xff]  ;;  %v5363_v26 = vld [vmem:[%s8013_s6 + $0x8] sm:$0xff]  ;;  %v5368_v27 = vld [vmem:[%s8013_s6 + $0x10] sm:$0xff] }
  0x6c   : > { %4495 = vmatprep.mubr.msk.f32.mxu1 %vm767_vm0, %v751_v20  ;;  %v5377_v28 = vld [vmem:[%s8013_s6 + $0x18] sm:$0xff]  ;;  %v745_v57 = vld [vmem:[%s8014_s28 + $0x10] sm:$0xff] }
  0x6d   : > { %v746_v58 = vld [vmem:[%s8014_s28 + $0x18] sm:$0xff] }
  0x6e   : > { %762 = vadd.xlane.f32.xlu0 %v761_v7 }
  0x6f   : > { %756 = vadd.xlane.f32.xlu1 %v755_v11 }
  0x70   : > { %s8016_s4 = smov %s8015_s2  ;;  %v742_v11 = vld [vmem:[%s8015_s2 + $0x18] sm:$0xff]  ;;  %s8043_s2 = smov 1  }
  0xf3   : > { %v766_v13 = vpop.xlane.xlu0 %765 }
  0xf4   : > { %4445 = vmatprep.subr.mxu0 %v766_v13  ;;  %v760_v14 = vpop.xlane.xlu1 %759 }
  0xf5   : > { %4446 = vmatpush3.msra.mxu0 %v766_v13  ;;  %v741_v13 = vld [vmem:[%s8016_s4 + $0x10] sm:$0xff] }
  0xf7   : > { %v763_v15 = vpop.xlane.xlu0 %762 }
  0xf8   : > { %4447 = vmatprep.subr.mxu0 %v763_v15  ;;  %v757_v16 = vpop.xlane.xlu1 %756 }
  0xf9   : > { %4448 = vmatpush3.msra.mxu0 %v763_v15 }
  0xfa   : > { %4449 = vmatprep.subr.mxu0 %v760_v14 }
  0xfb   : > { %4450 = vmatpush3.msra.mxu0 %v760_v14 }
  0xfc   : > { %4451 = vmatprep.subr.mxu0 %v757_v16 }
  0xfd   : > { %4452 = vmatpush3.msra.mxu0 %v757_v16 }
  0xfe   : > { %4454 = vmatmul.mubr.msk.f32.vlgmr.msra.gmra.mxu0 %vm767_vm0, %v5335_v17 }
  0xff   : > { %4456 = vmatprep.mubr.msk.f32.mxu0 %vm767_vm0, %v5340_v18 }
 0x102   : > { %4457 = vmatmul.mubr.msk.f32.gmra.mxu0 %vm767_vm0, %v5349_v19 }
 0x103   : > { %4467 = vmatprep.mubr.msk.f32.mxu0 %vm767_vm0, %v751_v20  ;;  %v739_v20 = vld [vmem:[%s8016_s4] sm:$0xff] }
 0x1be   : > { %v4455_v22 = vpop.f32.mrf.mxu0 }
 0x1c0   : > { %v846_v23 = vpop.f32.mrf.mxu0 }
 0x1c2   : > { %v4458_v24 = vpop.f32.mrf.mxu0 }
 0x1c3   : > { %4459 = vmatprep.subr.mxu0 %v4458_v24 }
 0x1c4   : > { %v856_v25 = vpop.f32.mrf.mxu0  ;;  %4460 = vmatpush3.msra.mxu0 %v4458_v24  ;;  %v744_v24 = vld [vmem:[%s8014_s28 + $0x8] sm:$0xff] }
 0x1c5   : > { %4461 = vmatprep.subr.mxu0 %v856_v25 }
 0x1c6   : > { %4462 = vmatpush3.msra.mxu0 %v856_v25  ;;  %v743_v25 = vld [vmem:[%s8014_s28] sm:$0xff] }
 0x1c7   : > { %4463 = vmatprep.subr.mxu0 %v4455_v22 }
 0x1c8   : > { %4464 = vmatpush3.msra.mxu0 %v4455_v22 }
 0x1c9   : > { %4465 = vmatprep.subr.mxu0 %v846_v23 }
 0x1ca   : > { %4466 = vmatpush3.msra.mxu0 %v846_v23 }
 0x1cb   : > { %4468 = vmatmul.mubr.msk.f32.vlgmr.msra.gmra.mxu0 %vm767_vm0, %v5363_v26 }
 0x1cc   : > { %4470 = vmatprep.mubr.msk.f32.mxu0 %vm767_vm0, %v5368_v27 }
 0x1cf   : > { %4471 = vmatmul.mubr.msk.f32.gmra.mxu0 %vm767_vm0, %v5377_v28 }
 0x1d0   : > { %4481 = vmatprep.mubr.msk.f32.mxu0 %vm767_vm0, %v747_v12 }
 0x28b   : > { %v4469_v29 = vpop.f32.mrf.mxu0 }
 0x28c   : > { %969 = vperm.xlu1 %4680, %v4469_v29  }
 0x28d   : > { %v943_v30 = vpop.f32.mrf.mxu0 }
 0x28f   : > { %v4472_v31 = vpop.f32.mrf.mxu0 }
 0x290   : > { %979 = vperm.xlu0 %4679, %v4472_v31  }
 0x291   : > { %v953_v32 = vpop.f32.mrf.mxu0 }
 0x292   : > { %974 = vperm.xlu1 %4680, %v953_v32  }
 0x296   : > { %964 = vperm.xlu1 %4680, %v943_v30  }
 0x307   : > { %v970_v33 = vpop.permute.xlu1 %969 }
 0x308   : > { %v5383_v34 = vsub.f32 %v5311_v5, %v970_v33  ;;  %v5386_v36 = vsub.f32 %v5314_v6, %v970_v33 }
 0x30a   : > { %v992_v44 = vmul.f32 %v5383_v34, %v5383_v34  ;;  %v993_v48 = vmul.f32 %v5386_v36, %v5386_v36 }
 0x30b   : > { %v980_v35 = vpop.permute.xlu0 %979 }
 0x30c   : > { %v5389_v37 = vsub.f32 %v5297_v0, %v980_v35  ;;  %v5392_v38 = vsub.f32 %v5300_v1, %v980_v35  ;;  %v1001_v53 = vadd.f32 %v993_v48, %v992_v44 }
 0x30d   : > { %v975_v39 = vpop.permute.xlu1 %974 }
 0x30e   : > { %v5395_v40 = vsub.f32 %v5305_v3, %v975_v39  ;;  %v5398_v41 = vsub.f32 %v5308_v4, %v975_v39  ;;  %v996_v42 = vmul.f32 %v5389_v37, %v5389_v37  ;;  %v997_v43 = vmul.f32 %v5392_v38, %v5392_v38 }
 0x310   : > { %v1007_v45 = vadd.f32 %v997_v43, %v996_v42  ;;  %v994_v46 = vmul.f32 %v5395_v40, %v5395_v40  ;;  %v995_v47 = vmul.f32 %v5398_v41, %v5398_v41 }
 0x311   : > { %v965_v49 = vpop.permute.xlu1 %964 }
 0x312   : > { %v5413_v50 = vsub.f32 %v5321_v9, %v965_v49  ;;  %v5416_v51 = vsub.f32 %v5324_v10, %v965_v49  ;;  %1008 = vadd.xlane.f32.xlu1 %v1007_v45  ;;  %v1004_v52 = vadd.f32 %v995_v47, %v994_v46 }
 0x314   : > { %1005 = vadd.xlane.f32.xlu0 %v1004_v52  ;;  %v990_v54 = vmul.f32 %v5413_v50, %v5413_v50  ;;  %v991_v55 = vmul.f32 %v5416_v51, %v5416_v51 }
 0x316   : > { %1002 = vadd.xlane.f32.xlu1 %v1001_v53  ;;  %v998_v56 = vadd.f32 %v991_v55, %v990_v54 }
 0x31a   : > { %999 = vadd.xlane.f32.xlu1 %v998_v56 }
 0x32b   : > { %1228 = vperm.xlu1 %4680, %v745_v57  }
 0x32f   : > { %1233 = vperm.xlu1 %4680, %v746_v58  }
 0x39b   : > { %v1009_v59 = vpop.xlane.xlu1 %1008 }
 0x39c   : > { %4473 = vmatprep.subr.mxu0 %v1009_v59 }
 0x39d   : > { %v1006_v60 = vpop.xlane.xlu0 %1005  ;;  %4474 = vmatpush3.msra.mxu0 %v1009_v59 }
 0x39e   : > { %4475 = vmatprep.subr.mxu0 %v1006_v60 }
 0x39f   : > { %4476 = vmatpush3.msra.mxu0 %v1006_v60  ;;  %v1003_v61 = vpop.xlane.xlu1 %1002 }
 0x3a0   : > { %4477 = vmatprep.subr.mxu0 %v1003_v61 }
 0x3a1   : > { %4478 = vmatpush3.msra.mxu0 %v1003_v61 }
 0x3a3   : > { %v1000_v62 = vpop.xlane.xlu1 %999 }
 0x3a4   : > { %4479 = vmatprep.subr.mxu0 %v1000_v62 }
 0x3a5   : > { %4480 = vmatpush3.msra.mxu0 %v1000_v62 }
 0x3a6   : > { %4482 = vmatmul.mubr.msk.f32.vlgmr.msra.gmra.mxu0 %vm767_vm0, %v5335_v17  ;;  %v740_v17 = vld [vmem:[%s8016_s4 + $0x8] sm:$0xff]  ;;  %s5056_s4 = smov [#allocation10]  }
 0x3a7   : > { %4484 = vmatprep.mubr.msk.f32.mxu0 %vm767_vm0, %v5340_v18 }
 0x3aa   : > { %4485 = vmatmul.mubr.msk.f32.gmra.mxu0 %vm767_vm0, %v5349_v19 }
 0x3ab   : > { %1622 = vmatprep.mubr.bf16.mxu0 %v5047_v21 }
 0x466   : > { %v4483_v63 = vpop.f32.mrf.mxu0 }
 0x468   : > { %v1076_v0 = vpop.f32.mrf.mxu0 }
 0x46a   : > { %v4486_v1 = vpop.f32.mrf.mxu0 }
 0x46b   : > { %4487 = vmatprep.subr.mxu1 %v4486_v1 }
 0x46c   : > { %v1086_v2 = vpop.f32.mrf.mxu0  ;;  %4488 = vmatpush3.msra.mxu1 %v4486_v1 }
 0x46d   : > { %4489 = vmatprep.subr.mxu1 %v1086_v2 }
 0x46e   : > { %4490 = vmatpush3.msra.mxu1 %v1086_v2 }
 0x46f   : > { %4491 = vmatprep.subr.mxu1 %v4483_v63 }
 0x470   : > { %4492 = vmatpush3.msra.mxu1 %v4483_v63 }
 0x471   : > { %4493 = vmatprep.subr.mxu1 %v1076_v0 }
 0x472   : > { %4494 = vmatpush3.msra.mxu1 %v1076_v0 }
 0x473   : > { %4496 = vmatmul.mubr.msk.f32.vlgmr.msra.gmra.mxu1 %vm767_vm0, %v5363_v26  ;;  %v1229_v26 = vpop.permute.xlu1 %1228 }
 0x474   : > { %4498 = vmatprep.mubr.msk.f32.mxu1 %vm767_vm0, %v5368_v27 }
 0x477   : > { %4499 = vmatmul.mubr.msk.f32.gmra.mxu1 %vm767_vm0, %v5377_v28  ;;  %v1234_v27 = vpop.permute.xlu1 %1233 }
 0x533   : > { %v4497_v3 = vpop.f32.mrf.mxu1 }
 0x534   : > { %v1167_v5 = vadd.f32 1e-05, %v4497_v3 }
 0x535   : > { %v1161_v4 = vpop.f32.mrf.mxu1 }
 0x536   : > { %v1162_v9 = vadd.f32 1e-05, %v1161_v4 }
 0x537   : > { %v4500_v6 = vpop.f32.mrf.mxu1 }
 0x538   : > { %v1177_v7 = vadd.f32 1e-05, %v4500_v6 }
 0x539   : > { %v1171_v8 = vpop.f32.mrf.mxu1 }
 0x53a   : > { %4729 = vrsqrt.f32 %v1177_v7  ;;  %v1172_v10 = vadd.f32 1e-05, %v1171_v8 }
 0x53b   : > { %4731 = vrsqrt.f32 %v1167_v5 }
 0x53c   : > { %4733 = vrsqrt.f32 %v1172_v10 }
 0x53d   : > { %4735 = vrsqrt.f32 %v1162_v9 }
 0x547   : > { %v4730_v12 = vpop.eup %4729 }
 0x548   : > { %v4732_v14 = vpop.eup %4731  ;;  %v1187_v15 = vmul.f32 %v4730_v12, %v742_v11 }
 0x549   : > { %v4734_v16 = vpop.eup %4733  ;;  %v1185_v22 = vmul.f32 %v4732_v14, %v740_v17 }
 0x54a   : > { %1205 = vperm.xlu0 %4679, %v1187_v15   ;;  %v1186_v18 = vmul.f32 %v4734_v16, %v741_v13  ;;  %v4736_v19 = vpop.eup %4735 }
 0x54b   : > { %v1184_v23 = vmul.f32 %v4736_v19, %v739_v20 }
 0x54c   : > { %1200 = vperm.xlu1 %4680, %v1186_v18  }
 0x54e   : > { %1195 = vperm.xlu0 %4679, %v1185_v22  }
 0x550   : > { %1190 = vperm.xlu1 %4680, %v1184_v23  }
 0x552   : > { %1223 = vperm.xlu0 %4679, %v744_v24  }
 0x554   : > { %1218 = vperm.xlu1 %4680, %v743_v25  }
 0x5c5   : > { %v1206_v28 = vpop.permute.xlu0 %1205 }
 0x5c6   : > { %v1214_v58 = vmul.f32 %v1206_v28, %v5389_v37  ;;  %v1215_v60 = vmul.f32 %v1206_v28, %v5392_v38 }
 0x5c7   : > { %v1201_v29 = vpop.permute.xlu1 %1200 }
 0x5c8   : > { %v1212_v59 = vmul.f32 %v1201_v29, %v5395_v40  ;;  %v1242_v61 = vadd.f32 %v1234_v27, %v1214_v58  ;;  %v1213_v62 = vmul.f32 %v1201_v29, %v5398_v41  ;;  %v1243_v0 = vadd.f32 %v1234_v27, %v1215_v60 }
 0x5c9   : > { %v1196_v30 = vpop.permute.xlu0 %1195 }
 0x5ca   : > { %v1210_v32 = vmul.f32 %v1196_v30, %v5383_v34  ;;  %v1211_v33 = vmul.f32 %v1196_v30, %v5386_v36  ;;  %v1240_v63 = vadd.f32 %v1229_v26, %v1212_v59  ;;  %v4255_v1 = vmul.f32 -1.442695, %v1242_v61  ;;  %v729_v59 = vld [vmem:[#allocation2] sm:$0xff] }
 0x5cb   : > { %v1191_v31 = vpop.permute.xlu1 %1190  ;;  %v1241_v2 = vadd.f32 %v1229_v26, %v1213_v62  ;;  %v4256_v6 = vmul.f32 -1.442695, %v1243_v0 }
 0x5cc   : > { %v1208_v39 = vmul.f32 %v1191_v31, %v5413_v50  ;;  %v1209_v42 = vmul.f32 %v1191_v31, %v5416_v51  ;;  %v4253_v3 = vmul.f32 -1.442695, %v1240_v63 }
 0x5cd   : > { %v1224_v35 = vpop.permute.xlu0 %1223  ;;  %v4254_v40 = vmul.f32 -1.442695, %v1241_v2 }
 0x5ce   : > { %v1238_v43 = vadd.f32 %v1224_v35, %v1210_v32  ;;  %v1239_v44 = vadd.f32 %v1224_v35, %v1211_v33 }
 0x5cf   : > { %v1219_v45 = vpop.permute.xlu1 %1218 }
 0x5d0   : > { %v4251_v46 = vmul.f32 -1.442695, %v1238_v43  ;;  %v4252_v47 = vmul.f32 -1.442695, %v1239_v44  ;;  %v1236_v48 = vadd.f32 %v1219_v45, %v1208_v39  ;;  %v1237_v49 = vadd.f32 %v1219_v45, %v1209_v42 }
 0x5d2   : > { %4737 = vpow2.f32 %v4251_v46  ;;  %v4249_v52 = vmul.f32 -1.442695, %v1236_v48  ;;  %v4250_v53 = vmul.f32 -1.442695, %v1237_v49 }
 0x5d3   : > { %4739 = vpow2.f32 %v4252_v47  ;;  %v1324_v47 = vlaneseq }
 0x5d4   : > { %4741 = vpow2.f32 %v4249_v52 }
 0x5d5   : > { %4743 = vpow2.f32 %v4250_v53  ;;  %v5635_v53 = vshrl.u32 %v1324_v47, 7  ;;  %v5659_v62 = vand.u32 127, %v1324_v47 }
 0x5d7   : > { %8018 = vst [vmem:[#allocation21_spill] sm:$0xff] %v5659_v62  ;;  %vm1520_vm2 = vcmp.lt.s32.totalorder %v5659_v62, 127  ;;  %vm1471_vm3 = vcmp.lt.s32.totalorder %v5659_v62, 1  ;;  %vm1418_vm5 = vcmp.lt.s32.totalorder %v5659_v62, 15  ;;  %vm1373_vm6 = vcmp.lt.s32.totalorder %v5659_v62, 16 }
 0x5d8   : > { %vm1326_vm7 = vcmp.lt.s32.totalorder %v5659_v62, 17  ;;  %vm1874_vm8 = vcmp.lt.s32.totalorder %v5659_v62, 111  ;;  %vm1829_vm9 = vcmp.lt.s32.totalorder %v5659_v62, 112  ;;  %vm1784_vm10 = vcmp.lt.s32.totalorder %v5659_v62, 113 }
 0x5df   : > { %v4738_v34 = vpop.eup %4737 }
 0x5e0   : > { %v4740_v36 = vpop.eup %4739  ;;  %v1270_v54 = vadd.f32 1.0, %v4738_v34 }
 0x5e1   : > { %v4742_v55 = vpop.eup %4741  ;;  %v1271_v50 = vadd.f32 1.0, %v4740_v36  ;;  %v5640_v36 = vsub.s32 0, %v5635_v53 }
 0x5e2   : > { %v4744_v56 = vpop.eup %4743  ;;  %4745 = vrcp.f32 %v1270_v54  ;;  %v1268_v51 = vadd.f32 1.0, %v4742_v55 }
 0x5e3   : > { %4747 = vrcp.f32 %v1271_v50  ;;  %v1269_v57 = vadd.f32 1.0, %v4744_v56 }
 0x5e4   : > { %4749 = vrcp.f32 %v1268_v51 }
 0x5e5   : > { %4751 = vrcp.f32 %v1269_v57  ;;  %v2104_v57 = vld [vmem:[%s7853_s11 + $0x30] sm:$0xff] }
 0x5e6   : > { %4753 = vpow2.f32 %v4255_v1  ;;  %v1531_v1 = vsub.s32 5, %v5635_v53 }
 0x5e7   : > { %4755 = vpow2.f32 %v4253_v3  ;;  %v5667_v3 = vunpack.c.l.bf16 %v729_v59 }
 0x5e8   : > { %4757 = vpow2.f32 %v4256_v6 }
 0x5e9   : > { %4759 = vpow2.f32 %v4254_v40  ;;  %v2101_v40 = vld [vmem:[%s7853_s11 + $0x18] sm:$0xff] }
 0x5ef   : > { %v4746_v4 = vpop.eup %4745 }
 0x5f0   : > { %v4748_v5 = vpop.eup %4747  ;;  %v5467_v7 = vmul.f32 %v4746_v4, %v1238_v43 }
 0x5f1   : > { %v4750_v37 = vpop.eup %4749  ;;  %v5473_v41 = vmul.f32 %v4748_v5, %v1239_v44 }
 0x5f2   : > { %v5469_v8 = vmul.f32 %v4750_v37, %v1236_v48  ;;  %1506 = vrot.lane.b32.xlu0 %v5467_v7, %s7881_s7  ;;  %v4752_v38 = vpop.eup %4751  ;;  %v2105_v37 = vld [vmem:[%s7853_s11 + $0x38] sm:$0xff] }
 0x5f3   : > { %v5477_v9 = vmul.f32 %v4752_v38, %v1237_v49  ;;  %v4754_v10 = vpop.eup %4753 }
 0x5f4   : > { %1504 = vrot.lane.b32.xlu1 %v5469_v8, %s7881_s7  ;;  %v4756_v11 = vpop.eup %4755  ;;  %v1274_v12 = vadd.f32 1.0, %v4754_v10 }
 0x5f5   : > { %v4758_v13 = vpop.eup %4757  ;;  %v1272_v14 = vadd.f32 1.0, %v4756_v11 }
 0x5f6   : > { %1514 = vrot.lane.b32.xlu0 %v5473_v41, %s7881_s7  ;;  %v4760_v15 = vpop.eup %4759  ;;  %v1275_v16 = vadd.f32 1.0, %v4758_v13  ;;  %4761 = vrcp.f32 %v1274_v12 }
 0x5f7   : > { %v1273_v17 = vadd.f32 1.0, %v4760_v15  ;;  %4763 = vrcp.f32 %v1272_v14 }
 0x5f8   : > { %1512 = vrot.lane.b32.xlu1 %v5477_v9, %s7881_s7  ;;  %4765 = vrcp.f32 %v1275_v16 }
 0x5f9   : > { %4767 = vrcp.f32 %v1273_v17  ;;  %v5694_v17 = vrot.slane %v5667_v3, %v1531_v1 }
 0x5fa   : > { %1457 = vrot.lane.b32.xlu0 %v5467_v7, %s7928_s1 }
 0x5fb   : > { %8020 = vst [vmem:[#allocation23_spill] sm:$0xff] %v5694_v17 }
 0x5fc   : > { %1455 = vrot.lane.b32.xlu1 %v5469_v8, %s7928_s1 }
 0x5fe   : > { %1465 = vrot.lane.b32.xlu0 %v5473_v41, %s7928_s1 }
 0x600   : > { %1463 = vrot.lane.b32.xlu1 %v5477_v9, %s7928_s1 }
 0x602   : > { %1404 = vrot.lane.b32.xlu0 %v5467_v7, %s7879_s23 }
 0x603   : > { %v4762_v18 = vpop.eup %4761 }
 0x604   : > { %1402 = vrot.lane.b32.xlu1 %v5469_v8, %s7879_s23  ;;  %v4764_v19 = vpop.eup %4763  ;;  %v5509_v20 = vmul.f32 %v4762_v18, %v1242_v61 }
 0x605   : > { %v4766_v22 = vpop.eup %4765  ;;  %v5513_v23 = vmul.f32 %v4764_v19, %v1240_v63  ;;  %v2103_v63 = vld [vmem:[%s7853_s11 + $0x28] sm:$0xff] }
 0x606   : > { %1412 = vrot.lane.b32.xlu0 %v5473_v41, %s7879_s23  ;;  %v4768_v24 = vpop.eup %4767  ;;  %v5517_v25 = vmul.f32 %v4766_v22, %v1243_v0  ;;  %v5664_v0 = vunpack.c.h.bf16 %v729_v59  ;;  %v2102_v22 = vld [vmem:[%s7853_s11 + $0x20] sm:$0xff] }
 0x607   : > { %v5521_v26 = vmul.f32 %v4768_v24, %v1241_v2  ;;  %v2099_v24 = vld [vmem:[%s7853_s11 + $0x8] sm:$0xff] }
 0x608   : > { %1410 = vrot.lane.b32.xlu1 %v5477_v9, %s7879_s23  ;;  %v5679_v38 = vrot.slane %v5664_v0, %v1531_v1 }
 0x60a   : > { %1359 = vrot.lane.b32.xlu0 %v5467_v7, %s7883_s30  ;;  %8019 = vst [vmem:[#allocation22_spill] sm:$0xff] %v5679_v38 }
 0x60c   : > { %1357 = vrot.lane.b32.xlu1 %v5469_v8, %s7883_s30 }
 0x60e   : > { %1367 = vrot.lane.b32.xlu0 %v5473_v41, %s7883_s30 }
 0x610   : > { %1365 = vrot.lane.b32.xlu1 %v5477_v9, %s7883_s30 }
 0x612   : > { %1310 = vrot.lane.b32.xlu0 %v5467_v7, %s7887_s29 }
 0x614   : > { %1308 = vrot.lane.b32.xlu1 %v5469_v8, %s7887_s29 }
 0x616   : > { %1510 = vrot.lane.b32.xlu0 %v5509_v20, %s7881_s7 }
 0x618   : > { %1508 = vrot.lane.b32.xlu1 %v5513_v23, %s7881_s7 }
 0x61a   : > { %1518 = vrot.lane.b32.xlu0 %v5517_v25, %s7881_s7 }
 0x61c   : > { %1516 = vrot.lane.b32.xlu1 %v5521_v26, %s7881_s7 }
 0x61e   : > { %1461 = vrot.lane.b32.xlu0 %v5509_v20, %s7928_s1 }
 0x620   : > { %1316 = vrot.lane.b32.xlu1 %v5477_v9, %s7887_s29 }
 0x622   : > { %1469 = vrot.lane.b32.xlu0 %v5517_v25, %s7928_s1 }
 0x624   : > { %1858 = vrot.lane.b32.xlu1 %v5469_v8, %s7885_s0 }
 0x626   : > { %1408 = vrot.lane.b32.xlu0 %v5509_v20, %s7879_s23 }
 0x628   : > { %1459 = vrot.lane.b32.xlu1 %v5513_v23, %s7928_s1 }
 0x62a   : > { %1416 = vrot.lane.b32.xlu0 %v5517_v25, %s7879_s23 }
 0x62c   : > { %1467 = vrot.lane.b32.xlu1 %v5521_v26, %s7928_s1  ;;  %s8047_s1 = smov 113  }
 0x62e   : > { %1363 = vrot.lane.b32.xlu0 %v5509_v20, %s7883_s30 }
 0x630   : > { %1866 = vrot.lane.b32.xlu1 %v5477_v9, %s7885_s0 }
 0x632   : > { %1371 = vrot.lane.b32.xlu0 %v5517_v25, %s7883_s30 }
 0x634   : > { %1813 = vrot.lane.b32.xlu1 %v5469_v8, %s7926_s21 }
 0x636   : > { %1314 = vrot.lane.b32.xlu0 %v5509_v20, %s7887_s29 }
 0x638   : > { %1406 = vrot.lane.b32.xlu1 %v5513_v23, %s7879_s23 }
 0x63a   : > { %1322 = vrot.lane.b32.xlu0 %v5517_v25, %s7887_s29 }
 0x63c   : > { %1414 = vrot.lane.b32.xlu1 %v5521_v26, %s7879_s23  ;;  %s8017_s23 = sld [smem:[#allocation72_spill]] }
 0x63e   : > { %1318 = vrot.lane.b32.xlu0 %v5473_v41, %s7887_s29 }
 0x640   : > { %1361 = vrot.lane.b32.xlu1 %v5513_v23, %s7883_s30 }
 0x642   : > { %1864 = vrot.lane.b32.xlu0 %v5509_v20, %s7885_s0  ;;  %s727_s7 = scalar_lea.vmem %s8017_s23, %s5288_s26  ;;  %s8045_s26 = smov 112  }
 0x643   : > { %v2090_v27 = vld [vmem:[%s727_s7] sm:$0x1]  ;;  %s8049_s7 = smov 15   ;;  %s4364_s23 = sshll.u32 %s5189_s3, 11 }
 0x644   : > { %1369 = vrot.lane.b32.xlu1 %v5521_v26, %s7883_s30  ;;  %s7889_s30 = smov 113   ;;  %v4281_v28 = vmul.f32 -1.442695, %v2090_v27 }
 0x646   : > { %1872 = vrot.lane.b32.xlu0 %v5517_v25, %s7885_s0  ;;  %4769 = vpow2.f32 %v4281_v28 }
 0x648   : > { %1312 = vrot.lane.b32.xlu1 %v5513_v23, %s7887_s29 }
 0x64a   : > { %1860 = vrot.lane.b32.xlu0 %v5467_v7, %s7885_s0 }
 0x64c   : > { %1320 = vrot.lane.b32.xlu1 %v5521_v26, %s7887_s29  ;;  %s8046_s29 = smov 16  }
 0x64e   : > { %1868 = vrot.lane.b32.xlu0 %v5473_v41, %s7885_s0 }
 0x650   : > { %1821 = vrot.lane.b32.xlu1 %v5477_v9, %s7926_s21 }
 0x652   : > { %1819 = vrot.lane.b32.xlu0 %v5509_v20, %s7926_s21 }
 0x653   : > { %v4770_v31 = vpop.eup %4769 }
 0x654   : > { %1768 = vrot.lane.b32.xlu1 %v5469_v8, %s7889_s30  ;;  %v2094_v33 = vadd.f32 1.0, %v4770_v31 }
 0x656   : > { %1827 = vrot.lane.b32.xlu0 %v5517_v25, %s7926_s21  ;;  %4771 = vrcp.f32 %v2094_v33 }
 0x658   : > { %1862 = vrot.lane.b32.xlu1 %v5513_v23, %s7885_s0 }
 0x65a   : > { %1815 = vrot.lane.b32.xlu0 %v5467_v7, %s7926_s21 }
 0x65c   : > { %1870 = vrot.lane.b32.xlu1 %v5521_v26, %s7885_s0  ;;  %s8058_s0 = smov 111  }
 0x65e   : > { %1823 = vrot.lane.b32.xlu0 %v5473_v41, %s7926_s21 }
 0x660   : > { %1817 = vrot.lane.b32.xlu1 %v5513_v23, %s7926_s21 }
 0x662   : > { %1774 = vrot.lane.b32.xlu0 %v5509_v20, %s7889_s30 }
 0x663   : > { %v4772_v52 = vpop.eup %4771 }
 0x664   : > { %v5601_v29 = vpop.permute.xlu0 %1506  ;;  %1825 = vrot.lane.b32.xlu1 %v5521_v26, %s7926_s21  ;;  %v2097_v54 = vmul.f32 %v4772_v52, %v2090_v27  ;;  %s8048_s21 = smov 17  }
 0x666   : > { %1782 = vrot.lane.b32.xlu0 %v5517_v25, %s7889_s30  ;;  %v1505_v30 = vpop.permute.xlu1 %1504  ;;  %v5647_v56 = vrot.slane %v2097_v54, %v5640_v36 }
 0x668   : > { %v5607_v32 = vpop.permute.xlu0 %1514  ;;  %1772 = vrot.lane.b32.xlu1 %v5513_v23, %s7889_s30  ;;  %v2118_v61 = vmul.f32 %v5647_v56, %v2104_v57  ;;  %v2117_v6 = vmul.f32 %v5647_v56, %v2103_v63  ;;  %v2119_v14 = vmul.f32 %v5647_v56, %v2105_v37  ;;  %v2115_v15 = vmul.f32 %v5647_v56, %v2101_v40  ;;  %v2100_v37 = vld [vmem:[%s7853_s11 + $0x10] sm:$0xff] }
 0x669   : > { %v1526_v16 = vsel %vm1520_vm2, %v5607_v32, %v5601_v29  ;;  %v2113_v63 = vmul.f32 %v5647_v56, %v2099_v24  ;;  %v1522_v1 = vsel %vm1520_vm2, %v5601_v29, %v5607_v32  ;;  %v2114_v32 = vmul.f32 %v5647_v56, %v2100_v37 }
 0x66a   : > { %1770 = vrot.lane.b32.xlu0 %v5467_v7, %s7889_s30  ;;  %v1513_v35 = vpop.permute.xlu1 %1512  ;;  %v2139_v5 = vsel %vm2120_vm1, %v2118_v61, 0.0  ;;  %v2136_v19 = vsel %vm2120_vm1, %v2117_v6, 0.0  ;;  %v2116_v61 = vmul.f32 %v5647_v56, %v2102_v22  ;;  %v1482_v22 = vsub.s32 3, %v5635_v53 }
 0x66b   : > { %v1525_v10 = vsel %vm1520_vm2, %v1513_v35, %v1505_v30  ;;  %v1521_v27 = vsel %vm1520_vm2, %v1505_v30, %v1513_v35  ;;  %v2142_v30 = vsel %vm2120_vm1, %v2119_v14, 0.0  ;;  %v2130_v35 = vsel %vm2120_vm1, %v2115_v15, 0.0  ;;  %v2098_v15 = vld [vmem:[%s7853_s11] sm:$0xff] }
 0x66c   : > { %v5613_v39 = vpop.permute.xlu0 %1457  ;;  %1780 = vrot.lane.b32.xlu1 %v5521_v26, %s7889_s30  ;;  %v1538_v28 = vmul.f32 %v5679_v38, %v1525_v10  ;;  %v1537_v40 = vmul.f32 %v5694_v17, %v1521_v27  ;;  %v2133_v29 = vsel %vm2120_vm1, %v2116_v61, 0.0  ;;  %v2124_v14 = vsel %vm2120_vm1, %v2113_v63, 0.0 }
 0x66d   : > { %v2127_v24 = vsel %vm2120_vm1, %v2114_v32, 0.0  ;;  %v2112_v27 = vmul.f32 %v5647_v56, %v2098_v15 }
 0x66e   : > { %1778 = vrot.lane.b32.xlu0 %v5473_v41, %s7889_s30  ;;  %v5619_v42 = vpop.permute.xlu1 %1455 }
 0x670   : > { %v5621_v43 = vpop.permute.xlu0 %1465  ;;  %1776 = vrot.lane.b32.xlu1 %v5477_v9, %s7889_s30 }
 0x672   : > { %v5625_v44 = vpop.permute.xlu1 %1463 }
 0x674   : > { %v5627_v45 = vpop.permute.xlu0 %1404 }
 0x676   : > { %v5629_v46 = vpop.permute.xlu1 %1402 }
 0x678   : > { %v5631_v48 = vpop.permute.xlu0 %1412 }
 0x67a   : > { %v5633_v49 = vpop.permute.xlu1 %1410 }
 0x67b   : > { %v1419_v15 = vsel %vm1418_vm5, %v5629_v46, %v5633_v49 }
 0x67c   : > { %v5637_v34 = vpop.permute.xlu0 %1359 }
 0x67e   : > { %v5642_v55 = vpop.permute.xlu1 %1357 }
 0x680   : > { %v5644_v50 = vpop.permute.xlu0 %1367 }
 0x682   : > { %v5649_v51 = vpop.permute.xlu1 %1365 }
 0x684   : > { %v5654_v58 = vpop.permute.xlu0 %1310 }
 0x686   : > { %v5656_v60 = vpop.permute.xlu1 %1308 }
 0x688   : > { %v1511_v2 = vpop.permute.xlu0 %1510 }
 0x68a   : > { %v1509_v4 = vpop.permute.xlu1 %1508 }
 0x68c   : > { %v1519_v11 = vpop.permute.xlu0 %1518 }
 0x68d   : > { %v1524_v12 = vsel %vm1520_vm2, %v1511_v2, %v1519_v11  ;;  %v1528_v13 = vsel %vm1520_vm2, %v1519_v11, %v1511_v2  ;;  %2140 = vadd.xlane.f32.xlu0 %v2139_v5  ;;  %v1540_v2 = vmul.f32 %v5679_v38, %v1526_v16 }
 0x68e   : > { %v1517_v18 = vpop.permute.xlu1 %1516  ;;  %v1543_v47 = vmul.f32 %v5694_v17, %v1524_v12  ;;  %v1544_v52 = vmul.f32 %v5679_v38, %v1528_v13  ;;  %v1539_v12 = vmul.f32 %v5694_v17, %v1522_v1 }
 0x68f   : > { %v1523_v31 = vsel %vm1520_vm2, %v1509_v4, %v1517_v18  ;;  %v1527_v33 = vsel %vm1520_vm2, %v1517_v18, %v1509_v4  ;;  %v1546_v11 = vpack.c.bf16 %v1540_v2, %v1538_v28 }
 0x690   : > { %v1541_v54 = vmul.f32 %v5694_v17, %v1523_v31  ;;  %v1542_v57 = vmul.f32 %v5679_v38, %v1527_v33  ;;  %v1462_v59 = vpop.permute.xlu0 %1461  ;;  %v1545_v16 = vpack.c.bf16 %v1539_v12, %v1537_v40  ;;  %v1502_v31 = vpack.c.bf16 %v5509_v20, %v5513_v23 }
 0x691   : > { %2137 = vadd.xlane.f32.xlu0 %v2136_v19  ;;  %v1503_v19 = vpack.c.bf16 %v5517_v25, %v5521_v26  ;;  %v1472_v25 = vsel %vm1471_vm3, %v5619_v42, %v5625_v44  ;;  %v1501_v33 = vpack.c.bf16 %v5473_v41, %v5477_v9  ;;  %v2121_v20 = vsel %vm2120_vm1, %v2112_v27, 0.0 }
 0x692   : > { %v1547_v4 = vpack.c.bf16 %v1543_v47, %v1541_v54  ;;  %v5723_v5 = vpop.permute.xlu1 %1316  ;;  %v1548_v6 = vpack.c.bf16 %v1544_v52, %v1542_v57  ;;  %v5755_v47 = vrot.slane %v5664_v0, %v1482_v22  ;;  %v1473_v23 = vsel %vm1471_vm3, %v5613_v39, %v5621_v43 }
 0x693   : > { %v5767_v54 = vrot.slane %v5667_v3, %v1482_v22  ;;  %v1500_v9 = vpack.c.bf16 %v5467_v7, %v5469_v8  ;;  %v1476_v57 = vsel %vm1471_vm3, %v5625_v44, %v5619_v42  ;;  %v1477_v42 = vsel %vm1471_vm3, %v5621_v43, %v5613_v39  ;;  %v4681_v39 = vld [vmem:[#allocation7] sm:$0xff]  }
 0x694   : > { %v1470_v10 = vpop.permute.xlu0 %1469  ;;  %2143 = vadd.xlane.f32.xlu1 %v2142_v30  ;;  %1594 = vmatprep.subr.bf16.mxu0 %v1548_v6  ;;  %8021 = vst [vmem:[#allocation24_spill] sm:$0xff] %v5755_v47  ;;  %v1491_v44 = vmul.f32 %v5755_v47, %v1473_v23  ;;  %v1429_v43 = vsub.s32 2, %v5635_v53 }
 0x695   : > { %2131 = vadd.xlane.f32.xlu0 %v2130_v35  ;;  %1595 = vmatpush1.bf16.msra.mxu0 %v1547_v4  ;;  %v1475_v56 = vsel %vm1471_vm3, %v1462_v59, %v1470_v10  ;;  %v1479_v52 = vsel %vm1471_vm3, %v1470_v10, %v1462_v59  ;;  %8022 = vst [vmem:[#allocation25_spill] sm:$0xff] %v5767_v54 }
 0x696   : > { %v5732_v13 = vpop.permute.xlu1 %1858  ;;  %1596 = vmatprep.subr.bf16.mxu0 %v1546_v11  ;;  %v1489_v59 = vmul.f32 %v5755_v47, %v1472_v25  ;;  %v1494_v61 = vmul.f32 %v5767_v54, %v1479_v52  ;;  %v1495_v63 = vmul.f32 %v5755_v47, %v1475_v56  ;;  %v1488_v37 = vmul.f32 %v5767_v54, %v1476_v57 }
 0x697   : > { %v1490_v11 = vmul.f32 %v5767_v54, %v1477_v42  ;;  %v5812_v22 = vrot.slane %v5664_v0, %v1429_v43 }
 0x698   : > { %v5738_v18 = vpop.permute.xlu0 %1408  ;;  %2134 = vadd.xlane.f32.xlu1 %v2133_v29  ;;  %v1497_v10 = vpack.c.bf16 %v1491_v44, %v1489_v59  ;;  %v1424_v59 = vsel %vm1418_vm5, %v5631_v48, %v5627_v45 }
 0x699   : > { %2125 = vadd.xlane.f32.xlu0 %v2124_v14  ;;  %1597 = vmatpush1.bf16.msra.mxu0 %v1545_v16  ;;  %v1496_v29 = vpack.c.bf16 %v1490_v11, %v1488_v37  ;;  %8023 = vst [vmem:[#allocation26_spill] sm:$0xff] %v5812_v22 }
 0x69a   : > { %v1460_v28 = vpop.permute.xlu1 %1459  ;;  %1598 = vmatprep.subr.bf16.mxu0 %v1503_v19  ;;  %v1307_v19 = vld [vmem:[%s7852_s10 + $0x38] sm:$0xff] }
 0x69c   : > { %v1417_v26 = vpop.permute.xlu0 %1416  ;;  %2128 = vadd.xlane.f32.xlu1 %v2127_v24 }
 0x69d   : > { %1599 = vmatpush1.bf16.msra.mxu0 %v1502_v31  ;;  %v1422_v24 = vsel %vm1418_vm5, %v5738_v18, %v1417_v26  ;;  %v1426_v27 = vsel %vm1418_vm5, %v1417_v26, %v5738_v18  ;;  %v5826_v31 = vrot.slane %v5667_v3, %v1429_v43  ;;  %v1423_v18 = vsel %vm1418_vm5, %v5633_v49, %v5629_v46  ;;  %v1305_v46 = vld [vmem:[%s7852_s10 + $0x28] sm:$0xff]  ;;  %v4682_v49 = vld [vmem:[#allocation7 + $0x8] sm:$0xff]  }
 0x69e   : > { %v1468_v41 = vpop.permute.xlu1 %1467  ;;  %1600 = vmatprep.subr.bf16.mxu0 %v1501_v33  ;;  %v1306_v33 = vld [vmem:[%s7852_s10 + $0x30] sm:$0xff]  ;;  %v1436_v26 = vmul.f32 %v5812_v22, %v1419_v15  ;;  %v1442_v23 = vmul.f32 %v5812_v22, %v1422_v24 }
 0x69f   : > { %v1474_v30 = vsel %vm1471_vm3, %v1460_v28, %v1468_v41  ;;  %v1478_v35 = vsel %vm1471_vm3, %v1468_v41, %v1460_v28  ;;  %v1420_v28 = vsel %vm1418_vm5, %v5627_v45, %v5631_v48  ;;  %8024 = vst [vmem:[#allocation27_spill] sm:$0xff] %v5826_v31  ;;  %v1437_v42 = vmul.f32 %v5826_v31, %v1424_v59 }
 0x6a0   : > { %v1492_v1 = vmul.f32 %v5767_v54, %v1478_v35  ;;  %v1493_v7 = vmul.f32 %v5755_v47, %v1474_v30  ;;  %v5784_v8 = vpop.permute.xlu0 %1363  ;;  %2122 = vadd.xlane.f32.xlu1 %v2121_v20  ;;  %v1441_v20 = vmul.f32 %v5826_v31, %v1426_v27  ;;  %v1384_v30 = vsub.s32 1, %v5635_v53 }
 0x6a1   : > { %1601 = vmatpush1.bf16.msra.mxu0 %v1500_v9  ;;  %v1438_v35 = vmul.f32 %v5812_v22, %v1420_v28  ;;  %v1374_v45 = vsel %vm1373_vm6, %v5642_v55, %v5649_v51  ;;  %v5931_v59 = vrot.slane %v5664_v0, %v5640_v36 }
 0x6a2   : > { %v1498_v2 = vpack.c.bf16 %v1494_v61, %v1492_v1  ;;  %v5791_v4 = vpop.permute.xlu1 %1866  ;;  %v1499_v6 = vpack.c.bf16 %v1495_v63, %v1493_v7  ;;  %v1435_v61 = vmul.f32 %v5826_v31, %v1423_v18  ;;  %v5887_v43 = vrot.slane %v5667_v3, %v1384_v30 }
 0x6a3   : > { %v1444_v44 = vpack.c.bf16 %v1438_v35, %v1436_v26  ;;  %8028 = vst [vmem:[#allocation31_spill] sm:$0xff] %v5931_v59 }
 0x6a4   : > { %v1372_v40 = vpop.permute.xlu0 %1371  ;;  %1602 = vmatprep.subr.bf16.mxu0 %v1499_v6  ;;  %v5869_v6 = vrot.slane %v5664_v0, %v1384_v30  ;;  %v1443_v11 = vpack.c.bf16 %v1437_v42, %v1435_v61  ;;  %8026 = vst [vmem:[#allocation29_spill] sm:$0xff] %v5887_v43  ;;  %v1327_v30 = vsel %vm1326_vm7, %v5656_v60, %v5723_v5 }
 0x6a5   : > { %1603 = vmatpush1.bf16.msra.mxu0 %v1498_v2  ;;  %v1304_v2 = vld [vmem:[%s7852_s10 + $0x20] sm:$0xff]  ;;  %v1377_v37 = vsel %vm1373_vm6, %v5784_v8, %v1372_v40 }
 0x6a6   : > { %v5795_v12 = vpop.permute.xlu1 %1813  ;;  %1604 = vmatprep.subr.bf16.mxu0 %v1497_v10  ;;  %8025 = vst [vmem:[#allocation28_spill] sm:$0xff] %v5869_v6  ;;  %v1381_v10 = vsel %vm1373_vm6, %v1372_v40, %v5784_v8  ;;  %v1378_v8 = vsel %vm1373_vm6, %v5649_v51, %v5642_v55  ;;  %v1391_v40 = vmul.f32 %v5869_v6, %v1374_v45  ;;  %v1303_v55 = vld [vmem:[%s7852_s10 + $0x18] sm:$0xff]  ;;  %v4683_v51 = vld [vmem:[#allocation7 + $0x10] sm:$0xff]  }
 0x6a8   : > { %v5797_v32 = vpop.permute.xlu0 %1314 }
 0x6a9   : > { %1605 = vmatpush1.bf16.msra.mxu0 %v1496_v29  ;;  %v1375_v29 = vsel %vm1373_vm6, %v5637_v34, %v5644_v50 }
 0x6aa   : > { %v1407_v14 = vpop.permute.xlu1 %1406 }
 0x6ac   : > { %v5805_v16 = vpop.permute.xlu0 %1322  ;;  %4261 = vmatmul.mubr.msk.bf16.vlgmr.msra.gmra.mxu0 %vm1577_vm4, %v4681_v39  ;;  %v1379_v39 = vsel %vm1373_vm6, %v5644_v50, %v5637_v34  ;;  %v1396_v34 = vmul.f32 %v5887_v43, %v1381_v10  ;;  %v1397_v50 = vmul.f32 %v5869_v6, %v1377_v37  ;;  %v1301_v10 = vld [vmem:[%s7852_s10 + $0x8] sm:$0xff] }
 0x6ad   : > { %1632 = vmatprep.mubr.bf16.mxu0 %v5047_v21 }
 0x6ae   : > { %v1415_v25 = vpop.permute.xlu1 %1414 }
 0x6af   : > { %v1421_v56 = vsel %vm1418_vm5, %v1407_v14, %v1415_v25  ;;  %v1425_v52 = vsel %vm1418_vm5, %v1415_v25, %v1407_v14  ;;  %2071 = vperm.xlu0 %4679, %v1307_v19   ;;  %v1393_v25 = vmul.f32 %v5869_v6, %v1375_v29  ;;  %v1331_v29 = vsel %vm1326_vm7, %v5723_v5, %v5656_v60  ;;  %v730_v5 = vld [vmem:[#allocation2 + $0x8] sm:$0x11] }
 0x6b0   : > { %v1439_v41 = vmul.f32 %v5826_v31, %v1425_v52  ;;  %v1440_v9 = vmul.f32 %v5812_v22, %v1421_v56  ;;  %v5844_v57 = vpop.permute.xlu0 %1318  ;;  %v1392_v52 = vmul.f32 %v5887_v43, %v1379_v39 }
 0x6b1   : > { %2066 = vperm.xlu1 %4680, %v1306_v33   ;;  %v1390_v33 = vmul.f32 %v5887_v43, %v1378_v8  ;;  %v1332_v42 = vsel %vm1326_vm7, %v5844_v57, %v5654_v58 }
 0x6b2   : > { %v1445_v63 = vpack.c.bf16 %v1441_v20, %v1439_v41  ;;  %v1362_v1 = vpop.permute.xlu1 %1361  ;;  %v1446_v7 = vpack.c.bf16 %v1442_v23, %v1440_v9  ;;  %v1330_v20 = vsel %vm1326_vm7, %v5797_v32, %v5805_v16  ;;  %v1334_v23 = vsel %vm1326_vm7, %v5805_v16, %v5797_v32 }
 0x6b3   : > { %2061 = vperm.xlu0 %4679, %v1305_v46   ;;  %v1399_v9 = vpack.c.bf16 %v1393_v25, %v1391_v40  ;;  %v1302_v46 = vld [vmem:[%s7852_s10 + $0x10] sm:$0xff]  ;;  %v1328_v32 = vsel %vm1326_vm7, %v5654_v58, %v5844_v57  ;;  %v1398_v16 = vpack.c.bf16 %v1392_v52, %v1390_v33  ;;  %v1346_v58 = vmul.f32 %v5931_v59, %v1327_v30 }
 0x6b4   : > { %v5862_v48 = vpop.permute.xlu0 %1864  ;;  %4262 = vmatmul.mubr.msk.bf16.gmra.mxu0 %vm1577_vm4, %v4682_v49  ;;  %1699 = vmatprep.subr.bf16.mxu0 %v1446_v7  ;;  %v5927_v49 = vrot.slane %v5667_v3, %v5640_v36  ;;  %v1348_v45 = vmul.f32 %v5931_v59, %v1328_v32 }
 0x6b5   : > { %1700 = vmatpush1.bf16.msra.mxu0 %v1445_v63  ;;  %1642 = vmatprep.mubr.bf16.mxu0 %v5047_v21  ;;  %v1352_v63 = vmul.f32 %v5931_v59, %v1330_v20 }
 0x6b6   : > { %v1370_v14 = vpop.permute.xlu1 %1369  ;;  %1701 = vmatprep.subr.bf16.mxu0 %v1444_v44  ;;  %8027 = vst [vmem:[#allocation30_spill] sm:$0xff] %v5927_v49  ;;  %v1351_v61 = vmul.f32 %v5927_v49, %v1334_v23  ;;  %v1347_v8 = vmul.f32 %v5927_v49, %v1332_v42  ;;  %v1345_v60 = vmul.f32 %v5927_v49, %v1331_v29 }
 0x6b7   : > { %v1376_v15 = vsel %vm1373_vm6, %v1362_v1, %v1370_v14  ;;  %v1380_v19 = vsel %vm1373_vm6, %v1370_v14, %v1362_v1  ;;  %2056 = vperm.xlu0 %4679, %v1304_v2   ;;  %v1875_v23 = vsel %vm1874_vm8, %v5732_v13, %v5791_v4 }
 0x6b8   : > { %v1394_v24 = vmul.f32 %v5887_v43, %v1380_v19  ;;  %v1395_v27 = vmul.f32 %v5869_v6, %v1376_v15  ;;  %v5902_v28 = vpop.permute.xlu0 %1872  ;;  %v1354_v15 = vpack.c.bf16 %v1348_v45, %v1346_v58  ;;  %v1300_v19 = vld [vmem:[%s7852_s10] sm:$0xff] }
 0x6b9   : > { %1702 = vmatpush1.bf16.msra.mxu0 %v1443_v11  ;;  %v4684_v11 = vld [vmem:[#allocation7 + $0x18] sm:$0xff]   ;;  %v1878_v33 = vsel %vm1874_vm8, %v5862_v48, %v5902_v28 }
 0x6ba   : > { %v1400_v18 = vpack.c.bf16 %v1396_v34, %v1394_v24  ;;  %v1313_v26 = vpop.permute.xlu1 %1312  ;;  %v1401_v56 = vpack.c.bf16 %v1397_v50, %v1395_v27  ;;  %v1353_v50 = vpack.c.bf16 %v1347_v8, %v1345_v60  ;;  %v4685_v27 = vld [vmem:[#allocation5] sm:$0xff]  }
 0x6bb   : > { %2051 = vperm.xlu0 %4679, %v1303_v55   ;;  %v1883_v55 = vunpack.c.l.bf16 %v730_v5 }
 0x6bc   : > { %v5919_v41 = vpop.permute.xlu0 %1860  ;;  %4263 = vmatmul.mubr.msk.bf16.gmra.mxu0 %vm1577_vm4, %v4683_v51  ;;  %1703 = vmatprep.subr.bf16.mxu0 %v1401_v56  ;;  %v1884_v51 = vunpack.c.h.bf16 %v730_v5  ;;  %v1882_v56 = vsel %vm1874_vm8, %v5902_v28, %v5862_v48 }
 0x6bd   : > { %1704 = vmatpush1.bf16.msra.mxu0 %v1400_v18  ;;  %1652 = vmatprep.mubr.bf16.mxu0 %v5047_v21 }
 0x6be   : > { %v1321_v35 = vpop.permute.xlu1 %1320  ;;  %1705 = vmatprep.subr.bf16.mxu0 %v1399_v9  ;;  %v5992_v20 = vrot.slane %v1884_v51, %v5640_v36  ;;  %v1879_v9 = vsel %vm1874_vm8, %v5791_v4, %v5732_v13 }
 0x6bf   : > { %v1329_v1 = vsel %vm1326_vm7, %v1313_v26, %v1321_v35  ;;  %v1333_v7 = vsel %vm1326_vm7, %v1321_v35, %v1313_v26  ;;  %2046 = vperm.xlu0 %4679, %v1302_v46   ;;  %v5981_v26 = vrot.slane %v1883_v55, %v5640_v36 }
 0x6c0   : > { %v1349_v44 = vmul.f32 %v5927_v49, %v1333_v7  ;;  %v1350_v2 = vmul.f32 %v5931_v59, %v1329_v1  ;;  %v1869_v37 = vpop.permute.xlu0 %1868  ;;  %8030 = vst [vmem:[#allocation33_spill] sm:$0xff] %v5992_v20 }
 0x6c1   : > { %1706 = vmatpush1.bf16.msra.mxu0 %v1398_v16  ;;  %8029 = vst [vmem:[#allocation32_spill] sm:$0xff] %v5981_v26  ;;  %v1880_v52 = vsel %vm1874_vm8, %v1869_v37, %v5919_v41  ;;  %v1899_v28 = vmul.f32 %v5981_v26, %v1878_v33  ;;  %v1876_v46 = vsel %vm1874_vm8, %v5919_v41, %v1869_v37 }
 0x6c2   : > { %v1355_v57 = vpack.c.bf16 %v1351_v61, %v1349_v44  ;;  %v5963_v39 = vpop.permute.xlu1 %1821  ;;  %v1356_v14 = vpack.c.bf16 %v1352_v63, %v1350_v2  ;;  %v1900_v16 = vmul.f32 %v5992_v20, %v1882_v56  ;;  %v1896_v30 = vmul.f32 %v5992_v20, %v1880_v52  ;;  %v4686_v61 = vld [vmem:[#allocation5 + $0x8] sm:$0xff]  }
 0x6c3   : > { %2041 = vperm.xlu0 %4679, %v1301_v10   ;;  %v1840_v63 = vsub.s32 7, %v5635_v53  ;;  %v1894_v41 = vmul.f32 %v5992_v20, %v1879_v9  ;;  %v1895_v1 = vmul.f32 %v5981_v26, %v1876_v46  ;;  %v1893_v44 = vmul.f32 %v5981_v26, %v1875_v23 }
 0x6c4   : > { %v1820_v40 = vpop.permute.xlu0 %1819  ;;  %4264 = vmatmul.mubr.msk.bf16.gmra.mxu0 %vm1577_vm4, %v4684_v11  ;;  %1707 = vmatprep.subr.bf16.mxu0 %v1356_v14  ;;  %v1834_v8 = vsel %vm1829_vm9, %v5963_v39, %v5795_v12  ;;  %v1830_v33 = vsel %vm1829_vm9, %v5795_v12, %v5963_v39 }
 0x6c5   : > { %1708 = vmatpush1.bf16.msra.mxu0 %v1355_v57  ;;  %1727 = vmatprep.mubr.bf16.mxu0 %v5047_v21  ;;  %v1902_v11 = vpack.c.bf16 %v1896_v30, %v1894_v41  ;;  %v6025_v29 = vrot.slane %v5667_v3, %v1840_v63  ;;  %v6028_v58 = vrot.slane %v5664_v0, %v1840_v63  ;;  %v4688_v41 = vld [vmem:[#allocation5 + $0x18] sm:$0xff]  }
 0x6c6   : > { %v5972_v34 = vpop.permute.xlu1 %1768  ;;  %1709 = vmatprep.subr.bf16.mxu0 %v1354_v15  ;;  %v1901_v14 = vpack.c.bf16 %v1895_v1, %v1893_v44  ;;  %v1795_v15 = vsub.s32 6, %v5635_v53 }
 0x6c7   : > { %2036 = vperm.xlu0 %4679, %v1300_v19   ;;  %8031 = vst [vmem:[#allocation34_spill] sm:$0xff] %v6025_v29  ;;  %8032 = vst [vmem:[#allocation35_spill] sm:$0xff] %v6028_v58  ;;  %v1847_v56 = vmul.f32 %v6028_v58, %v1834_v8  ;;  %v1846_v12 = vmul.f32 %v6025_v29, %v1830_v33 }
 0x6c8   : > { %v1828_v24 = vpop.permute.xlu0 %1827 }
 0x6c9   : > { %1710 = vmatpush1.bf16.msra.mxu0 %v1353_v50  ;;  %v1833_v2 = vsel %vm1829_vm9, %v1820_v40, %v1828_v24  ;;  %v1837_v37 = vsel %vm1829_vm9, %v1828_v24, %v1820_v40 }
 0x6ca   : > { %v1863_v25 = vpop.permute.xlu1 %1862  ;;  %v1852_v19 = vmul.f32 %v6025_v29, %v1833_v2  ;;  %v1853_v60 = vmul.f32 %v6028_v58, %v1837_v37 }
 0x6cc   : > { %v1816_v18 = vpop.permute.xlu0 %1815  ;;  %4269 = vmatmul.mubr.msk.bf16.vlgmr.msra.gmra.mxu0 %vm1577_vm4, %v4685_v27 }
 0x6cd   : > { %1737 = vmatprep.mubr.bf16.mxu0 %v5047_v21 }
 0x6ce   : > { %v1871_v48 = vpop.permute.xlu1 %1870 }
 0x6cf   : > { %v1877_v36 = vsel %vm1874_vm8, %v1863_v25, %v1871_v48  ;;  %v1881_v32 = vsel %vm1874_vm8, %v1871_v48, %v1863_v25  ;;  %v4687_v25 = vld [vmem:[#allocation5 + $0x10] sm:$0xff]   ;;  %v6057_v48 = vrot.slane %v5667_v3, %v1795_v15 }
 0x6d0   : > { %v1897_v35 = vmul.f32 %v5981_v26, %v1877_v36  ;;  %v1898_v13 = vmul.f32 %v5992_v20, %v1881_v32  ;;  %v1824_v4 = vpop.permute.xlu0 %1823 }
 0x6d1   : > { %v1835_v57 = vsel %vm1829_vm9, %v1824_v4, %v1816_v18  ;;  %v1831_v24 = vsel %vm1829_vm9, %v1816_v18, %v1824_v4  ;;  %8033 = vst [vmem:[#allocation36_spill] sm:$0xff] %v6057_v48 }
 0x6d2   : > { %v1903_v7 = vpack.c.bf16 %v1899_v28, %v1897_v35  ;;  %v1818_v42 = vpop.permute.xlu1 %1817  ;;  %v1904_v45 = vpack.c.bf16 %v1900_v16, %v1898_v13  ;;  %v1849_v27 = vmul.f32 %v6028_v58, %v1835_v57  ;;  %v1848_v9 = vmul.f32 %v6025_v29, %v1831_v24 }
 0x6d3   : > { %v6060_v28 = vrot.slane %v5664_v0, %v1795_v15  ;;  %v4689_v15 = vld [vmem:[#allocation8] sm:$0xff]  }
 0x6d4   : > { %v1775_v10 = vpop.permute.xlu0 %1774  ;;  %4270 = vmatmul.mubr.msk.bf16.gmra.mxu0 %vm1577_vm4, %v4686_v61  ;;  %1949 = vmatprep.subr.bf16.mxu0 %v1904_v45  ;;  %v1855_v36 = vpack.c.bf16 %v1849_v27, %v1847_v56  ;;  %v1854_v0 = vpack.c.bf16 %v1848_v9, %v1846_v12  ;;  %v2149_v56 = vld [vmem:[%s7854_s12 + $0x20] sm:$0xff]  ;;  %v2148_v9 = vld [vmem:[%s7854_s12 + $0x18] sm:$0xff] }
 0x6d5   : > { %1950 = vmatpush1.bf16.msra.mxu0 %v1903_v7  ;;  %1747 = vmatprep.mubr.bf16.mxu0 %v5047_v21  ;;  %8034 = vst [vmem:[#allocation37_spill] sm:$0xff] %v6060_v28 }
 0x6d6   : > { %v1826_v40 = vpop.permute.xlu1 %1825  ;;  %1951 = vmatprep.subr.bf16.mxu0 %v1902_v11 }
 0x6d7   : > { %v1832_v5 = vsel %vm1829_vm9, %v1818_v42, %v1826_v40  ;;  %v1836_v50 = vsel %vm1829_vm9, %v1826_v40, %v1818_v42 }
 0x6d8   : > { %v1850_v55 = vmul.f32 %v6025_v29, %v1832_v5  ;;  %v1851_v51 = vmul.f32 %v6028_v58, %v1836_v50  ;;  %v1783_v53 = vpop.permute.xlu0 %1782  ;;  %v2152_v5 = vld [vmem:[%s7854_s12 + $0x38] sm:$0xff]  ;;  %v2151_v50 = vld [vmem:[%s7854_s12 + $0x30] sm:$0xff] }
 0x6d9   : > { %1952 = vmatpush1.bf16.msra.mxu0 %v1901_v14  ;;  %v1788_v39 = vsel %vm1784_vm10, %v1775_v10, %v1783_v53  ;;  %v1792_v32 = vsel %vm1784_vm10, %v1783_v53, %v1775_v10 }
 0x6da   : > { %v1856_v52 = vpack.c.bf16 %v1852_v19, %v1850_v55  ;;  %v1773_v18 = vpop.permute.xlu1 %1772  ;;  %v1857_v23 = vpack.c.bf16 %v1853_v60, %v1851_v51  ;;  %v1807_v35 = vmul.f32 %v6057_v48, %v1788_v39  ;;  %v1808_v13 = vmul.f32 %v6060_v28, %v1792_v32  ;;  %v4691_v19 = vld [vmem:[#allocation8 + $0x10] sm:$0xff]   ;;  %v4692_v60 = vld [vmem:[#allocation8 + $0x18] sm:$0xff]   ;;  %v2147_v32 = vld [vmem:[%s7854_s12 + $0x10] sm:$0xff] }
 0x6dc   : > { %v1771_v46 = vpop.permute.xlu0 %1770  ;;  %4271 = vmatmul.mubr.msk.bf16.gmra.mxu0 %vm1577_vm4, %v4687_v25  ;;  %1953 = vmatprep.subr.bf16.mxu0 %v1857_v23 }
 0x6dd   : > { %1954 = vmatpush1.bf16.msra.mxu0 %v1856_v52  ;;  %1757 = vmatprep.mubr.bf16.mxu0 %v5047_v21 }
 0x6de   : > { %v1781_v3 = vpop.permute.xlu1 %1780  ;;  %1955 = vmatprep.subr.bf16.mxu0 %v1855_v36 }
 0x6df   : > { %v1787_v16 = vsel %vm1784_vm10, %v1773_v18, %v1781_v3  ;;  %v1791_v30 = vsel %vm1784_vm10, %v1781_v3, %v1773_v18  ;;  %v2145_v18 = vld [vmem:[%s7854_s12] sm:$0xff] }
 0x6e0   : > { %v1805_v4 = vmul.f32 %v6057_v48, %v1787_v16  ;;  %v1806_v61 = vmul.f32 %v6060_v28, %v1791_v30  ;;  %v1779_v63 = vpop.permute.xlu0 %1778 }
 0x6e1   : > { %v1786_v1 = vsel %vm1784_vm10, %v1771_v46, %v1779_v63  ;;  %v1790_v7 = vsel %vm1784_vm10, %v1779_v63, %v1771_v46  ;;  %1956 = vmatpush1.bf16.msra.mxu0 %v1854_v0  ;;  %v2146_v0 = vld [vmem:[%s7854_s12 + $0x8] sm:$0xff] }
 0x6e2   : > { %v1811_v42 = vpack.c.bf16 %v1807_v35, %v1805_v4  ;;  %v1777_v45 = vpop.permute.xlu1 %1776  ;;  %v1812_v44 = vpack.c.bf16 %v1808_v13, %v1806_v61  ;;  %v1803_v2 = vmul.f32 %v6057_v48, %v1786_v1  ;;  %v1804_v11 = vmul.f32 %v6060_v28, %v1790_v7 }
 0x6e3   : > { %v1785_v37 = vsel %vm1784_vm10, %v5972_v34, %v1777_v45  ;;  %v1789_v10 = vsel %vm1784_vm10, %v1777_v45, %v5972_v34  ;;  %v4690_v34 = vld [vmem:[#allocation8 + $0x8] sm:$0xff]  }
 0x6e4   : > { %v1801_v57 = vmul.f32 %v6057_v48, %v1785_v37  ;;  %v1802_v14 = vmul.f32 %v6060_v28, %v1789_v10  ;;  %4272 = vmatmul.mubr.msk.bf16.gmra.mxu0 %vm1577_vm4, %v4688_v41  ;;  %1957 = vmatprep.subr.bf16.mxu0 %v1812_v44 }
 0x6e5   : > { %1958 = vmatpush1.bf16.msra.mxu0 %v1811_v42  ;;  %1977 = vmatprep.mubr.bf16.mxu0 %v5047_v21 }
 0x6e6   : > { %v1809_v8 = vpack.c.bf16 %v1803_v2, %v1801_v57  ;;  %v1810_v40 = vpack.c.bf16 %v1804_v11, %v1802_v14 }
 0x6e8   : > { %1959 = vmatprep.subr.bf16.mxu0 %v1810_v40 }
 0x6e9   : > { %1960 = vmatpush1.bf16.msra.mxu0 %v1809_v8 }
 0x6ec   : > { %4277 = vmatmul.mubr.msk.bf16.vlgmr.msra.gmra.mxu0 %vm1577_vm4, %v4689_v15 }
 0x6ed   : > { %1987 = vmatprep.mubr.bf16.mxu0 %v5047_v21 }
 0x6f4   : > { %4278 = vmatmul.mubr.msk.bf16.gmra.mxu0 %vm1577_vm4, %v4690_v34 }
 0x6f5   : > { %1997 = vmatprep.mubr.bf16.mxu0 %v5047_v21 }
 0x6fc   : > { %4279 = vmatmul.mubr.msk.bf16.gmra.mxu0 %vm1577_vm4, %v4691_v19 }
 0x6fd   : > { %2007 = vmatprep.mubr.bf16.mxu0 %v5047_v21  ;;  %v2150_v21 = vld [vmem:[%s7854_s12 + $0x28] sm:$0xff] }
 0x704   : > { %4280 = vmatmul.mubr.msk.bf16.gmra.mxu0 %vm1577_vm4, %v4692_v60 }
 0x716   : > { %v2141_v24 = vpop.xlane.xlu0 %2140 }
 0x717   : > { %v2159_v51 = vadd.f32 %v2151_v50, %v2141_v24 }
 0x71a   : > { %v2138_v25 = vpop.xlane.xlu0 %2137 }
 0x71b   : > { %v2158_v33 = vadd.f32 %v2150_v21, %v2138_v25 }
 0x71d   : > { %v2144_v27 = vpop.xlane.xlu1 %2143 }
 0x71e   : > { %v2160_v55 = vadd.f32 %v2152_v5, %v2144_v27  ;;  %v2132_v12 = vpop.xlane.xlu0 %2131 }
 0x71f   : > { %v2156_v39 = vadd.f32 %v2148_v9, %v2132_v12 }
 0x720   : > { %2198 = vperm.xlu1 %4680, %v2160_v55  }
 0x721   : > { %v2135_v53 = vpop.xlane.xlu1 %2134 }
 0x722   : > { %v2157_v23 = vadd.f32 %v2149_v56, %v2135_v53  ;;  %v2126_v16 = vpop.xlane.xlu0 %2125 }
 0x723   : > { %v2154_v30 = vadd.f32 %v2146_v0, %v2126_v16 }
 0x724   : > { %2193 = vperm.xlu1 %4680, %v2159_v51  }
 0x725   : > { %v2129_v52 = vpop.xlane.xlu1 %2128 }
 0x726   : > { %v2155_v3 = vadd.f32 %v2147_v32, %v2129_v52 }
 0x728   : > { %2188 = vperm.xlu1 %4680, %v2158_v33  }
 0x729   : > { %v2123_v46 = vpop.xlane.xlu1 %2122 }
 0x72a   : > { %v2153_v36 = vadd.f32 %v2145_v18, %v2123_v46  ;;  %v2072_v46 = vpop.permute.xlu0 %2071 }
 0x72c   : > { %2183 = vperm.xlu1 %4680, %v2157_v23   ;;  %2163 = vperm.xlu0 %4679, %v2153_v36  }
 0x72d   : > { %v2067_v18 = vpop.permute.xlu1 %2066 }
 0x730   : > { %2178 = vperm.xlu1 %4680, %v2156_v39  }
 0x734   : > { %2173 = vperm.xlu1 %4680, %v2155_v3   ;;  %v2062_v3 = vpop.permute.xlu0 %2061 }
 0x738   : > { %2168 = vperm.xlu1 %4680, %v2154_v30  }
 0x76c   : > { %v1624_v35 = vpop.f32.mrf.mxu0 }
 0x76e   : > { %v1626_v13 = vpop.f32.mrf.mxu0 }
 0x770   : > { %v1628_v4 = vpop.f32.mrf.mxu0 }
 0x772   : > { %v1630_v61 = vpop.f32.mrf.mxu0 }
 0x774   : > { %v6124_v63 = vpop.f32.mrf.mxu0 }
 0x776   : > { %v6126_v41 = vpop.f32.mrf.mxu0 }
 0x778   : > { %v6128_v1 = vpop.f32.mrf.mxu0 }
 0x77a   : > { %v1640_v7 = vpop.f32.mrf.mxu0 }
 0x77c   : > { %v6130_v42 = vpop.f32.mrf.mxu0 }
 0x77e   : > { %v1646_v45 = vpop.f32.mrf.mxu0 }
 0x780   : > { %v1648_v44 = vpop.f32.mrf.mxu0 }
 0x782   : > { %v1650_v2 = vpop.f32.mrf.mxu0 }
 0x784   : > { %v1654_v37 = vpop.f32.mrf.mxu0 }
 0x786   : > { %v1656_v10 = vpop.f32.mrf.mxu0 }
 0x788   : > { %v1658_v11 = vpop.f32.mrf.mxu0 }
 0x78a   : > { %v1660_v57 = vpop.f32.mrf.mxu0 }
 0x78c   : > { %v1729_v14 = vpop.f32.mrf.mxu0 }
 0x78d   : > { %v6132_v8 = vadd.f32 %v1729_v14, %v1624_v35 }
 0x78e   : > { %v1731_v40 = vpop.f32.mrf.mxu0 }
 0x78f   : > { %8035 = vst [vmem:[#allocation38_spill] sm:$0xff] %v6132_v8  ;;  %v6134_v15 = vadd.f32 %v1731_v40, %v1626_v13  ;;  %v2057_v13 = vpop.permute.xlu0 %2056 }
 0x790   : > { %v1733_v34 = vpop.f32.mrf.mxu0 }
 0x791   : > { %v6136_v19 = vadd.f32 %v1733_v34, %v1628_v4 }
 0x792   : > { %v1735_v60 = vpop.f32.mrf.mxu0 }
 0x793   : > { %v2052_v20 = vpop.permute.xlu0 %2051  ;;  %v1736_v59 = vadd.f32 %v1735_v60, %v1630_v61 }
 0x794   : > { %v6138_v5 = vpop.f32.mrf.mxu0 }
 0x796   : > { %v1741_v50 = vpop.f32.mrf.mxu0 }
 0x797   : > { %v2047_v6 = vpop.permute.xlu0 %2046 }
 0x798   : > { %v1743_v24 = vpop.f32.mrf.mxu0 }
 0x79a   : > { %v1745_v27 = vpop.f32.mrf.mxu0 }
 0x79b   : > { %v6144_v36 = vpop.permute.xlu1 %2198  ;;  %v1746_v49 = vadd.f32 %v1745_v27, %v1640_v7 }
 0x79c   : > { %v1749_v55 = vpop.f32.mrf.mxu0 }
 0x79e   : > { %v1751_v51 = vpop.f32.mrf.mxu0 }
 0x79f   : > { %v2194_v0 = vpop.permute.xlu1 %2193  ;;  %v1752_v43 = vadd.f32 %v1751_v51, %v1646_v45 }
 0x7a0   : > { %v1753_v21 = vpop.f32.mrf.mxu0 }
 0x7a1   : > { %v1754_v29 = vadd.f32 %v1753_v21, %v1648_v44 }
 0x7a2   : > { %v1755_v53 = vpop.f32.mrf.mxu0 }
 0x7a3   : > { %v2189_v4 = vpop.permute.xlu1 %2188  ;;  %v1756_v31 = vadd.f32 %v1755_v53, %v1650_v2 }
 0x7a4   : > { %v1759_v25 = vpop.f32.mrf.mxu0 }
 0x7a5   : > { %v1760_v58 = vadd.f32 %v1759_v25, %v1654_v37 }
 0x7a6   : > { %v1761_v33 = vpop.f32.mrf.mxu0 }
 0x7a7   : > { %v6146_v26 = vpop.permute.xlu1 %2183  ;;  %v1762_v17 = vadd.f32 %v1761_v33, %v1656_v10 }
 0x7a8   : > { %v1763_v56 = vpop.f32.mrf.mxu0  ;;  %8038 = vst [vmem:[#allocation41_spill] sm:$0xff] %v6146_v26  ;;  %v1750_v26 = vadd.f32 %v1749_v55, %v6130_v42 }
 0x7a9   : > { %v1764_v62 = vadd.f32 %v1763_v56, %v1658_v11  ;;  %v2042_v11 = vpop.permute.xlu0 %2041 }
 0x7aa   : > { %v1765_v52 = vpop.f32.mrf.mxu0 }
 0x7ab   : > { %v1766_v2 = vadd.f32 %v1765_v52, %v1660_v57  ;;  %v2179_v37 = vpop.permute.xlu1 %2178  ;;  %v8041_v52 = vld [vmem:[#allocation38_spill] sm:$0xff] }
 0x7ac   : > { %v6140_v23 = vpop.f32.mrf.mxu0 }
 0x7ad   : > { %8036 = vst [vmem:[#allocation39_spill] sm:$0xff] %v6140_v23 }
 0x7ae   : > { %v6142_v9 = vpop.f32.mrf.mxu0 }
 0x7af   : > { %8037 = vst [vmem:[#allocation40_spill] sm:$0xff] %v6142_v9  ;;  %v1744_v9 = vadd.f32 %v1743_v24, %v6128_v1 }
 0x7b0   : > { %v1983_v12 = vpop.f32.mrf.mxu0 }
 0x7b2   : > { %v1985_v39 = vpop.f32.mrf.mxu0 }
 0x7b3   : > { %v2021_v42 = vadd.f32 %v1985_v39, %v1736_v59 }
 0x7b4   : > { %v1989_v32 = vpop.f32.mrf.mxu0 }
 0x7b5   : > { %v2077_v51 = vadd.f32 %v2042_v11, %v2021_v42 }
 0x7b6   : > { %v1991_v16 = vpop.f32.mrf.mxu0 }
 0x7b8   : > { %v1993_v30 = vpop.f32.mrf.mxu0 }
 0x7ba   : > { %v1995_v35 = vpop.f32.mrf.mxu0 }
 0x7bb   : > { %v2025_v44 = vadd.f32 %v1995_v35, %v1746_v49  ;;  %v1740_v49 = vadd.f32 %v6138_v5, %v6124_v63  ;;  %v8039_v5 = vld [vmem:[#allocation40_spill] sm:$0xff] }
 0x7bc   : > { %v1999_v14 = vpop.f32.mrf.mxu0  ;;  %v2019_v55 = vadd.f32 %v8039_v5, %v6134_v15 }
 0x7bd   : > { %v2026_v61 = vadd.f32 %v1999_v14, %v1750_v26  ;;  %v2022_v60 = vadd.f32 %v1989_v32, %v1740_v49 }
 0x7be   : > { %v2001_v40 = vpop.f32.mrf.mxu0 }
 0x7bf   : > { %v2027_v10 = vadd.f32 %v2001_v40, %v1752_v43  ;;  %v2082_v24 = vadd.f32 %v2057_v13, %v2026_v61 }
 0x7c0   : > { %v2003_v34 = vpop.f32.mrf.mxu0 }
 0x7c1   : > { %v2028_v28 = vadd.f32 %v2003_v34, %v1754_v29  ;;  %v1742_v29 = vadd.f32 %v1741_v50, %v6126_v41 }
 0x7c2   : > { %v2005_v22 = vpop.f32.mrf.mxu0 }
 0x7c3   : > { %v2029_v47 = vadd.f32 %v2005_v22, %v1756_v31  ;;  %v2084_v7 = vadd.f32 %v2062_v3, %v2028_v28  ;;  %v2023_v43 = vadd.f32 %v1991_v16, %v1742_v29  ;;  %v2174_v28 = vpop.permute.xlu1 %2173 }
 0x7c4   : > { %v2009_v38 = vpop.f32.mrf.mxu0 }
 0x7c5   : > { %v2030_v54 = vadd.f32 %v2009_v38, %v1760_v58  ;;  %v2085_v22 = vadd.f32 %v2062_v3, %v2029_v47  ;;  %v2024_v58 = vadd.f32 %v1993_v30, %v1744_v9  ;;  %v2081_v47 = vadd.f32 %v2052_v20, %v2025_v44  ;;  %v2233_v44 = vld [vmem:[%s7857_s15] sm:$0xff] }
 0x7c6   : > { %v2011_v48 = vpop.f32.mrf.mxu0  ;;  %v6162_v27 = vadd.f32 %v2189_v4, %v2084_v7  ;;  %v2079_v53 = vadd.f32 %v2047_v6, %v2023_v43  ;;  %4517 = vmatprep.mubr.msk.f32.mxu1 %vm2120_vm1, %v2233_v44  ;;  %v6217_v7 = vld [vmem:[%s7857_s15 + $0x8] sm:$0xff] }
 0x7c7   : > { %v2086_v23 = vadd.f32 %v2067_v18, %v2030_v54  ;;  %v2031_v8 = vadd.f32 %v2011_v48, %v1762_v17  ;;  %v6157_v57 = vadd.f32 %v2189_v4, %v2085_v22  ;;  %v2080_v50 = vadd.f32 %v2052_v20, %v2024_v58  ;;  %v2169_v32 = vpop.permute.xlu1 %2168 }
 0x7c8   : > { %v2013_v21 = vpop.f32.mrf.mxu0  ;;  %v6172_v25 = vadd.f32 %v2179_v37, %v2081_v47  ;;  %v6188_v3 = vadd.f32 %v2169_v32, %v2077_v51 }
 0x7c9   : > { %v2087_v38 = vadd.f32 %v2067_v18, %v2031_v8  ;;  %v2032_v31 = vadd.f32 %v2013_v21, %v1764_v62  ;;  %v6151_v54 = vadd.f32 %v2194_v0, %v2086_v23  ;;  %v2083_v62 = vadd.f32 %v2057_v13, %v2027_v10  ;;  %v8042_v18 = vld [vmem:[#allocation39_spill] sm:$0xff] }
 0x7ca   : > { %v2015_v45 = vpop.f32.mrf.mxu0  ;;  %v2020_v8 = vadd.f32 %v1983_v12, %v6136_v19  ;;  %v8040_v19 = vld [vmem:[#allocation41_spill] sm:$0xff]  ;;  %v2260_v56 = vadd.f32 %v6157_v57, %v6162_v27  ;;  %v2018_v23 = vadd.f32 %v8042_v18, %v8041_v52  ;;  %v6183_v15 = vadd.f32 %v2179_v37, %v2080_v50 }
 0x7cb   : > { %v6153_v17 = vadd.f32 %v2194_v0, %v2087_v38  ;;  %v2088_v48 = vadd.f32 %v2072_v46, %v2032_v31  ;;  %v2033_v1 = vadd.f32 %v2015_v45, %v1766_v2  ;;  %v6175_v33 = vadd.f32 %v8040_v19, %v2083_v62  ;;  %v6222_v45 = vld [vmem:[%s7857_s15 + $0x10] sm:$0xff] }
 0x7cc   : > { %v2076_v9 = vadd.f32 %v2042_v11, %v2020_v8  ;;  %v6186_v12 = vadd.f32 %v8040_v19, %v2082_v24  ;;  %v6190_v0 = vadd.f32 %v2174_v28, %v2079_v53  ;;  %v2254_v30 = vadd.f32 %v6172_v25, %v6183_v15  ;;  %v6245_v11 = vld [vmem:[%s7858_s16 + $0x8] sm:$0xff]  ;;  %v6250_v62 = vld [vmem:[%s7858_s16 + $0x10] sm:$0xff] }
 0x7cd   : > { %v2089_v41 = vadd.f32 %v2072_v46, %v2033_v1  ;;  %v2263_v26 = vadd.f32 %v6153_v17, %v6151_v54  ;;  %v6165_v59 = vadd.f32 %v6144_v36, %v2088_v48  ;;  %v2037_v46 = vpop.permute.xlu0 %2036  ;;  %v6231_v48 = vld [vmem:[%s7857_s15 + $0x18] sm:$0xff]  ;;  %v6238_v1 = vld [vmem:[%s7858_s16] sm:$0xff]  ;;  %v6278_v8 = vld [vmem:[%s7858_s16 + $0x30] sm:$0xff] }
 0x7ce   : > { %v2075_v39 = vadd.f32 %v2037_v46, %v2019_v55  ;;  %v2257_v16 = vadd.f32 %v6175_v33, %v6186_v12  ;;  %v6196_v35 = vadd.f32 %v2169_v32, %v2076_v9 }
 0x7cf   : > { %v6168_v63 = vadd.f32 %v6144_v36, %v2089_v41  ;;  %2264 = vadd.xlane.f32.xlu0 %v2263_v26  ;;  %v2078_v36 = vadd.f32 %v2047_v6, %v2022_v60  ;;  %v2074_v6 = vadd.f32 %v2037_v46, %v2018_v23  ;;  %v6259_v41 = vld [vmem:[%s7858_s16 + $0x18] sm:$0xff]  ;;  %v6264_v26 = vld [vmem:[%s7858_s16 + $0x20] sm:$0xff] }
 0x7d0   : > { %v2248_v34 = vadd.f32 %v6188_v3, %v6196_v35  ;;  %v6287_v60 = vld [vmem:[%s7858_s16 + $0x38] sm:$0xff] }
 0x7d1   : > { %v2266_v20 = vadd.f32 %v6168_v63, %v6165_v59  ;;  %v6198_v13 = vadd.f32 %v2174_v28, %v2078_v36  ;;  %v2164_v4 = vpop.permute.xlu0 %2163  ;;  %v6273_v28 = vld [vmem:[%s7858_s16 + $0x28] sm:$0xff] }
 0x7d2   : > { %v6200_v14 = vadd.f32 %v2164_v4, %v2075_v39  ;;  %v6206_v2 = vadd.f32 %v2164_v4, %v2074_v6 }
 0x7d3   : > { %2267 = vadd.xlane.f32.xlu1 %v2266_v20  ;;  %2261 = vadd.xlane.f32.xlu0 %v2260_v56  ;;  %v2251_v40 = vadd.f32 %v6190_v0, %v6198_v13 }
 0x7d4   : > { %v2245_v37 = vadd.f32 %v6200_v14, %v6206_v2 }
 0x7d7   : > { %2258 = vadd.xlane.f32.xlu1 %v2257_v16  ;;  %2255 = vadd.xlane.f32.xlu0 %v2254_v30 }
 0x7db   : > { %2252 = vadd.xlane.f32.xlu1 %v2251_v40  ;;  %2249 = vadd.xlane.f32.xlu0 %v2248_v34 }
 0x7df   : > { %2246 = vadd.xlane.f32.xlu1 %v2245_v37 }
 0x858   : > { %v2265_v21 = vpop.xlane.xlu0 %2264 }
 0x85c   : > { %v2268_v10 = vpop.xlane.xlu1 %2267  ;;  %v2262_v22 = vpop.xlane.xlu0 %2261 }
 0x85d   : > { %4501 = vmatprep.subr.mxu1 %v2268_v10 }
 0x85e   : > { %4502 = vmatpush3.msra.mxu1 %v2268_v10 }
 0x85f   : > { %4503 = vmatprep.subr.mxu1 %v2265_v21 }
 0x860   : > { %4504 = vmatpush3.msra.mxu1 %v2265_v21  ;;  %v2259_v38 = vpop.xlane.xlu1 %2258  ;;  %v2256_v31 = vpop.xlane.xlu0 %2255 }
 0x861   : > { %4505 = vmatprep.subr.mxu1 %v2262_v22 }
 0x862   : > { %4506 = vmatpush3.msra.mxu1 %v2262_v22 }
 0x863   : > { %4507 = vmatprep.subr.mxu1 %v2259_v38 }
 0x864   : > { %4508 = vmatpush3.msra.mxu1 %v2259_v38  ;;  %v2253_v29 = vpop.xlane.xlu1 %2252  ;;  %v2250_v58 = vpop.xlane.xlu0 %2249 }
 0x865   : > { %4509 = vmatprep.subr.mxu1 %v2256_v31 }
 0x866   : > { %4510 = vmatpush3.msra.mxu1 %v2256_v31 }
 0x867   : > { %4511 = vmatprep.subr.mxu1 %v2253_v29 }
 0x868   : > { %4512 = vmatpush3.msra.mxu1 %v2253_v29  ;;  %v2247_v61 = vpop.xlane.xlu1 %2246 }
 0x869   : > { %4513 = vmatprep.subr.mxu1 %v2250_v58 }
 0x86a   : > { %4514 = vmatpush3.msra.mxu1 %v2250_v58 }
 0x86b   : > { %4515 = vmatprep.subr.mxu1 %v2247_v61 }
 0x86c   : > { %4516 = vmatpush3.msra.mxu1 %v2247_v61 }
 0x86d   : > { %4518 = vmatmul.mubr.msk.f32.vlgmr.msra.gmra.mxu1 %vm2120_vm1, %v6217_v7 }
 0x86e   : > { %4520 = vmatprep.mubr.msk.f32.mxu1 %vm2120_vm1, %v6222_v45 }
 0x871   : > { %4521 = vmatmul.mubr.msk.f32.gmra.mxu1 %vm2120_vm1, %v6231_v48 }
 0x872   : > { %4531 = vmatprep.mubr.msk.f32.mxu1 %vm767_vm0, %v6238_v1 }
 0x92d   : > { %v4519_v49 = vpop.f32.mrf.mxu1 }
 0x92f   : > { %v2347_v42 = vpop.f32.mrf.mxu1 }
 0x931   : > { %v4522_v43 = vpop.f32.mrf.mxu1 }
 0x932   : > { %4523 = vmatprep.subr.mxu1 %v4522_v43 }
 0x933   : > { %v2357_v47 = vpop.f32.mrf.mxu1  ;;  %4524 = vmatpush3.msra.mxu1 %v4522_v43 }
 0x934   : > { %4525 = vmatprep.subr.mxu1 %v2357_v47 }
 0x935   : > { %4526 = vmatpush3.msra.mxu1 %v2357_v47 }
 0x936   : > { %4527 = vmatprep.subr.mxu1 %v4519_v49 }
 0x937   : > { %4528 = vmatpush3.msra.mxu1 %v4519_v49 }
 0x938   : > { %4529 = vmatprep.subr.mxu1 %v2347_v42 }
 0x939   : > { %4530 = vmatpush3.msra.mxu1 %v2347_v42 }
 0x93a   : > { %4532 = vmatmul.mubr.msk.f32.vlgmr.msra.gmra.mxu1 %vm767_vm0, %v6245_v11 }
 0x93b   : > { %4534 = vmatprep.mubr.msk.f32.mxu1 %vm767_vm0, %v6250_v62 }
 0x93e   : > { %4535 = vmatmul.mubr.msk.f32.gmra.mxu1 %vm767_vm0, %v6259_v41 }
 0x93f   : > { %4537 = vmatprep.mubr.msk.f32.mxu1 %vm767_vm0, %v6264_v26 }
 0x942   : > { %4538 = vmatmul.mubr.msk.f32.gmra.mxu1 %vm767_vm0, %v6273_v28 }
 0x943   : > { %4540 = vmatprep.mubr.msk.f32.mxu1 %vm767_vm0, %v6278_v8 }
 0x946   : > { %4541 = vmatmul.mubr.msk.f32.gmra.mxu1 %vm767_vm0, %v6287_v60 }
 0x947   : > { %4559 = vmatprep.mubr.msk.f32.mxu1 %vm2120_vm1, %v2233_v44 }
 0x9fa   : > { %v4533_v50 = vpop.f32.mrf.mxu1 }
 0x9fc   : > { %v2456_v24 = vpop.f32.mrf.mxu1 }
 0x9fe   : > { %v4536_v5 = vpop.f32.mrf.mxu1 }
 0xa00   : > { %v2466_v55 = vpop.f32.mrf.mxu1 }
 0xa02   : > { %v4539_v51 = vpop.f32.mrf.mxu1 }
 0xa04   : > { %v2476_v53 = vpop.f32.mrf.mxu1 }
 0xa06   : > { %v4542_v19 = vpop.f32.mrf.mxu1 }
 0xa07   : > { %2532 = vperm.xlu0 %4679, %v4542_v19   ;;  %v2227_v19 = vld [vmem:[%s7856_s14 + $0x10] sm:$0xff] }
 0xa08   : > { %v2486_v20 = vpop.f32.mrf.mxu1 }
 0xa09   : > { %2527 = vperm.xlu1 %4680, %v2486_v20   ;;  %v2230_v20 = vld [vmem:[%s7856_s14 + $0x28] sm:$0xff] }
 0xa0b   : > { %2517 = vperm.xlu0 %4679, %v2476_v53   ;;  %v2232_v53 = vld [vmem:[%s7856_s14 + $0x38] sm:$0xff] }
 0xa0d   : > { %2522 = vperm.xlu1 %4680, %v4539_v51  }
 0xa0f   : > { %2507 = vperm.xlu0 %4679, %v2466_v55  }
 0xa11   : > { %2512 = vperm.xlu1 %4680, %v4536_v5  }
 0xa13   : > { %2497 = vperm.xlu0 %4679, %v2456_v24  }
 0xa15   : > { %2502 = vperm.xlu1 %4680, %v4533_v50  }
 0xa82   : > { %v2533_v56 = vpop.permute.xlu0 %2532 }
 0xa83   : > { %v6293_v52 = vsub.f32 %v6165_v59, %v2533_v56  ;;  %v6296_v18 = vsub.f32 %v6168_v63, %v2533_v56  ;;  %v2225_v56 = vld [vmem:[%s7856_s14] sm:$0xff] }
 0xa84   : > { %v2528_v23 = vpop.permute.xlu1 %2527 }
 0xa85   : > { %v2565_v9 = vmul.f32 %v6293_v52, %v6293_v52  ;;  %v2566_v46 = vmul.f32 %v6296_v18, %v6296_v18  ;;  %v6303_v36 = vsub.f32 %v6151_v54, %v2528_v23  ;;  %v6306_v39 = vsub.f32 %v6153_v17, %v2528_v23  ;;  %v2228_v23 = vld [vmem:[%s7856_s14 + $0x18] sm:$0xff] }
 0xa86   : > { %v2518_v32 = vpop.permute.xlu0 %2517 }
 0xa87   : > { %v2563_v59 = vmul.f32 %v6303_v36, %v6303_v36  ;;  %v2564_v63 = vmul.f32 %v6306_v39, %v6306_v39  ;;  %v6313_v16 = vsub.f32 %v6186_v12, %v2518_v32  ;;  %v6316_v30 = vsub.f32 %v6175_v33, %v2518_v32 }
 0xa88   : > { %v2523_v6 = vpop.permute.xlu1 %2522  ;;  %v2588_v4 = vadd.f32 %v2566_v46, %v2565_v9  ;;  %v2226_v9 = vld [vmem:[%s7856_s14 + $0x8] sm:$0xff] }
 0xa89   : > { %v2559_v54 = vmul.f32 %v6313_v16, %v6313_v16  ;;  %v2560_v17 = vmul.f32 %v6316_v30, %v6316_v30  ;;  %v6323_v40 = vsub.f32 %v6162_v27, %v2523_v6  ;;  %v6326_v34 = vsub.f32 %v6157_v57, %v2523_v6 }
 0xa8a   : > { %2589 = vadd.xlane.f32.xlu1 %v2588_v4  ;;  %v2508_v12 = vpop.permute.xlu0 %2507  ;;  %v2585_v37 = vadd.f32 %v2564_v63, %v2563_v59 }
 0xa8b   : > { %v2561_v33 = vmul.f32 %v6323_v40, %v6323_v40  ;;  %v2562_v44 = vmul.f32 %v6326_v34, %v6326_v34  ;;  %v6333_v21 = vsub.f32 %v6198_v13, %v2508_v12  ;;  %v6336_v10 = vsub.f32 %v6190_v0, %v2508_v12 }
 0xa8c   : > { %2586 = vadd.xlane.f32.xlu0 %v2585_v37  ;;  %v2513_v27 = vpop.permute.xlu1 %2512  ;;  %v2579_v22 = vadd.f32 %v2560_v17, %v2559_v54 }
 0xa8d   : > { %v2555_v57 = vmul.f32 %v6333_v21, %v6333_v21  ;;  %v2556_v38 = vmul.f32 %v6336_v10, %v6336_v10  ;;  %v6343_v31 = vsub.f32 %v6183_v15, %v2513_v27  ;;  %v6346_v29 = vsub.f32 %v6172_v25, %v2513_v27 }
 0xa8e   : > { %2580 = vadd.xlane.f32.xlu1 %v2579_v22  ;;  %v2498_v13 = vpop.permute.xlu0 %2497  ;;  %v2582_v58 = vadd.f32 %v2562_v44, %v2561_v33 }
 0xa8f   : > { %v2557_v0 = vmul.f32 %v6343_v31, %v6343_v31  ;;  %v2558_v61 = vmul.f32 %v6346_v29, %v6346_v29  ;;  %v6353_v49 = vsub.f32 %v6206_v2, %v2498_v13  ;;  %v6356_v42 = vsub.f32 %v6200_v14, %v2498_v13  ;;  %v2218_v13 = vld [vmem:[%s7855_s13 + $0x8] sm:$0xff] }
 0xa90   : > { %2583 = vadd.xlane.f32.xlu0 %v2582_v58  ;;  %v2503_v15 = vpop.permute.xlu1 %2502  ;;  %v2573_v43 = vadd.f32 %v2556_v38, %v2555_v57 }
 0xa91   : > { %v2551_v25 = vmul.f32 %v6353_v49, %v6353_v49  ;;  %v2552_v47 = vmul.f32 %v6356_v42, %v6356_v42  ;;  %v6363_v50 = vsub.f32 %v6196_v35, %v2503_v15  ;;  %v6366_v24 = vsub.f32 %v6188_v3, %v2503_v15  ;;  %v2231_v35 = vld [vmem:[%s7856_s14 + $0x30] sm:$0xff]  ;;  %v2229_v3 = vld [vmem:[%s7856_s14 + $0x20] sm:$0xff] }
 0xa92   : > { %2574 = vadd.xlane.f32.xlu1 %v2573_v43  ;;  %v2576_v2 = vadd.f32 %v2558_v61, %v2557_v0  ;;  %v2217_v61 = vld [vmem:[%s7855_s13] sm:$0xff] }
 0xa93   : > { %v2553_v14 = vmul.f32 %v6363_v50, %v6363_v50  ;;  %v2554_v5 = vmul.f32 %v6366_v24, %v6366_v24  ;;  %v2567_v55 = vadd.f32 %v2552_v47, %v2551_v25  ;;  %v2220_v25 = vld [vmem:[%s7855_s13 + $0x18] sm:$0xff] }
 0xa94   : > { %2577 = vadd.xlane.f32.xlu0 %v2576_v2 }
 0xa95   : > { %v2570_v51 = vadd.f32 %v2554_v5, %v2553_v14  ;;  %v2219_v14 = vld [vmem:[%s7855_s13 + $0x10] sm:$0xff] }
 0xa96   : > { %2568 = vadd.xlane.f32.xlu1 %v2567_v55 }
 0xa98   : > { %2571 = vadd.xlane.f32.xlu0 %v2570_v51  ;;  %v2222_v51 = vld [vmem:[%s7855_s13 + $0x28] sm:$0xff] }
 0xaa7   : > { %2885 = vperm.xlu1 %4680, %v2231_v35  }
 0xaab   : > { %2875 = vperm.xlu1 %4680, %v2229_v3  }
 0xaae   : > { %2890 = vperm.xlu0 %4679, %v2232_v53   ;;  %v2221_v53 = vld [vmem:[%s7855_s13 + $0x20] sm:$0xff] }
 0xaaf   : > { %2865 = vperm.xlu1 %4680, %v2227_v19  }
 0xab2   : > { %2880 = vperm.xlu0 %4679, %v2230_v20  }
 0xab3   : > { %2855 = vperm.xlu1 %4680, %v2225_v56   ;;  %v2224_v56 = vld [vmem:[%s7855_s13 + $0x38] sm:$0xff] }
 0xab6   : > { %2870 = vperm.xlu0 %4679, %v2228_v23  }
 0xaba   : > { %2860 = vperm.xlu0 %4679, %v2226_v9  }
 0xb13   : > { %v2590_v46 = vpop.xlane.xlu1 %2589 }
 0xb14   : > { %4543 = vmatprep.subr.mxu1 %v2590_v46 }
 0xb15   : > { %v2587_v32 = vpop.xlane.xlu0 %2586  ;;  %4544 = vmatpush3.msra.mxu1 %v2590_v46  ;;  %v2223_v46 = vld [vmem:[%s7855_s13 + $0x30] sm:$0xff] }
 0xb16   : > { %4545 = vmatprep.subr.mxu1 %v2587_v32 }
 0xb17   : > { %4546 = vmatpush3.msra.mxu1 %v2587_v32  ;;  %v2581_v59 = vpop.xlane.xlu1 %2580 }
 0xb19   : > { %v2584_v63 = vpop.xlane.xlu0 %2583 }
 0xb1a   : > { %4547 = vmatprep.subr.mxu1 %v2584_v63 }
 0xb1b   : > { %4548 = vmatpush3.msra.mxu1 %v2584_v63  ;;  %v2575_v6 = vpop.xlane.xlu1 %2574 }
 0xb1c   : > { %4549 = vmatprep.subr.mxu1 %v2581_v59 }
 0xb1d   : > { %v2578_v4 = vpop.xlane.xlu0 %2577  ;;  %4550 = vmatpush3.msra.mxu1 %v2581_v59 }
 0xb1e   : > { %4551 = vmatprep.subr.mxu1 %v2578_v4 }
 0xb1f   : > { %4552 = vmatpush3.msra.mxu1 %v2578_v4  ;;  %v2569_v17 = vpop.xlane.xlu1 %2568 }
 0xb20   : > { %4553 = vmatprep.subr.mxu1 %v2575_v6 }
 0xb21   : > { %v2572_v54 = vpop.xlane.xlu0 %2571  ;;  %4554 = vmatpush3.msra.mxu1 %v2575_v6 }
 0xb22   : > { %4555 = vmatprep.subr.mxu1 %v2572_v54 }
 0xb23   : > { %4556 = vmatpush3.msra.mxu1 %v2572_v54  ;;  %v2886_v4 = vpop.permute.xlu1 %2885 }
 0xb24   : > { %4557 = vmatprep.subr.mxu1 %v2569_v17 }
 0xb25   : > { %4558 = vmatpush3.msra.mxu1 %v2569_v17 }
 0xb26   : > { %4560 = vmatmul.mubr.msk.f32.vlgmr.msra.gmra.mxu1 %vm2120_vm1, %v6217_v7 }
 0xb27   : > { %4562 = vmatprep.mubr.msk.f32.mxu1 %vm2120_vm1, %v6222_v45  ;;  %v2876_v17 = vpop.permute.xlu1 %2875 }
 0xb29   : > { %v6442_v6 = vpop.permute.xlu0 %2890 }
 0xb2a   : > { %4563 = vmatmul.mubr.msk.f32.gmra.mxu1 %vm2120_vm1, %v6231_v48 }
 0xb2b   : > { %4573 = vmatprep.mubr.msk.f32.mxu1 %vm767_vm0, %v6238_v1 }
 0xb2d   : > { %v6444_v54 = vpop.permute.xlu0 %2880 }
 0xbe6   : > { %v4561_v12 = vpop.f32.mrf.mxu1 }
 0xbe8   : > { %v2657_v37 = vpop.f32.mrf.mxu1 }
 0xbea   : > { %v4564_v33 = vpop.f32.mrf.mxu1 }
 0xbeb   : > { %4565 = vmatprep.subr.mxu1 %v4564_v33 }
 0xbec   : > { %v2667_v44 = vpop.f32.mrf.mxu1  ;;  %4566 = vmatpush3.msra.mxu1 %v4564_v33 }
 0xbed   : > { %4567 = vmatprep.subr.mxu1 %v2667_v44 }
 0xbee   : > { %4568 = vmatpush3.msra.mxu1 %v2667_v44 }
 0xbef   : > { %4569 = vmatprep.subr.mxu1 %v4561_v12 }
 0xbf0   : > { %4570 = vmatpush3.msra.mxu1 %v4561_v12  ;;  %v6446_v12 = vpop.permute.xlu0 %2870 }
 0xbf1   : > { %4571 = vmatprep.subr.mxu1 %v2657_v37 }
 0xbf2   : > { %4572 = vmatpush3.msra.mxu1 %v2657_v37  ;;  %v6448_v37 = vpop.permute.xlu1 %2865 }
 0xbf3   : > { %4574 = vmatmul.mubr.msk.f32.vlgmr.msra.gmra.mxu1 %vm767_vm0, %v6245_v11 }
 0xbf4   : > { %4576 = vmatprep.mubr.msk.f32.mxu1 %vm767_vm0, %v6250_v62  ;;  %v2861_v33 = vpop.permute.xlu0 %2860 }
 0xbf6   : > { %v2856_v44 = vpop.permute.xlu1 %2855 }
 0xbf7   : > { %4577 = vmatmul.mubr.msk.f32.gmra.mxu1 %vm767_vm0, %v6259_v41 }
 0xbf8   : > { %4579 = vmatprep.mubr.msk.f32.mxu1 %vm767_vm0, %v6264_v26 }
 0xbfb   : > { %4580 = vmatmul.mubr.msk.f32.gmra.mxu1 %vm767_vm0, %v6273_v28 }
 0xbfc   : > { %4582 = vmatprep.mubr.msk.f32.mxu1 %vm767_vm0, %v6278_v8 }
 0xbff   : > { %4583 = vmatmul.mubr.msk.f32.gmra.mxu1 %vm767_vm0, %v6287_v60 }
 0xcb3   : > { %v4575_v7 = vpop.f32.mrf.mxu1 }
 0xcb4   : > { %v2748_v45 = vadd.f32 1e-05, %v4575_v7 }
 0xcb5   : > { %v2742_v48 = vpop.f32.mrf.mxu1 }
 0xcb6   : > { %4773 = vrsqrt.f32 %v2748_v45  ;;  %v2743_v1 = vadd.f32 1e-05, %v2742_v48 }
 0xcb7   : > { %v4578_v11 = vpop.f32.mrf.mxu1 }
 0xcb8   : > { %4775 = vrsqrt.f32 %v2743_v1  ;;  %v2758_v62 = vadd.f32 1e-05, %v4578_v11 }
 0xcb9   : > { %v2752_v41 = vpop.f32.mrf.mxu1 }
 0xcba   : > { %4777 = vrsqrt.f32 %v2758_v62  ;;  %v2753_v26 = vadd.f32 1e-05, %v2752_v41 }
 0xcbb   : > { %v4581_v27 = vpop.f32.mrf.mxu1 }
 0xcbc   : > { %4779 = vrsqrt.f32 %v2753_v26  ;;  %v2768_v28 = vadd.f32 1e-05, %v4581_v27 }
 0xcbd   : > { %v2762_v22 = vpop.f32.mrf.mxu1 }
 0xcbe   : > { %4781 = vrsqrt.f32 %v2768_v28  ;;  %v2763_v8 = vadd.f32 1e-05, %v2762_v22 }
 0xcbf   : > { %v4584_v57 = vpop.f32.mrf.mxu1 }
 0xcc0   : > { %4783 = vrsqrt.f32 %v2763_v8  ;;  %v2778_v60 = vadd.f32 1e-05, %v4584_v57 }
 0xcc1   : > { %v2772_v38 = vpop.f32.mrf.mxu1 }
 0xcc2   : > { %4785 = vrsqrt.f32 %v2778_v60  ;;  %v2773_v58 = vadd.f32 1e-05, %v2772_v38 }
 0xcc3   : > { %v4774_v0 = vpop.eup %4773 }
 0xcc4   : > { %4787 = vrsqrt.f32 %v2773_v58  ;;  %v2790_v15 = vmul.f32 %v4774_v0, %v2218_v13 }
 0xcc5   : > { %v4776_v43 = vpop.eup %4775 }
 0xcc6   : > { %2804 = vperm.xlu0 %4679, %v2790_v15   ;;  %v2789_v47 = vmul.f32 %v4776_v43, %v2217_v61 }
 0xcc7   : > { %v4778_v2 = vpop.eup %4777 }
 0xcc8   : > { %2799 = vperm.xlu1 %4680, %v2789_v47   ;;  %v2792_v5 = vmul.f32 %v4778_v2, %v2220_v25 }
 0xcc9   : > { %v4780_v55 = vpop.eup %4779 }
 0xcca   : > { %2814 = vperm.xlu0 %4679, %v2792_v5   ;;  %v2791_v35 = vmul.f32 %v4780_v55, %v2219_v14 }
 0xccb   : > { %v4782_v3 = vpop.eup %4781 }
 0xccc   : > { %2809 = vperm.xlu1 %4680, %v2791_v35   ;;  %v2794_v19 = vmul.f32 %v4782_v3, %v2222_v51 }
 0xccd   : > { %v4784_v20 = vpop.eup %4783 }
 0xcce   : > { %2824 = vperm.xlu0 %4679, %v2794_v19   ;;  %v2793_v23 = vmul.f32 %v4784_v20, %v2221_v53 }
 0xccf   : > { %v4786_v9 = vpop.eup %4785 }
 0xcd0   : > { %2819 = vperm.xlu1 %4680, %v2793_v23   ;;  %v2796_v32 = vmul.f32 %v4786_v9, %v2224_v56 }
 0xcd1   : > { %v4788_v59 = vpop.eup %4787 }
 0xcd2   : > { %v2795_v63 = vmul.f32 %v4788_v59, %v2223_v46 }
 0xcd4   : > { %2829 = vperm.xlu0 %4679, %v2795_v63   ;;  %2834 = vperm.xlu1 %4680, %v2796_v32  }
 0xd41   : > { %v2805_v7 = vpop.permute.xlu0 %2804 }
 0xd42   : > { %v2839_v45 = vmul.f32 %v2805_v7, %v6363_v50  ;;  %v2840_v48 = vmul.f32 %v2805_v7, %v6366_v24 }
 0xd43   : > { %v2800_v1 = vpop.permute.xlu1 %2799 }
 0xd44   : > { %v6452_v11 = vadd.f32 %v2861_v33, %v2839_v45  ;;  %v6454_v62 = vadd.f32 %v2861_v33, %v2840_v48  ;;  %v2837_v41 = vmul.f32 %v2800_v1, %v6353_v49  ;;  %v2838_v26 = vmul.f32 %v2800_v1, %v6356_v42 }
 0xd45   : > { %v2815_v27 = vpop.permute.xlu0 %2814 }
 0xd46   : > { %v4308_v28 = vmul.f32 -1.442695, %v6452_v11  ;;  %v4309_v22 = vmul.f32 -1.442695, %v6454_v62  ;;  %v6460_v8 = vadd.f32 %v2856_v44, %v2837_v41  ;;  %v6462_v57 = vadd.f32 %v2856_v44, %v2838_v26 }
 0xd47   : > { %v2810_v50 = vpop.permute.xlu1 %2809  ;;  %v2844_v15 = vmul.f32 %v2815_v27, %v6346_v29  ;;  %v2843_v59 = vmul.f32 %v2815_v27, %v6343_v31 }
 0xd48   : > { %4789 = vpow2.f32 %v4308_v28  ;;  %v4306_v24 = vmul.f32 -1.442695, %v6460_v8  ;;  %v4307_v60 = vmul.f32 -1.442695, %v6462_v57  ;;  %v2842_v29 = vmul.f32 %v2810_v50, %v6336_v10 }
 0xd49   : > { %4791 = vpow2.f32 %v4309_v22  ;;  %v2825_v49 = vpop.permute.xlu0 %2824  ;;  %v6516_v31 = vadd.f32 %v6446_v12, %v2843_v59 }
 0xd4a   : > { %4793 = vpow2.f32 %v4306_v24  ;;  %v2848_v47 = vmul.f32 %v2825_v49, %v6326_v34  ;;  %v2847_v34 = vmul.f32 %v2825_v49, %v6323_v40  ;;  %v2841_v40 = vmul.f32 %v2810_v50, %v6333_v21 }
 0xd4b   : > { %4795 = vpow2.f32 %v4307_v60  ;;  %v2820_v42 = vpop.permute.xlu1 %2819  ;;  %v6498_v46 = vadd.f32 %v6448_v37, %v2842_v29  ;;  %v4312_v45 = vmul.f32 -1.442695, %v6516_v31 }
 0xd4c   : > { %v2846_v25 = vmul.f32 %v2820_v42, %v6316_v30  ;;  %v2845_v51 = vmul.f32 %v2820_v42, %v6313_v16  ;;  %v6489_v20 = vadd.f32 %v6444_v54, %v2848_v47  ;;  %v6503_v63 = vadd.f32 %v6444_v54, %v2847_v34 }
 0xd4d   : > { %v4311_v44 = vmul.f32 -1.442695, %v6498_v46 }
 0xd4e   : > { %v6486_v3 = vadd.f32 %v2876_v17, %v2846_v25  ;;  %v6495_v9 = vadd.f32 %v2876_v17, %v2845_v51  ;;  %v6511_v17 = vadd.f32 %v6448_v37, %v2841_v40  ;;  %v4316_v54 = vmul.f32 -1.442695, %v6503_v63 }
 0xd4f   : > { %v2830_v38 = vpop.permute.xlu0 %2829  ;;  %v2835_v13 = vpop.permute.xlu1 %2834 }
 0xd50   : > { %v2849_v58 = vmul.f32 %v2830_v38, %v6303_v36  ;;  %v2850_v0 = vmul.f32 %v2830_v38, %v6306_v39  ;;  %v2851_v61 = vmul.f32 %v2835_v13, %v6293_v52  ;;  %v6481_v52 = vadd.f32 %v6446_v12, %v2844_v15 }
 0xd51   : > { %v2852_v16 = vmul.f32 %v2835_v13, %v6296_v18  ;;  %v4315_v32 = vmul.f32 -1.442695, %v6486_v3  ;;  %v4314_v33 = vmul.f32 -1.442695, %v6495_v9 }
 0xd52   : > { %v6470_v43 = vadd.f32 %v2886_v4, %v2849_v58  ;;  %v6476_v14 = vadd.f32 %v6442_v6, %v2851_v61  ;;  %v6478_v55 = vadd.f32 %v2886_v4, %v2850_v0  ;;  %v4317_v4 = vmul.f32 -1.442695, %v6489_v20 }
 0xd53   : > { %v4313_v18 = vmul.f32 -1.442695, %v6481_v52  ;;  %v6508_v21 = vadd.f32 %v6442_v6, %v2852_v16  ;;  %v4310_v6 = vmul.f32 -1.442695, %v6511_v17 }
 0xd54   : > { %v4318_v2 = vmul.f32 -1.442695, %v6470_v43  ;;  %v4320_v56 = vmul.f32 -1.442695, %v6476_v14  ;;  %v4319_v10 = vmul.f32 -1.442695, %v6478_v55 }
 0xd55   : > { %v4790_v5 = vpop.eup %4789  ;;  %v4321_v7 = vmul.f32 -1.442695, %v6508_v21 }
 0xd56   : > { %v4792_v36 = vpop.eup %4791  ;;  %v2959_v39 = vadd.f32 1.0, %v4790_v5  ;;  %4797 = vpow2.f32 %v4318_v2 }
 0xd57   : > { %v4794_v30 = vpop.eup %4793  ;;  %v2960_v35 = vadd.f32 1.0, %v4792_v36 }
 0xd58   : > { %v4796_v53 = vpop.eup %4795  ;;  %4799 = vrcp.f32 %v2959_v39  ;;  %v2957_v19 = vadd.f32 1.0, %v4794_v30 }
 0xd59   : > { %4801 = vrcp.f32 %v2960_v35  ;;  %v2958_v23 = vadd.f32 1.0, %v4796_v53 }
 0xd5a   : > { %4803 = vrcp.f32 %v2957_v19 }
 0xd5b   : > { %4805 = vrcp.f32 %v2958_v23 }
 0xd5c   : > { %4807 = vpow2.f32 %v4320_v56 }
 0xd5d   : > { %4809 = vpow2.f32 %v4319_v10 }
 0xd5e   : > { %4811 = vpow2.f32 %v4315_v32 }
 0xd5f   : > { %4813 = vpow2.f32 %v4317_v4 }
 0xd60   : > { %4815 = vpow2.f32 %v4313_v18 }
 0xd61   : > { %4817 = vpow2.f32 %v4314_v33 }
 0xd62   : > { %4819 = vpow2.f32 %v4311_v44 }
 0xd63   : > { %v4798_v37 = vpop.eup %4797  ;;  %4821 = vpow2.f32 %v4316_v54 }
 0xd64   : > { %4823 = vpow2.f32 %v4321_v7 }
 0xd65   : > { %v4800_v48 = vpop.eup %4799  ;;  %4825 = vpow2.f32 %v4310_v6 }
 0xd66   : > { %v4802_v1 = vpop.eup %4801  ;;  %v6523_v12 = vmul.f32 %v4800_v48, %v6452_v11  ;;  %4827 = vpow2.f32 %v4312_v45  ;;  %v2969_v11 = vadd.f32 1.0, %v4798_v37 }
 0xd67   : > { %v4804_v41 = vpop.eup %4803  ;;  %v6531_v50 = vmul.f32 %v4802_v1, %v6454_v62 }
 0xd68   : > { %v4806_v26 = vpop.eup %4805  ;;  %v6526_v27 = vmul.f32 %v4804_v41, %v6460_v8  ;;  %3259 = vrot.lane.b32.xlu0 %v6523_v12, %s8043_s2  ;;  %4829 = vrcp.f32 %v2969_v11 }
 0xd69   : > { %v4808_v28 = vpop.eup %4807  ;;  %v6536_v60 = vmul.f32 %v4806_v26, %v6462_v57 }
 0xd6a   : > { %v4810_v22 = vpop.eup %4809  ;;  %3257 = vrot.lane.b32.xlu1 %v6526_v27, %s8043_s2  ;;  %v2971_v49 = vadd.f32 1.0, %v4808_v28 }
 0xd6b   : > { %v4812_v24 = vpop.eup %4811  ;;  %v2970_v42 = vadd.f32 1.0, %v4810_v22 }
 0xd6c   : > { %3275 = vrot.lane.b32.xlu0 %v6531_v50, %s8043_s2  ;;  %v4814_v8 = vpop.eup %4813  ;;  %v2966_v13 = vadd.f32 1.0, %v4812_v24  ;;  %4831 = vrcp.f32 %v2971_v49 }
 0xd6d   : > { %v4816_v38 = vpop.eup %4815  ;;  %v2968_v0 = vadd.f32 1.0, %v4814_v8  ;;  %4833 = vrcp.f32 %v2970_v42 }
 0xd6e   : > { %3273 = vrot.lane.b32.xlu1 %v6536_v60, %s8043_s2  ;;  %v4818_v62 = vpop.eup %4817  ;;  %4835 = vrcp.f32 %v2966_v13  ;;  %v2964_v39 = vadd.f32 1.0, %v4816_v38 }
 0xd6f   : > { %v4820_v58 = vpop.eup %4819  ;;  %v2965_v15 = vadd.f32 1.0, %v4818_v62  ;;  %4837 = vrcp.f32 %v2968_v0 }
 0xd70   : > { %3339 = vrot.lane.b32.xlu0 %v6523_v12, %s8044_s27  ;;  %v4822_v57 = vpop.eup %4821  ;;  %v2962_v47 = vadd.f32 1.0, %v4820_v58 }
 0xd71   : > { %v4824_v61 = vpop.eup %4823  ;;  %v2967_v5 = vadd.f32 1.0, %v4822_v57 }
 0xd72   : > { %3337 = vrot.lane.b32.xlu1 %v6526_v27, %s8044_s27  ;;  %v4826_v25 = vpop.eup %4825  ;;  %v2972_v2 = vadd.f32 1.0, %v4824_v61 }
 0xd73   : > { %v4828_v36 = vpop.eup %4827  ;;  %v2961_v29 = vadd.f32 1.0, %v4826_v25 }
 0xd74   : > { %3355 = vrot.lane.b32.xlu0 %v6531_v50, %s8044_s27  ;;  %4839 = vrcp.f32 %v2972_v2  ;;  %v2963_v51 = vadd.f32 1.0, %v4828_v36 }
 0xd75   : > { %4841 = vrcp.f32 %v2965_v15  ;;  %v4830_v30 = vpop.eup %4829 }
 0xd76   : > { %3353 = vrot.lane.b32.xlu1 %v6536_v60, %s8044_s27  ;;  %4843 = vrcp.f32 %v2962_v47  ;;  %v6559_v19 = vmul.f32 %v4830_v30, %v6470_v43 }
 0xd77   : > { %4845 = vrcp.f32 %v2967_v5 }
 0xd78   : > { %3733 = vrot.lane.b32.xlu0 %v6523_v12, %s8045_s26  ;;  %4847 = vrcp.f32 %v2964_v39 }
 0xd79   : > { %4849 = vrcp.f32 %v2961_v29  ;;  %v4832_v35 = vpop.eup %4831 }
 0xd7a   : > { %3731 = vrot.lane.b32.xlu1 %v6526_v27, %s8045_s26  ;;  %4851 = vrcp.f32 %v2963_v51  ;;  %v4834_v34 = vpop.eup %4833  ;;  %v6562_v56 = vmul.f32 %v4832_v35, %v6476_v14 }
 0xd7b   : > { %v4836_v53 = vpop.eup %4835  ;;  %v6567_v10 = vmul.f32 %v4834_v34, %v6478_v55 }
 0xd7c   : > { %3749 = vrot.lane.b32.xlu0 %v6531_v50, %s8045_s26  ;;  %v4838_v23 = vpop.eup %4837  ;;  %v6572_v32 = vmul.f32 %v4836_v53, %v6486_v3  ;;  %v3335_v59 = vpack.c.bf16 %v6562_v56, %v6559_v19 }
 0xd7d   : > { %v6582_v4 = vmul.f32 %v4838_v23, %v6489_v20 }
 0xd7e   : > { %3747 = vrot.lane.b32.xlu1 %v6536_v60, %s8045_s26 }
 0xd7f   : > { %v3334_v54 = vpack.c.bf16 %v6582_v4, %v6572_v32 }
 0xd80   : > { %3107 = vrot.lane.b32.xlu0 %v6523_v12, %s8046_s29 }
 0xd81   : > { %v4840_v16 = vpop.eup %4839 }
 0xd82   : > { %3105 = vrot.lane.b32.xlu1 %v6526_v27, %s8046_s29  ;;  %v4842_v40 = vpop.eup %4841  ;;  %v6575_v43 = vmul.f32 %v4840_v16, %v6508_v21 }
 0xd83   : > { %v4844_v14 = vpop.eup %4843  ;;  %v6587_v3 = vmul.f32 %v4842_v40, %v6495_v9 }
 0xd84   : > { %3123 = vrot.lane.b32.xlu0 %v6531_v50, %s8046_s29  ;;  %v4846_v55 = vpop.eup %4845  ;;  %v3336_v18 = vpack.c.bf16 %v6575_v43, %v6567_v10  ;;  %v6592_v44 = vmul.f32 %v4844_v14, %v6498_v46 }
 0xd85   : > { %v4848_v33 = vpop.eup %4847  ;;  %v6597_v20 = vmul.f32 %v4846_v55, %v6503_v63 }
 0xd86   : > { %3121 = vrot.lane.b32.xlu1 %v6536_v60, %s8046_s29  ;;  %v4850_v21 = vpop.eup %4849  ;;  %3465 = vmatprep.subr.bf16.mxu1 %v3336_v18  ;;  %v6602_v7 = vmul.f32 %v4848_v33, %v6481_v52 }
 0xd87   : > { %3466 = vmatpush1.bf16.msra.mxu1 %v3335_v59  ;;  %v4852_v9 = vpop.eup %4851  ;;  %v6605_v6 = vmul.f32 %v4850_v21, %v6511_v17  ;;  %v3333_v46 = vpack.c.bf16 %v6597_v20, %v6587_v3  ;;  %v3330_v17 = vpack.c.bf16 %v6531_v50, %v6536_v60 }
 0xd88   : > { %3661 = vrot.lane.b32.xlu0 %v6523_v12, %s8047_s1  ;;  %3467 = vmatprep.subr.bf16.mxu1 %v3334_v54  ;;  %v3332_v63 = vpack.c.bf16 %v6602_v7, %v6592_v44  ;;  %v6614_v37 = vmul.f32 %v4852_v9, %v6516_v31  ;;  %v3329_v31 = vpack.c.bf16 %v6523_v12, %v6526_v27 }
 0xd8a   : > { %3659 = vrot.lane.b32.xlu1 %v6526_v27, %s8047_s1  ;;  %v3331_v52 = vpack.c.bf16 %v6614_v37, %v6605_v6 }
 0xd8b   : > { %3468 = vmatpush1.bf16.msra.mxu1 %v3333_v46 }
 0xd8c   : > { %3677 = vrot.lane.b32.xlu0 %v6531_v50, %s8047_s1  ;;  %3469 = vmatprep.subr.bf16.mxu1 %v3332_v63 }
 0xd8e   : > { %3675 = vrot.lane.b32.xlu1 %v6536_v60, %s8047_s1 }
 0xd8f   : > { %3470 = vmatpush1.bf16.msra.mxu1 %v3331_v52 }
 0xd90   : > { %3035 = vrot.lane.b32.xlu0 %v6523_v12, %s8048_s21  ;;  %3471 = vmatprep.subr.bf16.mxu1 %v3330_v17  ;;  %v8069_v17 = vld [vmem:[#allocation36_spill] sm:$0xff] }
 0xd92   : > { %3033 = vrot.lane.b32.xlu1 %v6526_v27, %s8048_s21 }
 0xd93   : > { %3472 = vmatpush1.bf16.msra.mxu1 %v3329_v31 }
 0xd94   : > { %3051 = vrot.lane.b32.xlu0 %v6531_v50, %s8048_s21 }
 0xd96   : > { %3049 = vrot.lane.b32.xlu1 %v6536_v60, %s8048_s21 }
 0xd98   : > { %3263 = vrot.lane.b32.xlu0 %v6614_v37, %s8043_s2 }
 0xd9a   : > { %3261 = vrot.lane.b32.xlu1 %v6605_v6, %s8043_s2 }
 0xd9c   : > { %3279 = vrot.lane.b32.xlu0 %v6602_v7, %s8043_s2 }
 0xd9e   : > { %3277 = vrot.lane.b32.xlu1 %v6592_v44, %s8043_s2 }
 0xda0   : > { %3343 = vrot.lane.b32.xlu0 %v6614_v37, %s8044_s27 }
 0xda2   : > { %3341 = vrot.lane.b32.xlu1 %v6605_v6, %s8044_s27 }
 0xda4   : > { %3359 = vrot.lane.b32.xlu0 %v6602_v7, %s8044_s27 }
 0xda6   : > { %3357 = vrot.lane.b32.xlu1 %v6592_v44, %s8044_s27 }
 0xda8   : > { %3737 = vrot.lane.b32.xlu0 %v6614_v37, %s8045_s26 }
 0xdaa   : > { %3735 = vrot.lane.b32.xlu1 %v6605_v6, %s8045_s26 }
 0xdac   : > { %3753 = vrot.lane.b32.xlu0 %v6602_v7, %s8045_s26 }
 0xdae   : > { %3751 = vrot.lane.b32.xlu1 %v6592_v44, %s8045_s26 }
 0xdb0   : > { %3111 = vrot.lane.b32.xlu0 %v6614_v37, %s8046_s29 }
 0xdb2   : > { %3109 = vrot.lane.b32.xlu1 %v6605_v6, %s8046_s29 }
 0xdb4   : > { %3127 = vrot.lane.b32.xlu0 %v6602_v7, %s8046_s29 }
 0xdb6   : > { %3125 = vrot.lane.b32.xlu1 %v6592_v44, %s8046_s29 }
 0xdb8   : > { %3665 = vrot.lane.b32.xlu0 %v6614_v37, %s8047_s1 }
 0xdba   : > { %3663 = vrot.lane.b32.xlu1 %v6605_v6, %s8047_s1 }
 0xdbc   : > { %3681 = vrot.lane.b32.xlu0 %v6602_v7, %s8047_s1 }
 0xdbe   : > { %3679 = vrot.lane.b32.xlu1 %v6592_v44, %s8047_s1 }
 0xdc0   : > { %3039 = vrot.lane.b32.xlu0 %v6614_v37, %s8048_s21 }
 0xdc2   : > { %3037 = vrot.lane.b32.xlu1 %v6605_v6, %s8048_s21 }
 0xdc4   : > { %3055 = vrot.lane.b32.xlu0 %v6602_v7, %s8048_s21 }
 0xdc6   : > { %3053 = vrot.lane.b32.xlu1 %v6592_v44, %s8048_s21 }
 0xdc8   : > { %3183 = vrot.lane.b32.xlu0 %v6614_v37, %s8049_s7 }
 0xdca   : > { %3181 = vrot.lane.b32.xlu1 %v6605_v6, %s8049_s7 }
 0xdcc   : > { %3267 = vrot.lane.b32.xlu0 %v6597_v20, %s8043_s2 }
 0xdce   : > { %3265 = vrot.lane.b32.xlu1 %v6587_v3, %s8043_s2 }
 0xdd0   : > { %3283 = vrot.lane.b32.xlu0 %v6582_v4, %s8043_s2 }
 0xdd2   : > { %3281 = vrot.lane.b32.xlu1 %v6572_v32, %s8043_s2 }
 0xdd4   : > { %3347 = vrot.lane.b32.xlu0 %v6597_v20, %s8044_s27 }
 0xdd6   : > { %3345 = vrot.lane.b32.xlu1 %v6587_v3, %s8044_s27 }
 0xdd8   : > { %3363 = vrot.lane.b32.xlu0 %v6582_v4, %s8044_s27 }
 0xdda   : > { %v6700_v45 = vpop.permute.xlu0 %3259  ;;  %3361 = vrot.lane.b32.xlu1 %v6572_v32, %s8044_s27 }
 0xddc   : > { %3741 = vrot.lane.b32.xlu0 %v6597_v20, %s8045_s26  ;;  %v6706_v48 = vpop.permute.xlu1 %3257 }
 0xdde   : > { %v6708_v1 = vpop.permute.xlu0 %3275  ;;  %3739 = vrot.lane.b32.xlu1 %v6587_v3, %s8045_s26 }
 0xde0   : > { %3757 = vrot.lane.b32.xlu0 %v6582_v4, %s8045_s26  ;;  %v6714_v41 = vpop.permute.xlu1 %3273 }
 0xde2   : > { %v6716_v26 = vpop.permute.xlu0 %3339  ;;  %3755 = vrot.lane.b32.xlu1 %v6572_v32, %s8045_s26 }
 0xde4   : > { %3115 = vrot.lane.b32.xlu0 %v6597_v20, %s8046_s29  ;;  %v6722_v28 = vpop.permute.xlu1 %3337 }
 0xde6   : > { %v6724_v22 = vpop.permute.xlu0 %3355  ;;  %3113 = vrot.lane.b32.xlu1 %v6587_v3, %s8046_s29 }
 0xde8   : > { %3131 = vrot.lane.b32.xlu0 %v6582_v4, %s8046_s29  ;;  %v6730_v11 = vpop.permute.xlu1 %3353 }
 0xdea   : > { %v6732_v24 = vpop.permute.xlu0 %3733  ;;  %3129 = vrot.lane.b32.xlu1 %v6572_v32, %s8046_s29 }
 0xdec   : > { %3669 = vrot.lane.b32.xlu0 %v6597_v20, %s8047_s1  ;;  %v6738_v49 = vpop.permute.xlu1 %3731 }
 0xdee   : > { %v6740_v8 = vpop.permute.xlu0 %3749  ;;  %3667 = vrot.lane.b32.xlu1 %v6587_v3, %s8047_s1 }
 0xdf0   : > { %3685 = vrot.lane.b32.xlu0 %v6582_v4, %s8047_s1  ;;  %v6746_v42 = vpop.permute.xlu1 %3747 }
 0xdf2   : > { %v6748_v38 = vpop.permute.xlu0 %3107  ;;  %3683 = vrot.lane.b32.xlu1 %v6572_v32, %s8047_s1 }
 0xdf3   : > { %8050 = vst [vmem:[#allocation40_spill] sm:$0xff] %v6748_v38  ;;  %v8089_v38 = vld [vmem:[#allocation35_spill] sm:$0xff] }
 0xdf4   : > { %3043 = vrot.lane.b32.xlu0 %v6597_v20, %s8048_s21  ;;  %v6754_v62 = vpop.permute.xlu1 %3105 }
 0xdf5   : > { %8051 = vst [vmem:[#allocation41_spill] sm:$0xff] %v6754_v62 }
 0xdf6   : > { %v6756_v13 = vpop.permute.xlu0 %3123  ;;  %3041 = vrot.lane.b32.xlu1 %v6587_v3, %s8048_s21 }
 0xdf7   : > { %8052 = vst [vmem:[#allocation38_spill] sm:$0xff] %v6756_v13 }
 0xdf8   : > { %3059 = vrot.lane.b32.xlu0 %v6582_v4, %s8048_s21  ;;  %v6762_v58 = vpop.permute.xlu1 %3121 }
 0xdfa   : > { %v6764_v0 = vpop.permute.xlu0 %3661  ;;  %3057 = vrot.lane.b32.xlu1 %v6572_v32, %s8048_s21 }
 0xdfb   : > { %8053 = vst [vmem:[#allocation39_spill] sm:$0xff] %v6764_v0 }
 0xdfc   : > { %3187 = vrot.lane.b32.xlu0 %v6597_v20, %s8049_s7  ;;  %v6770_v57 = vpop.permute.xlu1 %3659 }
 0xdfd   : > { %8054 = vst [vmem:[#allocation42_spill] sm:$0xff] %v6770_v57  ;;  %v8086_v57 = vld [vmem:[#allocation22_spill] sm:$0xff] }
 0xdfe   : > { %v6772_v61 = vpop.permute.xlu0 %3677  ;;  %3185 = vrot.lane.b32.xlu1 %v6587_v3, %s8049_s7 }
 0xdff   : > { %8055 = vst [vmem:[#allocation43_spill] sm:$0xff] %v6772_v61 }
 0xe00   : > { %3203 = vrot.lane.b32.xlu0 %v6582_v4, %s8049_s7  ;;  %v6778_v15 = vpop.permute.xlu1 %3675 }
 0xe01   : > { %8056 = vst [vmem:[#allocation44_spill] sm:$0xff] %v6778_v15 }
 0xe02   : > { %v6780_v25 = vpop.permute.xlu0 %3035  ;;  %3201 = vrot.lane.b32.xlu1 %v6572_v32, %s8049_s7 }
 0xe03   : > { %8057 = vst [vmem:[#allocation45_spill] sm:$0xff] %v6780_v25 }
 0xe04   : > { %3813 = vrot.lane.b32.xlu0 %v6597_v20, %s8058_s0  ;;  %v6786_v47 = vpop.permute.xlu1 %3033  ;;  %v8063_v20 = vld [vmem:[#allocation29_spill] sm:$0xff] }
 0xe05   : > { %8059 = vst [vmem:[#allocation46_spill] sm:$0xff] %v6786_v47 }
 0xe06   : > { %v6788_v2 = vpop.permute.xlu0 %3051  ;;  %3811 = vrot.lane.b32.xlu1 %v6587_v3, %s8058_s0 }
 0xe07   : > { %8060 = vst [vmem:[#allocation47_spill] sm:$0xff] %v6788_v2 }
 0xe08   : > { %3829 = vrot.lane.b32.xlu0 %v6582_v4, %s8058_s0  ;;  %v6794_v5 = vpop.permute.xlu1 %3049 }
 0xe09   : > { %8061 = vst [vmem:[#allocation48_spill] sm:$0xff] %v6794_v5 }
 0xe0a   : > { %v6796_v36 = vpop.permute.xlu0 %3263  ;;  %3827 = vrot.lane.b32.xlu1 %v6572_v32, %s8058_s0 }
 0xe0c   : > { %3271 = vrot.lane.b32.xlu0 %v6562_v56, %s8043_s2  ;;  %v6802_v39 = vpop.permute.xlu1 %3261 }
 0xe0e   : > { %v6804_v29 = vpop.permute.xlu0 %3279  ;;  %3269 = vrot.lane.b32.xlu1 %v6559_v19, %s8043_s2 }
 0xe10   : > { %3287 = vrot.lane.b32.xlu0 %v6575_v43, %s8043_s2  ;;  %v6810_v51 = vpop.permute.xlu1 %3277 }
 0xe12   : > { %v6812_v30 = vpop.permute.xlu0 %3343  ;;  %3285 = vrot.lane.b32.xlu1 %v6567_v10, %s8043_s2  ;;  %s4969_s2 = sshll.u32 %s5056_s4, 4  ;;  %s4970_s2 = int_to_ptr.vmem [resolvable:$false] %s4969_s2 }
 0xe14   : > { %3351 = vrot.lane.b32.xlu0 %v6562_v56, %s8044_s27  ;;  %v6818_v35 = vpop.permute.xlu1 %3341 }
 0xe16   : > { %v6820_v34 = vpop.permute.xlu0 %3359  ;;  %3197 = vrot.lane.b32.xlu1 %v6592_v44, %s8049_s7 }
 0xe18   : > { %3367 = vrot.lane.b32.xlu0 %v6575_v43, %s8044_s27  ;;  %v6826_v53 = vpop.permute.xlu1 %3357 }
 0xe1a   : > { %v6828_v23 = vpop.permute.xlu0 %3737  ;;  %3807 = vrot.lane.b32.xlu1 %v6605_v6, %s8058_s0 }
 0xe1c   : > { %3745 = vrot.lane.b32.xlu0 %v6562_v56, %s8045_s26  ;;  %v6834_v16 = vpop.permute.xlu1 %3735 }
 0xe1e   : > { %v6836_v40 = vpop.permute.xlu0 %3753  ;;  %3349 = vrot.lane.b32.xlu1 %v6559_v19, %s8044_s27 }
 0xe20   : > { %3761 = vrot.lane.b32.xlu0 %v6575_v43, %s8045_s26  ;;  %v6842_v32 = vpop.permute.xlu1 %3751 }
 0xe22   : > { %v3112_v14 = vpop.permute.xlu0 %3111  ;;  %3365 = vrot.lane.b32.xlu1 %v6567_v10, %s8044_s27 }
 0xe24   : > { %3119 = vrot.lane.b32.xlu0 %v6562_v56, %s8046_s29  ;;  %v3110_v59 = vpop.permute.xlu1 %3109 }
 0xe26   : > { %v3128_v55 = vpop.permute.xlu0 %3127  ;;  %3823 = vrot.lane.b32.xlu1 %v6592_v44, %s8058_s0  ;;  %v8065_v44 = vld [vmem:[#allocation28_spill] sm:$0xff] }
 0xe27   : > { %v3140_v18 = vsel %vm1373_vm6, %v3112_v14, %v3128_v55  ;;  %v3148_v33 = vsel %vm1373_vm6, %v3128_v55, %v3112_v14  ;;  %v4695_v14 = vld [vmem:[%s7860_s18 + $0x4] ss:$8 sps:$4 sm:$0xff]  }
 0xe28   : > { %3135 = vrot.lane.b32.xlu0 %v6575_v43, %s8046_s29  ;;  %v3126_v3 = vpop.permute.xlu1 %3125  ;;  %v6861_v9 = vmul.f32 %v3148_v33, %v8063_v20  ;;  %v6864_v6 = vmul.f32 %v3140_v18, %v8065_v44  ;;  %4330 = vmatprep.mubr.msk.bf16.mxu1 %vm2120_vm1, %v4695_v14  ;;  %v8071_v14 = vld [vmem:[#allocation37_spill] sm:$0xff] }
 0xe29   : > { %v3139_v21 = vsel %vm1373_vm6, %v3110_v59, %v3126_v3  ;;  %v3147_v54 = vsel %vm1373_vm6, %v3126_v3, %v3110_v59 }
 0xe2a   : > { %8064 = vst [vmem:[#allocation21_spill] sm:$0xff] %v6861_v9  ;;  %8066 = vst [vmem:[#allocation29_spill] sm:$0xff] %v6864_v6  ;;  %v6867_v46 = vmul.f32 %v3147_v54, %v8063_v20  ;;  %v6870_v63 = vmul.f32 %v3139_v21, %v8065_v44  ;;  %v3666_v52 = vpop.permute.xlu0 %3665  ;;  %3743 = vrot.lane.b32.xlu1 %v6559_v19, %s8045_s26 }
 0xe2c   : > { %8067 = vst [vmem:[#allocation28_spill] sm:$0xff] %v6867_v46  ;;  %8068 = vst [vmem:[#allocation49_spill] sm:$0xff] %v6870_v63  ;;  %3673 = vrot.lane.b32.xlu0 %v6562_v56, %s8047_s1  ;;  %v3664_v31 = vpop.permute.xlu1 %3663 }
 0xe2e   : > { %v3682_v55 = vpop.permute.xlu0 %3681  ;;  %3759 = vrot.lane.b32.xlu1 %v6567_v10, %s8045_s26  ;;  %s8184_s26 = sld [smem:[#allocation79_spill]] }
 0xe2f   : > { %v3694_v18 = vsel %vm1784_vm10, %v3666_v52, %v3682_v55  ;;  %v3702_v33 = vsel %vm1784_vm10, %v3682_v55, %v3666_v52 }
 0xe30   : > { %3689 = vrot.lane.b32.xlu0 %v6575_v43, %s8047_s1  ;;  %v3680_v3 = vpop.permute.xlu1 %3679  ;;  %v6897_v59 = vmul.f32 %v3694_v18, %v8069_v17  ;;  %v6900_v25 = vmul.f32 %v3702_v33, %v8071_v14 }
 0xe31   : > { %v3693_v21 = vsel %vm1784_vm10, %v3664_v31, %v3680_v3  ;;  %v3701_v54 = vsel %vm1784_vm10, %v3680_v3, %v3664_v31 }
 0xe32   : > { %8070 = vst [vmem:[#allocation50_spill] sm:$0xff] %v6897_v59  ;;  %8072 = vst [vmem:[#allocation37_spill] sm:$0xff] %v6900_v25  ;;  %v6903_v2 = vmul.f32 %v3693_v21, %v8069_v17  ;;  %v6906_v52 = vmul.f32 %v3701_v54, %v8071_v14  ;;  %v3040_v55 = vpop.permute.xlu0 %3039  ;;  %3117 = vrot.lane.b32.xlu1 %v6559_v19, %s8046_s29 }
 0xe34   : > { %8073 = vst [vmem:[#allocation51_spill] sm:$0xff] %v6903_v2  ;;  %8074 = vst [vmem:[#allocation52_spill] sm:$0xff] %v6906_v52  ;;  %3047 = vrot.lane.b32.xlu0 %v6562_v56, %s8048_s21  ;;  %v3038_v31 = vpop.permute.xlu1 %3037  ;;  %v8075_v2 = vld [vmem:[#allocation30_spill] sm:$0xff]  ;;  %v8077_v52 = vld [vmem:[#allocation31_spill] sm:$0xff] }
 0xe36   : > { %v3056_v33 = vpop.permute.xlu0 %3055  ;;  %3133 = vrot.lane.b32.xlu1 %v6567_v10, %s8046_s29 }
 0xe37   : > { %v3068_v3 = vsel %vm1326_vm7, %v3040_v55, %v3056_v33  ;;  %v3076_v21 = vsel %vm1326_vm7, %v3056_v33, %v3040_v55 }
 0xe38   : > { %3063 = vrot.lane.b32.xlu0 %v6575_v43, %s8048_s21  ;;  %v3054_v54 = vpop.permute.xlu1 %3053  ;;  %v6929_v59 = vmul.f32 %v3076_v21, %v8075_v2  ;;  %v6932_v25 = vmul.f32 %v3068_v3, %v8077_v52 }
 0xe39   : > { %v3067_v47 = vsel %vm1326_vm7, %v3038_v31, %v3054_v54  ;;  %v3075_v18 = vsel %vm1326_vm7, %v3054_v54, %v3038_v31 }
 0xe3a   : > { %8076 = vst [vmem:[#allocation53_spill] sm:$0xff] %v6929_v59  ;;  %8078 = vst [vmem:[#allocation54_spill] sm:$0xff] %v6932_v25  ;;  %v6935_v5 = vmul.f32 %v3075_v18, %v8075_v2  ;;  %v6938_v55 = vmul.f32 %v3067_v47, %v8077_v52  ;;  %v6940_v33 = vpop.permute.xlu0 %3183  ;;  %3671 = vrot.lane.b32.xlu1 %v6559_v19, %s8047_s1  ;;  %v8083_v59 = vld [vmem:[#allocation25_spill] sm:$0xff]  ;;  %v8084_v25 = vld [vmem:[#allocation24_spill] sm:$0xff] }
 0xe3b   : > { %8081 = vst [vmem:[#allocation57_spill] sm:$0xff] %v6940_v33 }
 0xe3c   : > { %8079 = vst [vmem:[#allocation55_spill] sm:$0xff] %v6935_v5  ;;  %8080 = vst [vmem:[#allocation56_spill] sm:$0xff] %v6938_v55  ;;  %3191 = vrot.lane.b32.xlu0 %v6562_v56, %s8049_s7  ;;  %v6948_v21 = vpop.permute.xlu1 %3181 }
 0xe3d   : > { %8082 = vst [vmem:[#allocation58_spill] sm:$0xff] %v6948_v21 }
 0xe3e   : > { %v3268_v3 = vpop.permute.xlu0 %3267  ;;  %3687 = vrot.lane.b32.xlu1 %v6567_v10, %s8047_s1  ;;  %s8185_s1 = smov %s8184_s26 }
 0xe40   : > { %3207 = vrot.lane.b32.xlu0 %v6575_v43, %s8049_s7  ;;  %v3266_v47 = vpop.permute.xlu1 %3265 }
 0xe42   : > { %v3284_v54 = vpop.permute.xlu0 %3283  ;;  %3045 = vrot.lane.b32.xlu1 %v6559_v19, %s8048_s21 }
 0xe43   : > { %v3294_v31 = vsel %vm1471_vm3, %v3268_v3, %v3284_v54  ;;  %v3302_v21 = vsel %vm1471_vm3, %v3284_v54, %v3268_v3 }
 0xe44   : > { %3817 = vrot.lane.b32.xlu0 %v6562_v56, %s8058_s0  ;;  %v3282_v18 = vpop.permute.xlu1 %3281  ;;  %v6969_v55 = vmul.f32 %v3302_v21, %v8083_v59  ;;  %v6972_v61 = vmul.f32 %v3294_v31, %v8084_v25  ;;  %v8085_v31 = vld [vmem:[#allocation23_spill] sm:$0xff] }
 0xe45   : > { %v3293_v33 = vsel %vm1471_vm3, %v3266_v47, %v3282_v18  ;;  %v3301_v5 = vsel %vm1471_vm3, %v3282_v18, %v3266_v47 }
 0xe46   : > { %v6975_v0 = vmul.f32 %v3301_v5, %v8083_v59  ;;  %v6978_v3 = vmul.f32 %v3293_v33, %v8084_v25  ;;  %v3348_v56 = vpop.permute.xlu0 %3347  ;;  %3061 = vrot.lane.b32.xlu1 %v6567_v10, %s8048_s21  ;;  %s7793_s21 = scalar_lea.hbm %s8184_s26, %s4364_s23  ;;  %s4971_s23 = scalar_lea.vmem %s4970_s2, 4096 }
 0xe48   : > { %3833 = vrot.lane.b32.xlu0 %v6575_v43, %s8058_s0  ;;  %v3346_v21 = vpop.permute.xlu1 %3345 }
 0xe4a   : > { %v3364_v18 = vpop.permute.xlu0 %3363  ;;  %3177 = vrot.lane.b32.xlu1 %v6526_v27, %s8049_s7 }
 0xe4b   : > { %v3374_v5 = vsel %vm1520_vm2, %v3348_v56, %v3364_v18  ;;  %v3382_v33 = vsel %vm1520_vm2, %v3364_v18, %v3348_v56 }
 0xe4c   : > { %3199 = vrot.lane.b32.xlu0 %v6602_v7, %s8049_s7  ;;  %v3362_v47 = vpop.permute.xlu1 %3361  ;;  %v7001_v15 = vmul.f32 %v3374_v5, %v8085_v31  ;;  %v7004_v46 = vmul.f32 %v3382_v33, %v8086_v57  ;;  %v8087_v5 = vld [vmem:[#allocation34_spill] sm:$0xff] }
 0xe4d   : > { %v3373_v43 = vsel %vm1520_vm2, %v3346_v21, %v3362_v47  ;;  %v3381_v54 = vsel %vm1520_vm2, %v3362_v47, %v3346_v21 }
 0xe4e   : > { %v7007_v9 = vmul.f32 %v3373_v43, %v8085_v31  ;;  %v7010_v56 = vmul.f32 %v3381_v54, %v8086_v57  ;;  %v3742_v18 = vpop.permute.xlu0 %3741  ;;  %3189 = vrot.lane.b32.xlu1 %v6559_v19, %s8049_s7 }
 0xe50   : > { %3809 = vrot.lane.b32.xlu0 %v6614_v37, %s8058_s0  ;;  %v3740_v21 = vpop.permute.xlu1 %3739 }
 0xe52   : > { %v3758_v33 = vpop.permute.xlu0 %3757  ;;  %3205 = vrot.lane.b32.xlu1 %v6567_v10, %s8049_s7 }
 0xe53   : > { %v3768_v54 = vsel %vm1829_vm9, %v3742_v18, %v3758_v33  ;;  %v3776_v47 = vsel %vm1829_vm9, %v3758_v33, %v3742_v18 }
 0xe54   : > { %3825 = vrot.lane.b32.xlu0 %v6602_v7, %s8058_s0  ;;  %v3756_v43 = vpop.permute.xlu1 %3755  ;;  %v7033_v6 = vmul.f32 %v3768_v54, %v8087_v5  ;;  %v7036_v13 = vmul.f32 %v3776_v47, %v8089_v38 }
 0xe55   : > { %v3767_v37 = vsel %vm1829_vm9, %v3740_v21, %v3756_v43  ;;  %v3775_v63 = vsel %vm1829_vm9, %v3756_v43, %v3740_v21 }
 0xe56   : > { %8088 = vst [vmem:[#allocation25_spill] sm:$0xff] %v7033_v6  ;;  %v7039_v62 = vmul.f32 %v3767_v37, %v8087_v5  ;;  %v7042_v18 = vmul.f32 %v3775_v63, %v8089_v38  ;;  %v3116_v7 = vpop.permute.xlu0 %3115  ;;  %3815 = vrot.lane.b32.xlu1 %v6559_v19, %s8058_s0 }
 0xe58   : > { %8090 = vst [vmem:[#allocation24_spill] sm:$0xff] %v7039_v62  ;;  %3179 = vrot.lane.b32.xlu0 %v6523_v12, %s8049_s7  ;;  %v3114_v21 = vpop.permute.xlu1 %3113 }
 0xe5a   : > { %v3132_v47 = vpop.permute.xlu0 %3131  ;;  %3831 = vrot.lane.b32.xlu1 %v6567_v10, %s8058_s0  ;;  %v4707_v10 = vld [vmem:[%s7859_s17 + $0x4] ss:$8 sps:$4 sm:$0xff]  }
 0xe5b   : > { %v3142_v63 = vsel %vm1373_vm6, %v3116_v7, %v3132_v47  ;;  %v3150_v19 = vsel %vm1373_vm6, %v3132_v47, %v3116_v7  ;;  %4342 = vmatprep.mubr.msk.bf16.mxu0 %vm2120_vm1, %v4707_v10 }
 0xe5c   : > { %3195 = vrot.lane.b32.xlu0 %v6531_v50, %s8049_s7  ;;  %v3130_v43 = vpop.permute.xlu1 %3129  ;;  %v7068_v54 = vmul.f32 %v3150_v19, %v8063_v20  ;;  %v7071_v62 = vmul.f32 %v3142_v63, %v8065_v44 }
 0xe5d   : > { %v3141_v37 = vsel %vm1373_vm6, %v3114_v21, %v3130_v43  ;;  %v3149_v33 = vsel %vm1373_vm6, %v3130_v43, %v3114_v21 }
 0xe5e   : > { %v7074_v7 = vmul.f32 %v3149_v33, %v8063_v20  ;;  %v7077_v47 = vmul.f32 %v3141_v37, %v8065_v44  ;;  %v3670_v6 = vpop.permute.xlu0 %3669  ;;  %3193 = vrot.lane.b32.xlu1 %v6536_v60, %s8049_s7  ;;  %s717_s7 = sand.u32 1, %s5029_s25  }
 0xe5f   : > { %s4230_s30 = sshll.u32 %s717_s7, 7  ;;  %s7801_s3 = scalar_lea.sflag [#allocation4], %s717_s7 }
 0xe60   : > { %8091 = vst [vmem:[#allocation23_spill] sm:$0xff] %v7074_v7  ;;  %3805 = vrot.lane.b32.xlu0 %v6523_v12, %s8058_s0  ;;  %v3668_v63 = vpop.permute.xlu1 %3667 }
 0xe62   : > { %v3686_v19 = vpop.permute.xlu0 %3685  ;;  %3803 = vrot.lane.b32.xlu1 %v6526_v27, %s8058_s0  ;;  %v3026_v27 = vld [vmem:[%s7862_s20 + $0x8] sm:$0xff] }
 0xe63   : > { %v3696_v43 = vsel %vm1784_vm10, %v3670_v6, %v3686_v19  ;;  %v3704_v37 = vsel %vm1784_vm10, %v3686_v19, %v3670_v6 }
 0xe64   : > { %3821 = vrot.lane.b32.xlu0 %v6531_v50, %s8058_s0  ;;  %v3684_v10 = vpop.permute.xlu1 %3683  ;;  %v7104_v33 = vmul.f32 %v3696_v43, %v8069_v17  ;;  %v7107_v7 = vmul.f32 %v3704_v37, %v8071_v14 }
 0xe65   : > { %v3695_v12 = vsel %vm1784_vm10, %v3668_v63, %v3684_v10  ;;  %v3703_v21 = vsel %vm1784_vm10, %v3684_v10, %v3668_v63  ;;  %v3025_v63 = vld [vmem:[%s7862_s20] sm:$0xff] }
 0xe66   : > { %8092 = vst [vmem:[#allocation22_spill] sm:$0xff] %v7104_v33  ;;  %8093 = vst [vmem:[#allocation34_spill] sm:$0xff] %v7107_v7  ;;  %v7110_v6 = vmul.f32 %v3695_v12, %v8069_v17  ;;  %v7113_v50 = vmul.f32 %v3703_v21, %v8071_v14  ;;  %v3044_v19 = vpop.permute.xlu0 %3043  ;;  %3819 = vrot.lane.b32.xlu1 %v6536_v60, %s8058_s0  ;;  %v3028_v21 = vld [vmem:[%s7862_s20 + $0x18] sm:$0xff] }
 0xe68   : > { %8094 = vst [vmem:[#allocation35_spill] sm:$0xff] %v7110_v6  ;;  %8095 = vst [vmem:[#allocation59_spill] sm:$0xff] %v7113_v50  ;;  %4027 = vperm.xlu0 %4679, %v3026_v27   ;;  %v3042_v37 = vpop.permute.xlu1 %3041  ;;  %v3027_v27 = vld [vmem:[%s7862_s20 + $0x10] sm:$0xff] }
 0xe6a   : > { %v3060_v12 = vpop.permute.xlu0 %3059  ;;  %4022 = vperm.xlu1 %4680, %v3025_v63   ;;  %v3030_v63 = vld [vmem:[%s7862_s20 + $0x28] sm:$0xff] }
 0xe6b   : > { %v3070_v60 = vsel %vm1326_vm7, %v3044_v19, %v3060_v12  ;;  %v3078_v17 = vsel %vm1326_vm7, %v3060_v12, %v3044_v19 }
 0xe6c   : > { %4037 = vperm.xlu0 %4679, %v3028_v21   ;;  %v3058_v43 = vpop.permute.xlu1 %3057  ;;  %v7142_v33 = vmul.f32 %v3078_v17, %v8075_v2  ;;  %v7145_v19 = vmul.f32 %v3070_v60, %v8077_v52 }
 0xe6d   : > { %v3069_v10 = vsel %vm1326_vm7, %v3042_v37, %v3058_v43  ;;  %v3077_v6 = vsel %vm1326_vm7, %v3058_v43, %v3042_v37  ;;  %v3029_v43 = vld [vmem:[%s7862_s20 + $0x20] sm:$0xff] }
 0xe6e   : > { %8096 = vst [vmem:[#allocation60_spill] sm:$0xff] %v7142_v33  ;;  %8097 = vst [vmem:[#allocation61_spill] sm:$0xff] %v7145_v19  ;;  %v7148_v12 = vmul.f32 %v3077_v6, %v8075_v2  ;;  %v7151_v21 = vmul.f32 %v3069_v10, %v8077_v52  ;;  %v3188_v50 = vpop.permute.xlu0 %3187  ;;  %4032 = vperm.xlu1 %4680, %v3027_v27   ;;  %v3032_v6 = vld [vmem:[%s7862_s20 + $0x38] sm:$0xff]  ;;  %v8100_v33 = vld [vmem:[#allocation27_spill] sm:$0xff] }
 0xe70   : > { %8098 = vst [vmem:[#allocation62_spill] sm:$0xff] %v7148_v12  ;;  %8099 = vst [vmem:[#allocation63_spill] sm:$0xff] %v7151_v21  ;;  %4047 = vperm.xlu0 %4679, %v3030_v63   ;;  %v3186_v17 = vpop.permute.xlu1 %3185  ;;  %v3031_v63 = vld [vmem:[%s7862_s20 + $0x30] sm:$0xff]  ;;  %v8102_v21 = vld [vmem:[#allocation26_spill] sm:$0xff] }
 0xe72   : > { %v3204_v10 = vpop.permute.xlu0 %3203  ;;  %4042 = vperm.xlu1 %4680, %v3029_v43  }
 0xe73   : > { %v3214_v27 = vsel %vm1418_vm5, %v3188_v50, %v3204_v10  ;;  %v3222_v7 = vsel %vm1418_vm5, %v3204_v10, %v3188_v50 }
 0xe74   : > { %4057 = vperm.xlu0 %4679, %v3032_v6   ;;  %v3202_v37 = vpop.permute.xlu1 %3201  ;;  %v7175_v43 = vmul.f32 %v3222_v7, %v8100_v33  ;;  %v7178_v19 = vmul.f32 %v3214_v27, %v8102_v21 }
 0xe75   : > { %v3213_v60 = vsel %vm1418_vm5, %v3186_v17, %v3202_v37  ;;  %v3221_v12 = vsel %vm1418_vm5, %v3202_v37, %v3186_v17 }
 0xe76   : > { %8101 = vst [vmem:[#allocation64_spill] sm:$0xff] %v7175_v43  ;;  %8103 = vst [vmem:[#allocation26_spill] sm:$0xff] %v7178_v19  ;;  %v7181_v50 = vmul.f32 %v3221_v12, %v8100_v33  ;;  %v7184_v10 = vmul.f32 %v3213_v60, %v8102_v21  ;;  %v3814_v6 = vpop.permute.xlu0 %3813  ;;  %4052 = vperm.xlu1 %4680, %v3031_v63   ;;  %v8106_v33 = vld [vmem:[#allocation32_spill] sm:$0xff] }
 0xe78   : > { %8104 = vst [vmem:[#allocation65_spill] sm:$0xff] %v7181_v50  ;;  %8105 = vst [vmem:[#allocation66_spill] sm:$0xff] %v7184_v10  ;;  %v3812_v2 = vpop.permute.xlu1 %3811  ;;  %v8108_v50 = vld [vmem:[#allocation33_spill] sm:$0xff] }
 0xe7a   : > { %v3830_v7 = vpop.permute.xlu0 %3829 }
 0xe7b   : > { %v3840_v17 = vsel %vm1874_vm8, %v3814_v6, %v3830_v7  ;;  %v3848_v12 = vsel %vm1874_vm8, %v3830_v7, %v3814_v6 }
 0xe7c   : > { %v3828_v27 = vpop.permute.xlu1 %3827  ;;  %v7199_v52 = vmul.f32 %v3840_v17, %v8106_v33  ;;  %v7202_v43 = vmul.f32 %v3848_v12, %v8108_v50 }
 0xe7d   : > { %v3839_v60 = vsel %vm1874_vm8, %v3812_v2, %v3828_v27  ;;  %v3847_v63 = vsel %vm1874_vm8, %v3828_v27, %v3812_v2 }
 0xe7e   : > { %8107 = vst [vmem:[#allocation67_spill] sm:$0xff] %v7199_v52  ;;  %8109 = vst [vmem:[#allocation68_spill] sm:$0xff] %v7202_v43  ;;  %v7205_v37 = vmul.f32 %v3839_v60, %v8106_v33  ;;  %v7208_v10 = vmul.f32 %v3847_v63, %v8108_v50  ;;  %v3272_v6 = vpop.permute.xlu0 %3271 }
 0xe80   : > { %8110 = vst [vmem:[#allocation69_spill] sm:$0xff] %v7205_v37  ;;  %8111 = vst [vmem:[#allocation70_spill] sm:$0xff] %v7208_v10  ;;  %v3270_v19 = vpop.permute.xlu1 %3269 }
 0xe82   : > { %v3288_v27 = vpop.permute.xlu0 %3287 }
 0xe83   : > { %v3296_v17 = vsel %vm1471_vm3, %v3272_v6, %v3288_v27  ;;  %v3304_v12 = vsel %vm1471_vm3, %v3288_v27, %v3272_v6  ;;  %v3291_v6 = vsel %vm1471_vm3, %v6802_v39, %v6810_v51 }
 0xe84   : > { %v3286_v60 = vpop.permute.xlu1 %3285  ;;  %v3319_v7 = vmul.f32 %v3304_v12, %v8083_v59  ;;  %v3320_v37 = vmul.f32 %v3296_v17, %v8084_v25  ;;  %v3310_v17 = vmul.f32 %v3291_v6, %v8084_v25  ;;  %v3298_v6 = vsel %vm1471_vm3, %v6708_v1, %v6700_v45 }
 0xe85   : > { %v3295_v63 = vsel %vm1471_vm3, %v3270_v19, %v3286_v60  ;;  %v3303_v50 = vsel %vm1471_vm3, %v3286_v60, %v3270_v19  ;;  %v3292_v19 = vsel %vm1471_vm3, %v6796_v36, %v6804_v29 }
 0xe86   : > { %v3317_v2 = vmul.f32 %v3303_v50, %v8083_v59  ;;  %v3318_v52 = vmul.f32 %v3295_v63, %v8084_v25  ;;  %v3352_v10 = vpop.permute.xlu0 %3351  ;;  %v3299_v50 = vsel %vm1471_vm3, %v6810_v51, %v6802_v39  ;;  %v8112_v39 = vpack.c.bf16 %v6972_v61, %v6978_v3 }
 0xe87   : > { %v8113_v63 = vpack.c.bf16 %v6969_v55, %v6975_v0 }
 0xe88   : > { %v3327_v27 = vpack.c.bf16 %v3319_v7, %v3317_v2  ;;  %v7230_v43 = vpop.permute.xlu1 %3197  ;;  %v3328_v33 = vpack.c.bf16 %v3320_v37, %v3318_v52  ;;  %v3289_v7 = vsel %vm1471_vm3, %v6706_v48, %v6714_v41  ;;  %v3300_v52 = vsel %vm1471_vm3, %v6804_v29, %v6796_v36 }
 0xe89   : > { %v3312_v37 = vmul.f32 %v3292_v19, %v8084_v25  ;;  %v3309_v2 = vmul.f32 %v3299_v50, %v8083_v59  ;;  %v3297_v36 = vsel %vm1471_vm3, %v6714_v41, %v6706_v48  ;;  %v3306_v29 = vmul.f32 %v3289_v7, %v8084_v25 }
 0xe8a   : > { %v3368_v12 = vpop.permute.xlu0 %3367  ;;  %3473 = vmatprep.subr.bf16.mxu1 %v3328_v33  ;;  %v3290_v33 = vsel %vm1471_vm3, %v6700_v45, %v6708_v1  ;;  %v3311_v3 = vmul.f32 %v3300_v52, %v8083_v59  ;;  %v3305_v41 = vmul.f32 %v3297_v36, %v8083_v59  ;;  %v3307_v7 = vmul.f32 %v3298_v6, %v8083_v59 }
 0xe8b   : > { %3474 = vmatpush1.bf16.msra.mxu1 %v3327_v27  ;;  %v3324_v61 = vpack.c.bf16 %v3312_v37, %v3310_v17  ;;  %v3308_v27 = vmul.f32 %v3290_v33, %v8084_v25  ;;  %v3376_v0 = vsel %vm1520_vm2, %v3352_v10, %v3368_v12  ;;  %v3384_v55 = vsel %vm1520_vm2, %v3368_v12, %v3352_v10 }
 0xe8c   : > { %3475 = vmatprep.subr.bf16.mxu1 %v8112_v39  ;;  %v7253_v51 = vpop.permute.xlu1 %3807  ;;  %v3323_v19 = vpack.c.bf16 %v3311_v3, %v3309_v2  ;;  %v3321_v1 = vpack.c.bf16 %v3307_v7, %v3305_v41  ;;  %v3399_v37 = vmul.f32 %v3376_v0, %v8085_v31  ;;  %v3400_v59 = vmul.f32 %v3384_v55, %v8086_v57 }
 0xe8d   : > { %v3322_v17 = vpack.c.bf16 %v3308_v27, %v3306_v29  ;;  %v3379_v10 = vsel %vm1520_vm2, %v6826_v53, %v6818_v35  ;;  %v3371_v3 = vsel %vm1520_vm2, %v6818_v35, %v6826_v53  ;;  %v3377_v27 = vsel %vm1520_vm2, %v6730_v11, %v6722_v28 }
 0xe8e   : > { %v7265_v60 = vpop.permute.xlu0 %3745  ;;  %v8114_v35 = vpack.c.bf16 %v7004_v46, %v7010_v56  ;;  %v3369_v7 = vsel %vm1520_vm2, %v6722_v28, %v6730_v11  ;;  %v8115_v56 = vpack.c.bf16 %v7001_v15, %v7007_v9  ;;  %v3370_v55 = vsel %vm1520_vm2, %v6716_v26, %v6724_v22 }
 0xe8f   : > { %3476 = vmatpush1.bf16.msra.mxu1 %v8113_v63  ;;  %v3390_v63 = vmul.f32 %v3379_v10, %v8086_v57  ;;  %v3385_v11 = vmul.f32 %v3369_v7, %v8085_v31 }
 0xe90   : > { %3477 = vmatprep.subr.bf16.mxu1 %v3324_v61  ;;  %v3350_v48 = vpop.permute.xlu1 %3349  ;;  %v3380_v61 = vsel %vm1520_vm2, %v6820_v34, %v6812_v30 }
 0xe91   : > { %v3392_v41 = vmul.f32 %v3380_v61, %v8086_v57  ;;  %v4693_v61 = vld [vmem:[%s7860_s18] ss:$8 sps:$4 sm:$0xff]  }
 0xe92   : > { %v3762_v50 = vpop.permute.xlu0 %3761 }
 0xe93   : > { %3478 = vmatpush1.bf16.msra.mxu1 %v3323_v19  ;;  %v3378_v19 = vsel %vm1520_vm2, %v6724_v22, %v6716_v26  ;;  %v3404_v0 = vpack.c.bf16 %v3392_v41, %v3390_v63  ;;  %v4696_v63 = vld [vmem:[%s7860_s18 + $0x14] ss:$8 sps:$4 sm:$0xff]  }
 0xe94   : > { %3479 = vmatprep.subr.bf16.mxu1 %v3322_v17  ;;  %v3366_v45 = vpop.permute.xlu1 %3365  ;;  %v3389_v17 = vmul.f32 %v3371_v3, %v8085_v31 }
 0xe95   : > { %v3375_v25 = vsel %vm1520_vm2, %v3350_v48, %v3366_v45  ;;  %v3383_v52 = vsel %vm1520_vm2, %v3366_v45, %v3350_v48  ;;  %v3372_v48 = vsel %vm1520_vm2, %v6812_v30, %v6820_v34  ;;  %v3386_v30 = vmul.f32 %v3377_v27, %v8086_v57 }
 0xe96   : > { %v3397_v39 = vmul.f32 %v3375_v25, %v8085_v31  ;;  %v3398_v33 = vmul.f32 %v3383_v52, %v8086_v57  ;;  %v3120_v2 = vpop.permute.xlu0 %3119  ;;  %v3391_v46 = vmul.f32 %v3372_v48, %v8085_v31  ;;  %v3388_v45 = vmul.f32 %v3378_v19, %v8086_v57 }
 0xe97   : > { %3480 = vmatpush1.bf16.msra.mxu1 %v3321_v1  ;;  %v3778_v25 = vsel %vm1829_vm9, %v3762_v50, %v7265_v60  ;;  %v3387_v57 = vmul.f32 %v3370_v55, %v8085_v31  ;;  %v3771_v27 = vsel %vm1829_vm9, %v6746_v42, %v6738_v49  ;;  %v3774_v48 = vsel %vm1829_vm9, %v6836_v40, %v6828_v23 }
 0xe98   : > { %v3407_v12 = vpack.c.bf16 %v3399_v37, %v3397_v39  ;;  %v7294_v36 = vpop.permute.xlu1 %3823  ;;  %v3408_v29 = vpack.c.bf16 %v3400_v59, %v3398_v33  ;;  %v3403_v1 = vpack.c.bf16 %v3391_v46, %v3389_v17  ;;  %v3402_v22 = vpack.c.bf16 %v3388_v45, %v3386_v30 }
 0xe99   : > { %v3770_v37 = vsel %vm1829_vm9, %v7265_v60, %v3762_v50  ;;  %v3794_v59 = vmul.f32 %v3778_v25, %v8089_v38  ;;  %v3401_v33 = vpack.c.bf16 %v3387_v57, %v3385_v11  ;;  %v3780_v46 = vmul.f32 %v3771_v27, %v8089_v38 }
 0xe9a   : > { %v3136_v6 = vpop.permute.xlu0 %3135  ;;  %3489 = vmatprep.subr.bf16.mxu1 %v3408_v29  ;;  %v3793_v60 = vmul.f32 %v3770_v37, %v8087_v5  ;;  %v3786_v55 = vmul.f32 %v3774_v48, %v8089_v38  ;;  %v3763_v25 = vsel %vm1829_vm9, %v6738_v49, %v6746_v42  ;;  %v8118_v49 = vld [vmem:[#allocation25_spill] sm:$0xff]  ;;  %v8119_v42 = vld [vmem:[#allocation24_spill] sm:$0xff] }
 0xe9b   : > { %3490 = vmatpush2.bf16.msra.mxu1 %v3407_v12  ;;  %v3773_v12 = vsel %vm1829_vm9, %v6842_v32, %v6834_v16  ;;  %v3144_v50 = vsel %vm1373_vm6, %v3120_v2, %v3136_v6  ;;  %v3152_v3 = vsel %vm1373_vm6, %v3136_v6, %v3120_v2  ;;  %v3765_v2 = vsel %vm1829_vm9, %v6834_v16, %v6842_v32 }
 0xe9c   : > { %3491 = vmatprep.subr.bf16.mxu1 %v8114_v35  ;;  %v3744_v53 = vpop.permute.xlu1 %3743  ;;  %v3784_v41 = vmul.f32 %v3773_v12, %v8089_v38  ;;  %v3167_v17 = vmul.f32 %v3152_v3, %v8063_v20  ;;  %v3168_v7 = vmul.f32 %v3144_v50, %v8065_v44  ;;  %v3772_v32 = vsel %vm1829_vm9, %v6740_v8, %v6732_v24  ;;  %v8123_v12 = vld [vmem:[#allocation40_spill] sm:$0xff] }
 0xe9d   : > { %v8120_v57 = vpack.c.bf16 %v8118_v49, %v8119_v42  ;;  %v3779_v37 = vmul.f32 %v3763_v25, %v8087_v5 }
 0xe9e   : > { %v7327_v34 = vpop.permute.xlu0 %3673 }
 0xe9f   : > { %3492 = vmatpush2.bf16.msra.mxu1 %v8115_v56  ;;  %v3766_v56 = vsel %vm1829_vm9, %v6828_v23, %v6836_v40  ;;  %v3798_v23 = vpack.c.bf16 %v3786_v55, %v3784_v41  ;;  %v8117_v40 = vld [vmem:[#allocation41_spill] sm:$0xff] }
 0xea0   : > { %3493 = vmatprep.subr.bf16.mxu1 %v3404_v0  ;;  %v3760_v28 = vpop.permute.xlu1 %3759 }
 0xea1   : > { %v3777_v15 = vsel %vm1829_vm9, %v3760_v28, %v3744_v53  ;;  %v3769_v9 = vsel %vm1829_vm9, %v3744_v53, %v3760_v28  ;;  %v8116_v28 = vpack.c.bf16 %v7036_v13, %v7042_v18  ;;  %v4698_v13 = vld [vmem:[%s7860_s18 + $0x10] ss:$8 sps:$4 sm:$0xff]   ;;  %v3137_v18 = vsel %vm1373_vm6, %v8117_v40, %v6762_v58 }
 0xea2   : > { %v3792_v52 = vmul.f32 %v3777_v15, %v8089_v38  ;;  %v7347_v26 = vpop.permute.xlu0 %3689  ;;  %v3791_v10 = vmul.f32 %v3769_v9, %v8087_v5  ;;  %v3783_v15 = vmul.f32 %v3765_v2, %v8087_v5  ;;  %v3782_v9 = vmul.f32 %v3772_v32, %v8089_v38  ;;  %v8124_v2 = vld [vmem:[#allocation23_spill] sm:$0xff] }
 0xea3   : > { %3494 = vmatpush2.bf16.msra.mxu1 %v3403_v1  ;;  %v3764_v38 = vsel %vm1829_vm9, %v6732_v24, %v6740_v8  ;;  %v3706_v24 = vsel %vm1784_vm10, %v7347_v26, %v7327_v34  ;;  %v3698_v41 = vsel %vm1784_vm10, %v7327_v34, %v7347_v26 }
 0xea4   : > { %3495 = vmatprep.subr.bf16.mxu1 %v3402_v22  ;;  %v3118_v39 = vpop.permute.xlu1 %3117  ;;  %v3802_v31 = vpack.c.bf16 %v3794_v59, %v3792_v52  ;;  %v3801_v35 = vpack.c.bf16 %v3793_v60, %v3791_v10  ;;  %v3785_v22 = vmul.f32 %v3766_v56, %v8087_v5  ;;  %v8121_v59 = vpack.c.bf16 %v7071_v62, %v7077_v47  ;;  %v8122_v10 = vld [vmem:[#allocation38_spill] sm:$0xff]  ;;  %v4699_v62 = vld [vmem:[%s7860_s18 + $0x24] ss:$8 sps:$4 sm:$0xff]  }
 0xea5   : > { %v3145_v47 = vsel %vm1373_vm6, %v6762_v58, %v8117_v40  ;;  %v3154_v60 = vmul.f32 %v3137_v18, %v8065_v44  ;;  %v3781_v27 = vmul.f32 %v3764_v38, %v8087_v5  ;;  %v3146_v48 = vsel %vm1373_vm6, %v8122_v10, %v8123_v12  ;;  %v8126_v5 = vld [vmem:[#allocation29_spill] sm:$0xff]  ;;  %v8134_v40 = vld [vmem:[#allocation31_spill] sm:$0xff]  ;;  %v8136_v38 = vld [vmem:[#allocation44_spill] sm:$0xff] }
 0xea6   : > { %v7359_v29 = vpop.permute.xlu0 %3047  ;;  %v8125_v58 = vpack.c.bf16 %v7068_v54, %v8124_v2  ;;  %v3153_v54 = vmul.f32 %v3145_v47, %v8063_v20  ;;  %v8144_v2 = vld [vmem:[#allocation22_spill] sm:$0xff] }
 0xea7   : > { %3496 = vmatpush2.bf16.msra.mxu1 %v3401_v33  ;;  %v3796_v33 = vpack.c.bf16 %v3782_v9, %v3780_v46  ;;  %v4701_v46 = vld [vmem:[%s7860_s18 + $0x20] ss:$8 sps:$4 sm:$0xff]  }
 0xea8   : > { %3931 = vmatprep.subr.bf16.mxu1 %v3802_v31  ;;  %v3134_v6 = vpop.permute.xlu1 %3133  ;;  %v3138_v31 = vsel %vm1373_vm6, %v8123_v12, %v8122_v10 }
 0xea9   : > { %v3143_v53 = vsel %vm1373_vm6, %v3118_v39, %v3134_v6  ;;  %v3151_v19 = vsel %vm1373_vm6, %v3134_v6, %v3118_v39  ;;  %v3156_v6 = vmul.f32 %v3138_v31, %v8065_v44 }
 0xeaa   : > { %v3165_v30 = vmul.f32 %v3151_v19, %v8063_v20  ;;  %v3166_v0 = vmul.f32 %v3143_v53, %v8065_v44  ;;  %v3064_v16 = vpop.permute.xlu0 %3063  ;;  %3498 = vmatmul.mubr.bf16.vlgmr.msra.gmra.mxu1 %v4693_v61  ;;  %v3797_v61 = vpack.c.bf16 %v3785_v22, %v3783_v15  ;;  %v8127_v53 = vld [vmem:[#allocation49_spill] sm:$0xff]  ;;  %v3155_v44 = vmul.f32 %v3146_v48, %v8063_v20  ;;  %v8131_v20 = vld [vmem:[#allocation28_spill] sm:$0xff] }
 0xeab   : > { %3932 = vmatpush1.bf16.msra.mxu1 %v3801_v35  ;;  %4331 = vmatprep.mubr.msk.bf16.mxu1 %vm2120_vm1, %v4696_v63  ;;  %v3722_v35 = vmul.f32 %v3706_v24, %v8071_v14  ;;  %v8128_v19 = vpack.c.bf16 %v8126_v5, %v8127_v53  ;;  %v3170_v34 = vpack.c.bf16 %v3156_v6, %v3154_v60  ;;  %v8141_v24 = vld [vmem:[#allocation43_spill] sm:$0xff]  ;;  %v8147_v5 = vld [vmem:[#allocation61_spill] sm:$0xff] }
 0xeac   : > { %v3175_v45 = vpack.c.bf16 %v3167_v17, %v3165_v30  ;;  %3933 = vmatprep.subr.bf16.mxu1 %v8116_v28  ;;  %v3672_v11 = vpop.permute.xlu1 %3671  ;;  %v3176_v1 = vpack.c.bf16 %v3168_v7, %v3166_v0  ;;  %v3795_v7 = vpack.c.bf16 %v3781_v27, %v3779_v37  ;;  %v8129_v30 = vld [vmem:[#allocation36_spill] sm:$0xff]  ;;  %v3072_v55 = vsel %vm1326_vm7, %v7359_v29, %v3064_v16  ;;  %v8130_v28 = vld [vmem:[#allocation21_spill] sm:$0xff]  ;;  %v8143_v27 = vld [vmem:[#allocation46_spill] sm:$0xff] }
 0xead   : > { %v3721_v56 = vmul.f32 %v3698_v41, %v8129_v30  ;;  %v3169_v25 = vpack.c.bf16 %v3155_v44, %v3153_v54  ;;  %v3096_v18 = vmul.f32 %v3072_v55, %v8134_v40  ;;  %v8148_v53 = vld [vmem:[#allocation63_spill] sm:$0xff] }
 0xeae   : > { %v7413_v52 = vpop.permute.xlu0 %3191  ;;  %3586 = vmatprep.subr.bf16.mxu0 %v3176_v1 }
 0xeaf   : > { %3587 = vmatpush1.bf16.msra.mxu0 %v3175_v45  ;;  %3934 = vmatpush1.bf16.msra.mxu1 %v8120_v57  ;;  %v3080_v45 = vsel %vm1326_vm7, %v3064_v16, %v7359_v29  ;;  %v4702_v29 = vld [vmem:[%s7860_s18 + $0x34] ss:$8 sps:$4 sm:$0xff]  }
 0xeb0   : > { %3588 = vmatprep.subr.bf16.mxu0 %v8121_v59  ;;  %3935 = vmatprep.subr.bf16.mxu1 %v3798_v23  ;;  %v3688_v39 = vpop.permute.xlu1 %3687  ;;  %v8133_v16 = vld [vmem:[#allocation30_spill] sm:$0xff] }
 0xeb1   : > { %v3705_v8 = vsel %vm1784_vm10, %v3688_v39, %v3672_v11  ;;  %v3697_v50 = vsel %vm1784_vm10, %v3672_v11, %v3688_v39  ;;  %v8132_v11 = vpack.c.bf16 %v8130_v28, %v8131_v20  ;;  %v8135_v57 = vld [vmem:[#allocation42_spill] sm:$0xff] }
 0xeb2   : > { %v3720_v3 = vmul.f32 %v3705_v8, %v8071_v14  ;;  %v7455_v63 = vpop.permute.xlu0 %3207  ;;  %3508 = vmatmul.mubr.bf16.gmra.mxu1 %v4698_v13  ;;  %v3719_v0 = vmul.f32 %v3697_v50, %v8129_v30  ;;  %v3095_v13 = vmul.f32 %v3080_v45, %v8133_v16  ;;  %v3699_v37 = vsel %vm1784_vm10, %v8136_v38, %v8135_v57  ;;  %v8137_v39 = vld [vmem:[#allocation34_spill] sm:$0xff] }
 0xeb3   : > { %3589 = vmatpush1.bf16.msra.mxu0 %v8125_v58  ;;  %3936 = vmatpush1.bf16.msra.mxu1 %v3797_v61  ;;  %v8140_v61 = vld [vmem:[#allocation39_spill] sm:$0xff]  ;;  %v3708_v47 = vmul.f32 %v3699_v37, %v8071_v14  ;;  %v4704_v50 = vld [vmem:[%s7860_s18 + $0x30] ss:$8 sps:$4 sm:$0xff]  }
 0xeb4   : > { %3590 = vmatprep.subr.bf16.mxu0 %v8128_v19  ;;  %3937 = vmatprep.subr.bf16.mxu1 %v3796_v33  ;;  %v3046_v17 = vpop.permute.xlu1 %3045  ;;  %v3730_v26 = vpack.c.bf16 %v3722_v35, %v3720_v3  ;;  %v3729_v15 = vpack.c.bf16 %v3721_v56, %v3719_v0  ;;  %v8138_v33 = vld [vmem:[#allocation59_spill] sm:$0xff]  ;;  %v3700_v8 = vsel %vm1784_vm10, %v8141_v24, %v8140_v61  ;;  %v8142_v3 = vld [vmem:[#allocation48_spill] sm:$0xff] }
 0xeb5   : > { %4332 = vmatprep.mubr.msk.bf16.mxu1 %vm2120_vm1, %v4699_v62  ;;  %v8139_v10 = vpack.c.bf16 %v8137_v39, %v8138_v33  ;;  %v3691_v62 = vsel %vm1784_vm10, %v8135_v57, %v8136_v38  ;;  %v3065_v48 = vsel %vm1326_vm7, %v8143_v27, %v8142_v3  ;;  %v8145_v58 = vld [vmem:[#allocation35_spill] sm:$0xff]  ;;  %v3692_v41 = vsel %vm1784_vm10, %v8140_v61, %v8141_v24  ;;  %v4853_v57 = vld [vmem:[%s5294_s24 + $0x38] sm:$0xff]  ;;  %v4854_v38 = vld [vmem:[%s5294_s24 + $0x28] sm:$0xff] }
 0xeb6   : > { %v7478_v32 = vpop.permute.xlu0 %3817  ;;  %v8146_v6 = vpack.c.bf16 %v8144_v2, %v8145_v58  ;;  %v3710_v35 = vmul.f32 %v3700_v8, %v8071_v14  ;;  %v8149_v19 = vpack.c.bf16 %v8147_v5, %v8148_v53  ;;  %v3707_v44 = vmul.f32 %v3691_v62, %v8129_v30  ;;  %v4710_v14 = vld [vmem:[%s7861_s19 + $0x4] ss:$8 sps:$4 sm:$0xff]   ;;  %v4855_v8 = vld [vmem:[%s5294_s24 + $0x30] sm:$0xff] }
 0xeb7   : > { %3591 = vmatpush1.bf16.msra.mxu0 %v8132_v11  ;;  %3938 = vmatpush1.bf16.msra.mxu1 %v3795_v7  ;;  %v8151_v7 = vld [vmem:[#allocation52_spill] sm:$0xff]  ;;  %v3073_v56 = vsel %vm1326_vm7, %v8142_v3, %v8143_v27  ;;  %v3082_v55 = vmul.f32 %v3065_v48, %v8134_v40  ;;  %v3709_v20 = vmul.f32 %v3692_v41, %v8129_v30  ;;  %v4856_v62 = vld [vmem:[%s5294_s24 + $0x20] sm:$0xff]  ;;  %v8164_v3 = vld [vmem:[#allocation53_spill] sm:$0xff] }
 0xeb8   : > { %3592 = vmatprep.subr.bf16.mxu0 %v3170_v34  ;;  %3939 = vmatprep.subr.bf16.mxu1 %v3730_v26  ;;  %v3062_v1 = vpop.permute.xlu1 %3061  ;;  %v8153_v34 = vld [vmem:[#allocation47_spill] sm:$0xff]  ;;  %v8154_v26 = vld [vmem:[#allocation45_spill] sm:$0xff]  ;;  %v3724_v28 = vpack.c.bf16 %v3710_v35, %v3708_v47  ;;  %v8155_v11 = vld [vmem:[#allocation60_spill] sm:$0xff]  ;;  %v3024_v37 = vpack.c.bf16 %v4853_v57, %v4854_v38  ;;  %v3081_v39 = vmul.f32 %v3073_v56, %v8133_v16 }
 0xeb9   : > { %v3071_v9 = vsel %vm1326_vm7, %v3046_v17, %v3062_v1  ;;  %v3079_v23 = vsel %vm1326_vm7, %v3062_v1, %v3046_v17  ;;  %v8150_v17 = vld [vmem:[#allocation37_spill] sm:$0xff]  ;;  %v8156_v1 = vld [vmem:[#allocation62_spill] sm:$0xff]  ;;  %v3216_v33 = vsel %vm1418_vm5, %v7413_v52, %v7455_v63  ;;  %v3023_v47 = vpack.c.bf16 %v4855_v8, %v4856_v62  ;;  %v8165_v27 = vld [vmem:[#allocation55_spill] sm:$0xff] }
 0xeba   : > { %v3093_v22 = vmul.f32 %v3079_v23, %v8133_v16  ;;  %v3094_v49 = vmul.f32 %v3071_v9, %v8134_v40  ;;  %v7504_v42 = vpop.permute.xlu0 %3833  ;;  %3518 = vmatmul.mubr.bf16.gmra.mxu1 %v4701_v46  ;;  %v8152_v54 = vpack.c.bf16 %v8150_v17, %v8151_v7  ;;  %v3066_v46 = vsel %vm1326_vm7, %v8154_v26, %v8153_v34  ;;  %v8159_v9 = vld [vmem:[#allocation51_spill] sm:$0xff]  ;;  %v4857_v41 = vld [vmem:[%s5294_s24 + $0x18] sm:$0xff]  ;;  %v4858_v35 = vld [vmem:[%s5294_s24 + $0x8] sm:$0xff] }
 0xebb   : > { %3593 = vmatpush1.bf16.msra.mxu0 %v3169_v25  ;;  %3940 = vmatpush1.bf16.msra.mxu1 %v3729_v15  ;;  %v8157_v25 = vpack.c.bf16 %v8155_v11, %v8156_v1  ;;  %v8158_v15 = vld [vmem:[#allocation50_spill] sm:$0xff]  ;;  %v8166_v48 = vpack.c.bf16 %v8164_v3, %v8165_v27  ;;  %v3224_v2 = vsel %vm1418_vm5, %v7455_v63, %v7413_v52  ;;  %v8168_v7 = vld [vmem:[#allocation57_spill] sm:$0xff]  ;;  %v8175_v27 = vld [vmem:[#allocation64_spill] sm:$0xff] }
 0xebc   : > { %v3103_v59 = vpack.c.bf16 %v3095_v13, %v3093_v22  ;;  %3941 = vmatprep.subr.bf16.mxu1 %v8139_v10  ;;  %v7513_v12 = vpop.permute.xlu1 %3177  ;;  %v3104_v31 = vpack.c.bf16 %v3096_v18, %v3094_v49  ;;  %4333 = vmatprep.mubr.msk.bf16.mxu1 %vm2120_vm1, %v4702_v29  ;;  %v8160_v23 = vpack.c.bf16 %v8158_v15, %v8159_v9  ;;  %v8161_v18 = vld [vmem:[#allocation54_spill] sm:$0xff]  ;;  %v8162_v22 = vld [vmem:[#allocation56_spill] sm:$0xff] }
 0xebd   : > { %v3074_v29 = vsel %vm1326_vm7, %v8153_v34, %v8154_v26  ;;  %v3084_v13 = vmul.f32 %v3066_v46, %v8134_v40  ;;  %v8163_v49 = vpack.c.bf16 %v8161_v18, %v8162_v22  ;;  %v3240_v58 = vmul.f32 %v3216_v33, %v8102_v21  ;;  %v8172_v57 = vld [vmem:[#allocation26_spill] sm:$0xff] }
 0xebe   : > { %v7525_v60 = vpop.permute.xlu0 %3199  ;;  %3594 = vmatprep.subr.bf16.mxu0 %v3104_v31  ;;  %v3842_v53 = vsel %vm1874_vm8, %v7478_v32, %v7504_v42  ;;  %v3850_v46 = vsel %vm1874_vm8, %v7504_v42, %v7478_v32  ;;  %v8171_v42 = vld [vmem:[#allocation33_spill] sm:$0xff]  ;;  %v8173_v38 = vld [vmem:[#allocation66_spill] sm:$0xff]  ;;  %v3837_v3 = vsel %vm1874_vm8, %v7253_v51, %v7294_v36 }
 0xebf   : > { %3595 = vmatpush1.bf16.msra.mxu0 %v3103_v59  ;;  %3942 = vmatpush1.bf16.msra.mxu1 %v8146_v6  ;;  %v3723_v59 = vpack.c.bf16 %v3709_v20, %v3707_v44  ;;  %v3098_v24 = vpack.c.bf16 %v3084_v13, %v3082_v55  ;;  %v3212_v52 = vsel %vm1418_vm5, %v8168_v7, %v7525_v60  ;;  %v4860_v44 = vld [vmem:[%s5294_s24] sm:$0xff]  ;;  %v8170_v55 = vld [vmem:[#allocation32_spill] sm:$0xff] }
 0xec0   : > { %3596 = vmatprep.subr.bf16.mxu0 %v8149_v19  ;;  %3943 = vmatprep.subr.bf16.mxu1 %v8152_v54  ;;  %v3190_v0 = vpop.permute.xlu1 %3189  ;;  %v8167_v19 = vld [vmem:[#allocation27_spill] sm:$0xff]  ;;  %v3232_v11 = vmul.f32 %v3212_v52, %v8102_v21  ;;  %v3866_v15 = vmul.f32 %v3850_v46, %v8171_v42  ;;  %v3220_v9 = vsel %vm1418_vm5, %v7525_v60, %v8168_v7 }
 0xec1   : > { %v3239_v26 = vmul.f32 %v3224_v2, %v8167_v19  ;;  %v3845_v60 = vsel %vm1874_vm8, %v7294_v36, %v7253_v51  ;;  %v3231_v33 = vmul.f32 %v3220_v9, %v8167_v19  ;;  %v4717_v9 = vld [vmem:[%s7859_s17 + $0x24] ss:$8 sps:$4 sm:$0xff]  }
 0xec2   : > { %v7561_v45 = vpop.permute.xlu0 %3809  ;;  %3528 = vmatmul.mubr.bf16.gmra.mxu1 %v4704_v50  ;;  %v3083_v50 = vmul.f32 %v3074_v29, %v8133_v16  ;;  %v3022_v16 = vpack.c.bf16 %v4857_v41, %v4858_v35 }
 0xec3   : > { %3597 = vmatpush1.bf16.msra.mxu0 %v8157_v25  ;;  %3944 = vmatpush1.bf16.msra.mxu1 %v8160_v23 }
 0xec4   : > { %3598 = vmatprep.subr.bf16.mxu0 %v8163_v49  ;;  %3945 = vmatprep.subr.bf16.mxu1 %v3724_v28  ;;  %v3206_v30 = vpop.permute.xlu1 %3205  ;;  %v3097_v5 = vpack.c.bf16 %v3083_v50, %v3081_v39  ;;  %v3865_v28 = vmul.f32 %v3842_v53, %v8170_v55 }
 0xec5   : > { %v3215_v40 = vsel %vm1418_vm5, %v3190_v0, %v3206_v30  ;;  %4354 = vmatprep.mubr.msk.bf16.mxu1 %vm1577_vm4, %v4710_v14  ;;  %v3223_v10 = vsel %vm1418_vm5, %v3206_v30, %v3190_v0  ;;  %v4859_v0 = vld [vmem:[%s5294_s24 + $0x10] sm:$0xff]  ;;  %v8169_v14 = vld [vmem:[#allocation58_spill] sm:$0xff]  ;;  %s7765_s24 = scalar_lea.vmem [#allocation10], %s4230_s30 }
 0xec6   : > { %v3238_v31 = vmul.f32 %v3215_v40, %v8102_v21  ;;  %v3826_v61 = vpop.permute.xlu0 %3825  ;;  %v3237_v17 = vmul.f32 %v3223_v10, %v8167_v19  ;;  %v3021_v34 = vpack.c.bf16 %v4859_v0, %v4860_v44  ;;  %v3211_v56 = vsel %vm1418_vm5, %v8169_v14, %v7230_v43  ;;  %v8182_v0 = vld [vmem:[#allocation69_spill] sm:$0xff]  ;;  %s4106_s0 = sshll.u32 %s7765_s24, 4  ;;  %s7796_s0 = int_to_ptr.vmem [resolvable:$true] %s4106_s0 }
 0xec7   : > { %3599 = vmatpush1.bf16.msra.mxu0 %v8166_v48  ;;  %3946 = vmatpush1.bf16.msra.mxu1 %v3723_v59  ;;  %v3230_v18 = vmul.f32 %v3211_v56, %v8102_v21  ;;  %v3846_v22 = vsel %vm1874_vm8, %v3826_v61, %v7561_v45  ;;  %v3219_v49 = vsel %vm1418_vm5, %v7230_v43, %v8169_v14  ;;  %v8176_v48 = vld [vmem:[#allocation65_spill] sm:$0xff]  ;;  %s4965_s30 = scalar_lea.vmem %s7796_s0, 2048  ;;  %p4972_p0 = scmp.lt.s32.totalorder %s7796_s0, %s4970_s2 }
 0xec8   : > { %3600 = vmatprep.subr.bf16.mxu0 %v3098_v24  ;;  %v3816_v6 = vpop.permute.xlu1 %3815  ;;  %3951 = vmatprep.subr.bf16.mxu1 %v3024_v37  ;;  %v3248_v54 = vpack.c.bf16 %v3240_v58, %v3238_v31  ;;  %v3247_v1 = vpack.c.bf16 %v3239_v26, %v3237_v17  ;;  %v8174_v37 = vpack.c.bf16 %v8172_v57, %v8173_v38  ;;  %v8178_v58 = vld [vmem:[#allocation68_spill] sm:$0xff]  ;;  %p4966_p8 = scmp.ne.s32.totalorder %s7796_s0, %s4965_s30  ;;  %p4973_p2 = scmp.lt.s32.totalorder %s4971_s23, %s4965_s30 }
 0xec9   : > { %v3244_v10 = vpack.c.bf16 %v3232_v11, %v3230_v18  ;;  %v3838_v31 = vsel %vm1874_vm8, %v7561_v45, %v3826_v61  ;;  %v3858_v24 = vmul.f32 %v3846_v22, %v8171_v42  ;;  %v3229_v50 = vmul.f32 %v3219_v49, %v8167_v19  ;;  %v4723_v18 = vld [vmem:[%s7859_s17 + $0x34] ss:$8 sps:$4 sm:$0xff]   ;;  %v4722_v22 = vld [vmem:[%s7861_s19 + $0x20] ss:$8 sps:$4 sm:$0xff]  }
 0xeca   : > { %v3180_v63 = vpop.permute.xlu0 %3179  ;;  %v8177_v45 = vpack.c.bf16 %v8175_v27, %v8176_v48  ;;  %v3856_v61 = vmul.f32 %v3845_v60, %v8171_v42  ;;  %v3857_v51 = vmul.f32 %v3838_v31, %v8170_v55  ;;  %v4726_v49 = vld [vmem:[%s7861_s19 + $0x34] ss:$8 sps:$4 sm:$0xff]   ;;  %v4725_v60 = vld [vmem:[%s7859_s17 + $0x30] ss:$8 sps:$4 sm:$0xff]   ;;  %p4967_p11 = pnand %p4966_p8, %p5206_p5  ;;  %p4974_p13 = por %p4973_p2, %p4972_p0 }
 0xecb   : > { %3601 = vmatpush1.bf16.msra.mxu0 %v3097_v5  ;;  %3952 = vmatpush2.bf16.msra.mxu1 %v3023_v47  ;;  %v3855_v5 = vmul.f32 %v3837_v3, %v8170_v55 }
 0xecc   : > { %3610 = vmatprep.subr.bf16.mxu0 %v3248_v54  ;;  %v3832_v20 = vpop.permute.xlu1 %3831  ;;  %3953 = vmatprep.subr.bf16.mxu1 %v3022_v16  ;;  %v3243_v16 = vpack.c.bf16 %v3231_v33, %v3229_v50  ;;  %v3870_v7 = vpack.c.bf16 %v3858_v24, %v3856_v61  ;;  %v8181_v54 = vld [vmem:[#allocation67_spill] sm:$0xff]  ;;  %p4968_p1 = pneg %p4967_p11 }
 0xecd   : > { %v3841_v25 = vsel %vm1874_vm8, %v3816_v6, %v3832_v20  ;;  %v3849_v32 = vsel %vm1874_vm8, %v3832_v20, %v3816_v6  ;;  %v8179_v6 = vld [vmem:[#allocation70_spill] sm:$0xff]  ;;  %v8183_v44 = vpack.c.bf16 %v8181_v54, %v8182_v0  ;;  %v3869_v26 = vpack.c.bf16 %v3857_v51, %v3855_v5 }
 0xece   : > { %v3863_v23 = vmul.f32 %v3841_v25, %v8170_v55  ;;  %v3864_v29 = vmul.f32 %v3849_v32, %v8171_v42  ;;  %v3196_v13 = vpop.permute.xlu0 %3195  ;;  %v8180_v41 = vpack.c.bf16 %v8178_v58, %v8179_v6  ;;  %v4711_v25 = vld [vmem:[%s7859_s17 + $0x14] ss:$8 sps:$4 sm:$0xff]   ;;  %p4975_p3 = pnand %p4974_p13, %p4968_p1 }
 0xecf   : > { %3611 = vmatpush2.bf16.msra.mxu0 %v3247_v1  ;;  %3954 = vmatpush2.bf16.msra.mxu1 %v3021_v34  ;;  %v3210_v40 = vsel %vm1418_vm5, %v3180_v63, %v3196_v13  ;;  %v4705_v1 = vld [vmem:[%s7859_s17] ss:$8 sps:$4 sm:$0xff]  }
 0xed0   : > { %v3873_v30 = vpack.c.bf16 %v3865_v28, %v3863_v23  ;;  %3612 = vmatprep.subr.bf16.mxu0 %v8174_v37  ;;  %v3194_v59 = vpop.permute.xlu1 %3193  ;;  %v3874_v39 = vpack.c.bf16 %v3866_v15, %v3864_v29  ;;  %v3228_v2 = vmul.f32 %v3210_v40, %v8102_v21  ;;  %v4713_v15 = vld [vmem:[%s7859_s17 + $0x10] ss:$8 sps:$4 sm:$0xff]   ;;  %v4720_v29 = vld [vmem:[%s7861_s19 + $0x24] ss:$8 sps:$4 sm:$0xff]  }
 0xed1   : > { %v3209_v43 = vsel %vm1418_vm5, %v7513_v12, %v3194_v59  ;;  %v3217_v8 = vsel %vm1418_vm5, %v3194_v59, %v7513_v12  ;;  %v3218_v12 = vsel %vm1418_vm5, %v3196_v13, %v3180_v63  ;;  %v4716_v23 = vld [vmem:[%s7861_s19 + $0x10] ss:$8 sps:$4 sm:$0xff]   ;;  %v4719_v13 = vld [vmem:[%s7859_s17 + $0x20] ss:$8 sps:$4 sm:$0xff]  }
 0xed2   : > { %v3226_v62 = vmul.f32 %v3209_v43, %v8102_v21  ;;  %v3806_v47 = vpop.permute.xlu0 %3805  ;;  %3955 = vmatprep.subr.bf16.mxu1 %v3874_v39  ;;  %v3225_v36 = vmul.f32 %v3217_v8, %v8167_v19  ;;  %v3227_v52 = vmul.f32 %v3218_v12, %v8167_v19 }
 0xed3   : > { %3613 = vmatpush2.bf16.msra.mxu0 %v8177_v45  ;;  %3956 = vmatpush2.bf16.msra.mxu1 %v3873_v30  ;;  %v4728_v30 = vld [vmem:[%s7861_s19 + $0x30] ss:$8 sps:$4 sm:$0xff]  }
 0xed4   : > { %3614 = vmatprep.subr.bf16.mxu0 %v3244_v10  ;;  %3957 = vmatprep.subr.bf16.mxu1 %v8180_v41  ;;  %v3804_v35 = vpop.permute.xlu1 %3803  ;;  %v3242_v17 = vpack.c.bf16 %v3228_v2, %v3226_v62  ;;  %v3241_v46 = vpack.c.bf16 %v3227_v52, %v3225_v36 }
 0xed6   : > { %v3822_v53 = vpop.permute.xlu0 %3821 }
 0xed7   : > { %v3836_v21 = vsel %vm1874_vm8, %v3806_v47, %v3822_v53  ;;  %v3844_v63 = vsel %vm1874_vm8, %v3822_v53, %v3806_v47  ;;  %3615 = vmatpush2.bf16.msra.mxu0 %v3243_v16  ;;  %3958 = vmatpush2.bf16.msra.mxu1 %v8183_v44 }
 0xed8   : > { %3616 = vmatprep.subr.bf16.mxu0 %v3242_v17  ;;  %3959 = vmatprep.subr.bf16.mxu1 %v3870_v7  ;;  %v3820_v34 = vpop.permute.xlu1 %3819  ;;  %v3853_v56 = vmul.f32 %v3836_v21, %v8170_v55  ;;  %v3854_v28 = vmul.f32 %v3844_v63, %v8171_v42 }
 0xed9   : > { %v3835_v14 = vsel %vm1874_vm8, %v3804_v35, %v3820_v34  ;;  %v3843_v19 = vsel %vm1874_vm8, %v3820_v34, %v3804_v35 }
 0xeda   : > { %v3851_v20 = vmul.f32 %v3835_v14, %v8170_v55  ;;  %v3852_v11 = vmul.f32 %v3843_v19, %v8171_v42  ;;  %v4708_v55 = vld [vmem:[%s7861_s19] ss:$8 sps:$4 sm:$0xff]   ;;  %v4714_v42 = vld [vmem:[%s7861_s19 + $0x14] ss:$8 sps:$4 sm:$0xff]  }
 0xedb   : > { %3617 = vmatpush2.bf16.msra.mxu0 %v3241_v46  ;;  %3960 = vmatpush2.bf16.msra.mxu1 %v3869_v26 }
 0xedc   : > { %v3867_v4 = vpack.c.bf16 %v3853_v56, %v3851_v20  ;;  %v3868_v32 = vpack.c.bf16 %v3854_v28, %v3852_v11 }
 0xede   : > { %3619 = vmatmul.mubr.bf16.vlgmr.msra.gmra.mxu0 %v4705_v1  ;;  %3961 = vmatprep.subr.bf16.mxu1 %v3868_v32 }
 0xedf   : > { %3962 = vmatpush2.bf16.msra.mxu1 %v3867_v4  ;;  %4343 = vmatprep.mubr.msk.bf16.mxu0 %vm2120_vm1, %v4711_v25 }
 0xee2   : > { %3964 = vmatmul.mubr.bf16.vlgmr.msra.gmra.mxu1 %v4708_v55 }
 0xee3   : > { %4355 = vmatprep.mubr.msk.bf16.mxu1 %vm1577_vm4, %v4714_v42  ;;  %v4028_v17 = vpop.permute.xlu0 %4027 }
 0xee5   : > { %v4023_v2 = vpop.permute.xlu1 %4022 }
 0xee6   : > { %3629 = vmatmul.mubr.bf16.gmra.mxu0 %v4713_v15 }
 0xee7   : > { %4344 = vmatprep.mubr.msk.bf16.mxu0 %vm2120_vm1, %v4717_v9  ;;  %v4038_v42 = vpop.permute.xlu0 %4037 }
 0xee9   : > { %v4033_v14 = vpop.permute.xlu1 %4032 }
 0xeea   : > { %3974 = vmatmul.mubr.bf16.gmra.mxu1 %v4716_v23 }
 0xeeb   : > { %4356 = vmatprep.mubr.msk.bf16.mxu1 %vm1577_vm4, %v4720_v29 }
 0xeee   : > { %3639 = vmatmul.mubr.bf16.gmra.mxu0 %v4719_v13 }
 0xeef   : > { %4345 = vmatprep.mubr.msk.bf16.mxu0 %vm2120_vm1, %v4723_v18 }
 0xef2   : > { %3984 = vmatmul.mubr.bf16.gmra.mxu1 %v4722_v22 }
 0xef3   : > { %4357 = vmatprep.mubr.msk.bf16.mxu1 %vm1577_vm4, %v4726_v49 }
 0xef6   : > { %3649 = vmatmul.mubr.bf16.gmra.mxu0 %v4725_v60 }
 0xefa   : > { %3994 = vmatmul.mubr.bf16.gmra.mxu1 %v4728_v30 }
 0xf6a   : > { %v3499_v57 = vpop.f32.mrf.mxu1 }
 0xf6c   : > { %v3501_v38 = vpop.f32.mrf.mxu1 }
 0xf6e   : > { %v3503_v37 = vpop.f32.mrf.mxu1 }
 0xf70   : > { %v3505_v59 = vpop.f32.mrf.mxu1 }
 0xf72   : > { %v3509_v39 = vpop.f32.mrf.mxu1 }
 0xf74   : > { %v3511_v33 = vpop.f32.mrf.mxu1 }
 0xf76   : > { %v3513_v40 = vpop.f32.mrf.mxu1 }
 0xf78   : > { %v3515_v43 = vpop.f32.mrf.mxu1 }
 0xf7a   : > { %v3519_v10 = vpop.f32.mrf.mxu1 }
 0xf7c   : > { %v7748_v31 = vpop.f32.mrf.mxu1 }
 0xf7e   : > { %v7750_v24 = vpop.f32.mrf.mxu1 }
 0xf80   : > { %v7752_v8 = vpop.f32.mrf.mxu1 }
 0xf82   : > { %v7754_v62 = vpop.f32.mrf.mxu1 }
 0xf84   : > { %v7756_v47 = vpop.f32.mrf.mxu1 }
 0xf86   : > { %v7758_v50 = vpop.f32.mrf.mxu1 }
 0xf88   : > { %v7761_v27 = vpop.f32.mrf.mxu1 }
 0xf9e   : > { %v3620_v3 = vpop.f32.mrf.mxu0 }
 0xf9f   : > { %v3621_v45 = vadd.f32 %v3620_v3, %v3499_v57  ;;  %v4043_v57 = vpop.permute.xlu1 %4042 }
 0xfa0   : > { %v3622_v48 = vpop.f32.mrf.mxu0 }
 0xfa1   : > { %v3623_v58 = vadd.f32 %v3622_v48, %v3501_v38 }
 0xfa2   : > { %v3624_v61 = vpop.f32.mrf.mxu0  ;;  %v3965_v12 = vpop.f32.mrf.mxu1 }
 0xfa3   : > { %v4004_v6 = vadd.f32 %v3965_v12, %v3621_v45  ;;  %v3625_v16 = vadd.f32 %v3624_v61, %v3503_v37  ;;  %v4048_v45 = vpop.permute.xlu0 %4047 }
 0xfa4   : > { %v3626_v41 = vpop.f32.mrf.mxu0  ;;  %v3967_v35 = vpop.f32.mrf.mxu1 }
 0xfa5   : > { %v4060_v51 = vadd.f32 %v4023_v2, %v4004_v6  ;;  %v4005_v36 = vadd.f32 %v3967_v35, %v3623_v58  ;;  %v3627_v7 = vadd.f32 %v3626_v41, %v3505_v59 }
 0xfa6   : > { %v3630_v5 = vpop.f32.mrf.mxu0  ;;  %v3969_v53 = vpop.f32.mrf.mxu1 }
 0xfa7   : > { %4076 = vst [vmem:[%s7765_s24] sm:$0xff] %v4060_v51  ;;  %v4061_v52 = vadd.f32 %v4023_v2, %v4005_v36  ;;  %v4006_v21 = vadd.f32 %v3969_v53, %v3625_v16  ;;  %v3631_v0 = vadd.f32 %v3630_v5, %v3509_v39  ;;  %v4053_v51 = vpop.permute.xlu1 %4052 }
 0xfa8   : > { %v3632_v63 = vpop.f32.mrf.mxu0  ;;  %v3971_v54 = vpop.f32.mrf.mxu1 }
 0xfa9   : > { %4077 = vst [vmem:[%s7765_s24 + $0x8] sm:$0xff] %v4061_v52  ;;  %v4062_v44 = vadd.f32 %v4028_v17, %v4006_v21  ;;  %v4007_v34 = vadd.f32 %v3971_v54, %v3627_v7  ;;  %v3633_v19 = vadd.f32 %v3632_v63, %v3511_v33 }
 0xfaa   : > { %v3634_v26 = vpop.f32.mrf.mxu0  ;;  %v3975_v46 = vpop.f32.mrf.mxu1 }
 0xfab   : > { %4078 = vst [vmem:[%s7765_s24 + $0x10] sm:$0xff] %v4062_v44  ;;  %v4063_v56 = vadd.f32 %v4028_v17, %v4007_v34  ;;  %v4008_v28 = vadd.f32 %v3975_v46, %v3631_v0  ;;  %v3635_v1 = vadd.f32 %v3634_v26, %v3513_v40  ;;  %v4058_v0 = vpop.permute.xlu0 %4057 }
 0xfac   : > { %v3636_v20 = vpop.f32.mrf.mxu0  ;;  %v3977_v11 = vpop.f32.mrf.mxu1 }
 0xfad   : > { %4079 = vst [vmem:[%s7765_s24 + $0x18] sm:$0xff] %v4063_v56  ;;  %v4064_v25 = vadd.f32 %v4033_v14, %v4008_v28  ;;  %v4009_v4 = vadd.f32 %v3977_v11, %v3633_v19  ;;  %v3637_v15 = vadd.f32 %v3636_v20, %v3515_v43 }
 0xfae   : > { %v3640_v32 = vpop.f32.mrf.mxu0  ;;  %v3979_v55 = vpop.f32.mrf.mxu1 }
 0xfaf   : > { %4080 = vst [vmem:[%s7765_s24 + $0x20] sm:$0xff] %v4064_v25  ;;  %v4065_v9 = vadd.f32 %v4033_v14, %v4009_v4  ;;  %v4010_v23 = vadd.f32 %v3979_v55, %v3635_v1  ;;  %v3641_v18 = vadd.f32 %v3640_v32, %v3519_v10 }
 0xfb0   : > { %v3642_v29 = vpop.f32.mrf.mxu0  ;;  %v3981_v13 = vpop.f32.mrf.mxu1 }
 0xfb1   : > { %4081 = vst [vmem:[%s7765_s24 + $0x28] sm:$0xff] %v4065_v9  ;;  %v4066_v22 = vadd.f32 %v4038_v42, %v4010_v23  ;;  %v4011_v49 = vadd.f32 %v3981_v13, %v3637_v15  ;;  %v3643_v38 = vadd.f32 %v3642_v29, %v7748_v31 }
 0xfb2   : > { %v3644_v60 = vpop.f32.mrf.mxu0  ;;  %v3985_v30 = vpop.f32.mrf.mxu1 }
 0xfb3   : > { %4082 = vst [vmem:[%s7765_s24 + $0x30] sm:$0xff] %v4066_v22  ;;  %v4067_v37 = vadd.f32 %v4038_v42, %v4011_v49  ;;  %v4012_v59 = vadd.f32 %v3985_v30, %v3641_v18  ;;  %v3645_v40 = vadd.f32 %v3644_v60, %v7750_v24 }
 0xfb4   : > { %v3646_v39 = vpop.f32.mrf.mxu0  ;;  %v3987_v33 = vpop.f32.mrf.mxu1 }
 0xfb5   : > { %4083 = vst [vmem:[%s7765_s24 + $0x38] sm:$0xff] %v4067_v37  ;;  %v4068_v43 = vadd.f32 %v4043_v57, %v4012_v59  ;;  %v4013_v3 = vadd.f32 %v3987_v33, %v3643_v38  ;;  %v3647_v61 = vadd.f32 %v3646_v39, %v7752_v8 }
 0xfb6   : > { %v3650_v10 = vpop.f32.mrf.mxu0  ;;  %v3989_v48 = vpop.f32.mrf.mxu1 }
 0xfb7   : > { %4084 = vst [vmem:[%s7765_s24 + $0x40] sm:$0xff] %v4068_v43  ;;  %v4069_v12 = vadd.f32 %v4043_v57, %v4013_v3  ;;  %v4014_v2 = vadd.f32 %v3989_v48, %v3645_v40  ;;  %v3651_v6 = vadd.f32 %v3650_v10, %v7754_v62 }
 0xfb8   : > { %v3652_v31 = vpop.f32.mrf.mxu0  ;;  %v3991_v58 = vpop.f32.mrf.mxu1 }
 0xfb9   : > { %4085 = vst [vmem:[%s7765_s24 + $0x48] sm:$0xff] %v4069_v12  ;;  %v4070_v41 = vadd.f32 %v4048_v45, %v4014_v2  ;;  %v4015_v24 = vadd.f32 %v3991_v58, %v3647_v61  ;;  %v3653_v36 = vadd.f32 %v3652_v31, %v7756_v47 }
 0xfba   : > { %v3654_v35 = vpop.f32.mrf.mxu0  ;;  %v3995_v16 = vpop.f32.mrf.mxu1 }
 0xfbb   : > { %4086 = vst [vmem:[%s7765_s24 + $0x50] sm:$0xff] %v4070_v41  ;;  %v4071_v5 = vadd.f32 %v4048_v45, %v4015_v24  ;;  %v4016_v8 = vadd.f32 %v3995_v16, %v3651_v6  ;;  %v3655_v7 = vadd.f32 %v3654_v35, %v7758_v50 }
 0xfbc   : > { %v3656_v53 = vpop.f32.mrf.mxu0  ;;  %v3997_v17 = vpop.f32.mrf.mxu1 }
 0xfbd   : > { %4087 = vst [vmem:[%s7765_s24 + $0x58] sm:$0xff] %v4071_v5  ;;  %v4072_v62 = vadd.f32 %v4053_v51, %v4016_v8  ;;  %v4017_v52 = vadd.f32 %v3997_v17, %v3653_v36  ;;  %v3657_v63 = vadd.f32 %v3656_v53, %v7761_v27 }
 0xfbe   : > { %v3999_v21 = vpop.f32.mrf.mxu1 }
 0xfbf   : > { %4088 = vst [vmem:[%s7765_s24 + $0x60] sm:$0xff] %v4072_v62  ;;  %v4073_v54 = vadd.f32 %v4053_v51, %v4017_v52  ;;  %v4018_v47 = vadd.f32 %v3999_v21, %v3655_v7 }
 0xfc0   : > { %v4001_v44 = vpop.f32.mrf.mxu1 }
 0xfc1   : > { %4089 = vst [vmem:[%s7765_s24 + $0x68] sm:$0xff] %v4073_v54  ;;  %v4074_v34 = vadd.f32 %v4058_v0, %v4018_v47  ;;  %v4019_v26 = vadd.f32 %v4001_v44, %v3657_v63 }
 0xfc3   : > { %4090 = vst [vmem:[%s7765_s24 + $0x70] sm:$0xff] %v4074_v34  ;;  %v4075_v50 = vadd.f32 %v4058_v0, %v4019_v26 }
 0xfc5   : > { %4091 = vst [vmem:[%s7765_s24 + $0x78] sm:$0xff] %v4075_v50 }
 0xfc6   : > { %4978 = shalt.err (!%p4975_p3)
}
 0xfc7   : > { %s4979_s7 = scalar_lea.hbm %s7793_s21, 2048  ;;  %s4983_s4 = scalar_lea.hbm %s8185_s1, 4096 }
 0xfc8   : > { %p4980_p9 = scmp.ne.s32.totalorder %s7793_s21, %s4979_s7  ;;  %p4984_p12 = scmp.lt.s32.totalorder %s7793_s21, %s8185_s1 }
 0xfc9   : > { %p4985_p10 = scmp.lt.s32.totalorder %s4983_s4, %s4979_s7 }
 0xfca   : > { %p4981_p4 = pnand %p4980_p9, %p5206_p5 }
 0xfcb   : > { %p4986_p8 = por %p4985_p10, %p4984_p12 }
 0xfcc   : > { %p4982_p7 = pneg %p4981_p4 }
 0xfce   : > { %p4987_p11 = pnand %p4986_p8, %p4982_p7 }
 0xfd0   : > { %4990 = shalt.err (!%p4987_p11)
}
 0xfd1   : > { %s5057_s30 = smov 256  }
 0xfd2   : > { %4601 = dma.vmem_to_hbm [thread:$0]  (%p5206_p5), %s7796_s0, 2048, %s7793_s21, %s7801_s3, %s5057_s30, %s5057_s30, %s8046_s29  }
 0xfd3 PF: > { %s8186_s2 = sld [smem:[#allocation17_spill]] }
 0xfd4   : > { %s8187_s23 = sld [smem:[#allocation15_spill]] }
 0xfd9   : > { %p4628_p1 = scmp.ge.s32.totalorder %s8186_s2, 2 }
 0xfda   : > { %s4121_s27 = sand.u32 1, %s8187_s23  }
 0xfdb   : > { %p4617_p0 = pnand %p4628_p1, %p5210_p6  ;;  %s4122_s6 = scalar_lea.sflag [#allocation4], %s4121_s27 }
 0xfdd   : > { %p4618_p2 = pneg %p4617_p0 }
 0xfdf   : > { %5020 = dma.done.wait (%p4618_p2), %s4122_s6, 2048  }
 0xfe0   : > { %5022 = vsyncadd (%p4618_p2), %s4122_s6, 4294965248  ;;  %s8189_s27 = sld [smem:[#allocation18_spill]]  ;;  %s8192_s2 = smov %s5029_s25 }
 0xfe1   : > { %s8190_s5 = sld [smem:[#allocation16_spill]] }
 0xfe2   : > { %s8191_s26 = sld [smem:[#allocation19_spill]] }
 0xfe6   : > { %p34_p13 = scmp.ge.s32.totalorder %s8189_s27, 4  }
 0xfe7   : > { %s8193_s25 = smov %s8190_s5 }
 0xfe8   :  { %36 = sbr.rel (!%p34_p13) target bundleno = 16 (0x10), region = 159 }
 0xfed   :  { %4127 = vsyncpa [#allocation3], 1 }
 0xfee   :  { %4129 = vsyncpa [#allocation3 + $0x1], 1 }
 0xfef   :  { %4130 = vsyncpa [#allocation6], 1 }
 0xff0   :  { %4131 = vsyncpa [#allocation9], 1 }
 0xff1   :  { %4132 = vsyncpa [#allocation4], 1 }
 0xff2   :  { %4134 = vsyncpa [#allocation4 + $0x1], 1 }

</bundles_post_ra>
